<compile_context>
chip_gen: v7x
topology: tpu7x:2x2x1
jax: 0.10.0
libtpu: 0.0.40
codegen_flags: <defaults>
</compile_context>

<pallas_src>
import functools

import jax
import jax.numpy as jnp
from jax.experimental import pallas as pl
from jax.experimental.pallas import tpu as pltpu


# -----------------------------------------------------------------------------
# helpers
# -----------------------------------------------------------------------------
_SMALL_M = 256  # below this row count, route GEMMs to plain XLA (latency win)


def _round_up(x, m):
    return ((x + m - 1) // m) * m


@functools.lru_cache(maxsize=None)
def _vmem_cap_bytes():
    # generation-aware VMEM capacity: 64 MiB/core on v7x, 128 MiB on v5e/v6e.
    try:
        return int(pltpu.get_tpu_info().vmem_capacity_bytes)
    except Exception:
        return 64 * 1024 * 1024  # conservative fallback (v7x per-core VMEM)


def _vmem_limit(needed_bytes):
    cap = _vmem_cap_bytes()
    return int(min(max(needed_bytes + (8 << 20), 16 << 20), (3 * cap) // 4))


@functools.lru_cache(maxsize=None)
def _gen_caps():
    """Per-generation matmul tile caps (tm, tn, tk)."""
    if _vmem_cap_bytes() <= 64 * 1024 * 1024:      # v7x: 64 MiB VMEM per core
        return 512, 512, 1024
    return 1024, 512, 1024                         # v5e / v6e: 128 MiB VMEM


def _pick_row_tile(M, cap):
    """Largest multiple-of-8 row tile <= cap that divides M (preferred: no row
    padding -> no residual pad / output slice copies); falls back to padding."""
    cap = max(8, min(cap, _round_up(M, 8)) // 8 * 8)
    best = None
    if M % 8 == 0:
        for c in range(cap, 7, -8):
            if M % c == 0:
                best = c
                break
    if best is not None and best * 4 >= cap:       # divisor not absurdly small
        return best, M
    return cap, _round_up(M, cap)


def _mm_tiles(M, Kp, Np):
    """Row axis tiled (M split across TensorCores), K (reduction) last grid axis."""
    tm_cap, tn_cap, tk_cap = _gen_caps()
    tm, Mp = _pick_row_tile(M, tm_cap)
    tn = next(t for t in (512, 256, 128) if t <= tn_cap and Np % t == 0)
    tk = next(t for t in (1024, 512, 256, 128) if t <= tk_cap and Kp % t == 0)
    return Mp, tm, tn, tk


def _affine_row_tile(Mp, Np):
    """Row tile for the affine kernel: ~2 MiB blocks, must divide Mp exactly."""
    cap = (2 * 1024 * 1024) // (Np * 4)
    cap = max(8, min(cap, Mp, 4096) // 8 * 8)
    for c in range(cap, 7, -8):
        if Mp % c == 0:
            return c
    return 8


# -----------------------------------------------------------------------------
# Pallas kernels
# -----------------------------------------------------------------------------
def _matmul_stats_kernel(a_ref, b_ref, o_ref, sum_ref, sq_ref, acc_ref):
    """bf16 @ bf16 -> f32 accumulator; last k step writes the bf16 output tile plus
    per-tile column sum / sum-of-squares (row 0 of the stats tile only)."""
    @pl.when(pl.program_id(2) == 0)
    def _():
        acc_ref[...] = jnp.zeros_like(acc_ref)

    acc_ref[...] += jnp.dot(a_ref[...], b_ref[...],
                            preferred_element_type=jnp.float32)

    @pl.when(pl.program_id(2) == pl.num_programs(2) - 1)
    def _():
        acc = acc_ref[...]
        o_ref[...] = acc.astype(o_ref.dtype)
        sum_ref[0:1, :] = jnp.sum(acc, axis=0, keepdims=True)
        sq_ref[0:1, :] = jnp.sum(acc * acc, axis=0, keepdims=True)


def _matmul_bias_kernel(a_ref, b_ref, bias_ref, o_ref, acc_ref):
    """bf16 @ bf16 -> f32 accumulator, bias fused into the epilogue."""
    @pl.when(pl.program_id(2) == 0)
    def _():
        acc_ref[...] = jnp.zeros_like(acc_ref)

    acc_ref[...] += jnp.dot(a_ref[...], b_ref[...],
                            preferred_element_type=jnp.float32)

    @pl.when(pl.program_id(2) == pl.num_programs(2) - 1)
    def _():
        o_ref[...] = (acc_ref[...] + bias_ref[...]).astype(o_ref.dtype)


@functools.lru_cache(maxsize=None)
def _matmul_stats_call(Mp, Kp, Np, tm, tn, tk):
    gm = Mp // tm
    needed = 2 * (tm * tk + tk * tn) * 2 + tm * tn * 4 + 2 * tm * tn * 2 + 4 * 8 * tn * 4
    return pl.pallas_call(
        _matmul_stats_kernel,
        out_shape=(jax.ShapeDtypeStruct((Mp, Np), jnp.bfloat16),
                   jax.ShapeDtypeStruct((gm * 8, Np), jnp.float32),
                   jax.ShapeDtypeStruct((gm * 8, Np), jnp.float32)),
        grid_spec=pltpu.PrefetchScalarGridSpec(
            num_scalar_prefetch=0,
            grid=(gm, Np // tn, Kp // tk),
            in_specs=[pl.BlockSpec((tm, tk), lambda i, j, k: (i, k)),
                      pl.BlockSpec((tk, tn), lambda i, j, k: (k, j))],
            out_specs=[pl.BlockSpec((tm, tn), lambda i, j, k: (i, j)),
                       pl.BlockSpec((8, tn), lambda i, j, k: (i, j)),
                       pl.BlockSpec((8, tn), lambda i, j, k: (i, j))],
            scratch_shapes=[pltpu.VMEM((tm, tn), jnp.float32)]),
        compiler_params=pltpu.CompilerParams(
            dimension_semantics=("parallel", "parallel", "arbitrary"),
            vmem_limit_bytes=_vmem_limit(needed)),
    )


@functools.lru_cache(maxsize=None)
def _matmul_bias_call(Mp, Kp, Np, tm, tn, tk, out_dtype):
    needed = 2 * (tm * tk + tk * tn) * 2 + tm * tn * 4 + 2 * tm * tn * 4 + 2 * tn * 4
    return pl.pallas_call(
        _matmul_bias_kernel,
        out_shape=jax.ShapeDtypeStruct((Mp, Np), out_dtype),
        grid_spec=pltpu.PrefetchScalarGridSpec(
            num_scalar_prefetch=0,
            grid=(Mp // tm, Np // tn, Kp // tk),
            in_specs=[pl.BlockSpec((tm, tk), lambda i, j, k: (i, k)),
                      pl.BlockSpec((tk, tn), lambda i, j, k: (k, j)),
                      pl.BlockSpec((1, tn), lambda i, j, k: (0, j))],
            out_specs=pl.BlockSpec((tm, tn), lambda i, j, k: (i, j)),
            scratch_shapes=[pltpu.VMEM((tm, tn), jnp.float32)]),
        compiler_params=pltpu.CompilerParams(
            dimension_semantics=("parallel", "parallel", "arbitrary"),
            vmem_limit_bytes=_vmem_limit(needed)),
    )


def matmul_bn_stats(cols, wmat, M):
    """cols (M, Kp) @ wmat (Kp, Np) -> bf16 (Mp, Np) output (kept at padded shape)
    plus f32 per-channel batch mean / biased variance from the epilogue sums."""
    Kp, Np = wmat.shape
    Mp, tm, tn, tk = _mm_tiles(M, Kp, Np)
    a = cols.astype(jnp.bfloat16)
    if Mp != M:
        a = jnp.pad(a, ((0, Mp - M), (0, 0)))       # zero rows: no effect on sums
    out, s, q = _matmul_stats_call(Mp, Kp, Np, tm, tn, tk)(a, wmat)
    gm = Mp // tm
    col_sum = jnp.sum(s.reshape(gm, 8, Np)[:, 0, :], axis=0)
    col_sq = jnp.sum(q.reshape(gm, 8, Np)[:, 0, :], axis=0)
    mean = col_sum / M
    var = jnp.maximum(col_sq / M - mean * mean, 0.0)
    return out, mean, var, Mp


def linear(x, wmat, bias):
    """x (M, K) @ pre-padded wmat (Kp, Np) + bias; tiny M goes straight to XLA."""
    M, K = x.shape
    Kp, Np = wmat.shape
    nout = bias.shape[0]
    if M < _SMALL_M:
        y = jnp.dot(x.astype(jnp.bfloat16), wmat, preferred_element_type=jnp.float32)
        return y[:, :nout] + bias.astype(jnp.float32)
    Mp, tm, tn, tk = _mm_tiles(M, Kp, Np)
    a = x.astype(jnp.bfloat16)
    if (Mp, Kp) != (M, K):
        a = jnp.pad(a, ((0, Mp - M), (0, Kp - K)))
    bias_p = jnp.pad(bias.astype(jnp.float32), (0, Np - nout)).reshape(1, Np)
    out = _matmul_bias_call(Mp, Kp, Np, tm, tn, tk, jnp.float32)(a, wmat, bias_p)
    return out[:M, :nout]


def _affine_kernel(x_ref, s_ref, b_ref, o_ref, *, relu):
    y = x_ref[...].astype(jnp.float32) * s_ref[...] + b_ref[...]
    if relu:
        y = jnp.maximum(y, 0.0)
    o_ref[...] = y.astype(o_ref.dtype)


def _affine_res_kernel(x_ref, s_ref, b_ref, r_ref, o_ref, *, relu):
    y = (x_ref[...].astype(jnp.float32) * s_ref[...] + b_ref[...]
         + r_ref[...].astype(jnp.float32))
    if relu:
        y = jnp.maximum(y, 0.0)
    o_ref[...] = y.astype(o_ref.dtype)


@functools.lru_cache(maxsize=None)
def _affine_call(Mp, C, tm, relu, with_residual, out_dtype):
    kern = functools.partial(
        _affine_res_kernel if with_residual else _affine_kernel, relu=relu)
    in_specs = [pl.BlockSpec((tm, C), lambda i: (i, 0)),
                pl.BlockSpec((1, C), lambda i: (0, 0)),
                pl.BlockSpec((1, C), lambda i: (0, 0))]
    if with_residual:
        in_specs.append(pl.BlockSpec((tm, C), lambda i: (i, 0)))
    needed = (6 + (2 if with_residual else 0)) * tm * C * 4 + 4 * C * 4
    return pl.pallas_call(
        kern,
        out_shape=jax.ShapeDtypeStruct((Mp, C), out_dtype),
        grid_spec=pltpu.PrefetchScalarGridSpec(
            num_scalar_prefetch=0,
            grid=(Mp // tm,),
            in_specs=in_specs,
            out_specs=pl.BlockSpec((tm, C), lambda i: (i, 0))),
        compiler_params=pltpu.CompilerParams(
            dimension_semantics=("parallel",),
            vmem_limit_bytes=_vmem_limit(needed)),
    )


def affine_act(x2d, scale, shift, residual=None, relu=False, out_dtype=jnp.bfloat16):
    """y = x * scale + shift (+ residual), optional ReLU; consumes the matmul output
    at its padded (Mp, Np) shape with a row tile dividing Mp (no re-pad / re-slice)."""
    Mp, Np = x2d.shape
    tm = _affine_row_tile(Mp, Np)
    scale = scale.reshape(1, Np).astype(jnp.float32)
    shift = shift.reshape(1, Np).astype(jnp.float32)
    call = _affine_call(Mp, Np, tm, relu, residual is not None, out_dtype)
    if residual is None:
        return call(x2d, scale, shift)
    return call(x2d, scale, shift, residual)


def _meanpool_kernel(x_ref, o_ref):
    o_ref[...] = jnp.mean(x_ref[...].astype(jnp.float32), axis=1, keepdims=True)


@functools.lru_cache(maxsize=None)
def _meanpool_call(G, S, C, gb):
    return jax.jit(pl.pallas_call(
        _meanpool_kernel,
        out_shape=jax.ShapeDtypeStruct((G, 1, C), jnp.float32),
        grid=(G // gb,),
        in_specs=[pl.BlockSpec((gb, S, C), lambda i: (i, 0, 0))],
        out_specs=pl.BlockSpec((gb, 1, C), lambda i: (i, 0, 0)),
        compiler_params=pltpu.CompilerParams(
            dimension_semantics=("parallel",),
            vmem_limit_bytes=_vmem_limit(4 * gb * S * C + 4 * gb * C)),
    ))


def meanpool_pallas(x):
    """x: (G, S, C) -> mean over axis 1 -> (G, C) float32; several rows per step."""
    G, S, C = x.shape
    budget = max(1, (8 << 20) // max(1, S * C * 4))
    gb = 1
    for d in range(min(G, budget), 0, -1):
        if G % d == 0:
            gb = d
            break
    return _meanpool_call(G, S, C, gb)(x)[:, 0, :]


# -----------------------------------------------------------------------------
# NN building blocks (channel-padded NHWC layout, pre-prepared weights)
# -----------------------------------------------------------------------------
def batchnorm_train(x2d, gamma, beta, eps=1e-5):
    """PyTorch training-mode BatchNorm over rows of (M, C): biased batch stats.
    Only used on tiny (batch-sized) tensors in the fusion head -> plain XLA."""
    x2d = x2d.astype(jnp.float32)
    mean = jnp.mean(x2d, axis=0)
    var = jnp.maximum(jnp.mean(x2d * x2d, axis=0) - mean * mean, 0.0)
    scale = gamma * jax.lax.rsqrt(var + eps)
    return x2d * scale + (beta - mean * scale)


def conv2d_bn(x, wmat, gamma, beta, kh, kw, stride=1, pad=None, relu=False,
              residual=None, eps=1e-5, out_dtype=jnp.bfloat16):
    """NHWC conv (im2col + fused matmul/BN-stats kernel) followed by training-mode
    BatchNorm, optional residual add and ReLU.  x carries channel padding to 128
    (pad lanes are all-zero); wmat is the matching pre-padded bf16 (K, Np) matrix;
    gamma/beta are zero-padded so padded output channels stay exactly zero."""
    N, H, W, Cx = x.shape
    Kp, Np = wmat.shape
    if pad is None:
        pad = (kh - 1) // 2
    Ho = (H + 2 * pad - kh) // stride + 1
    Wo = (W + 2 * pad - kw) // stride + 1
    M = N * Ho * Wo

    if kh == 1 and kw == 1 and pad == 0:
        # TODO(synk): for stride>1 this strided slice materialises a downsample copy;
        # fold the row subsampling into the matmul A index_map instead.
        xs = x if stride == 1 else x[:, ::stride, ::stride, :]
        cols = xs.reshape(M, Cx)
    else:
        # TODO(synk): fold the (kh, kw) window into the matmul K-grid (manual-DMA
        # implicit GEMM over the padded NHWC activation) so the im2col matrix is
        # never materialised in HBM at large resolutions.
        xp = jnp.pad(x, ((0, 0), (pad, pad), (pad, pad), (0, 0)))
        patches = [xp[:, i:i + stride * Ho:stride, j:j + stride * Wo:stride, :]
                   for i in range(kh) for j in range(kw)]
        if kh * kw * Cx < Kp:   # stem only: raw 3-channel input, K padded to 128
            patches.append(jnp.zeros((N, Ho, Wo, Kp - kh * kw * Cx), x.dtype))
        cols = jnp.concatenate(patches, axis=-1).reshape(M, Kp)

    r2d = residual.reshape(M, Np) if residual is not None else None

    if M < _SMALL_M:
        # tiny GEMMs (attention head / 1x1 nonlinear block at M=O(batch)): XLA has
        # less fixed cost than a pallas_call here.
        acc = jnp.dot(cols.astype(jnp.bfloat16), wmat,
                      preferred_element_type=jnp.float32)
        mean = jnp.mean(acc, axis=0)
        var = jnp.maximum(jnp.mean(acc * acc, axis=0) - mean * mean, 0.0)
        scale = gamma * jax.lax.rsqrt(var + eps)
        y = acc * scale + (beta - mean * scale)
        if r2d is not None:
            y = y + r2d.astype(jnp.float32)
        if relu:
            y = jnp.maximum(y, 0.0)
        return y.astype(out_dtype).reshape(N, Ho, Wo, Np)

    out_p, mean, var, Mp = matmul_bn_stats(cols, wmat, M)
    scale = gamma * jax.lax.rsqrt(var + eps)
    shift = beta - mean * scale
    if r2d is not None and Mp != M:
        r2d = jnp.pad(r2d, ((0, Mp - M), (0, 0)))
    y = affine_act(out_p, scale, shift, residual=r2d, relu=relu, out_dtype=out_dtype)
    if Mp != M:
        y = y[:M]
    return y.reshape(N, Ho, Wo, Np)


def max_pool2d(x, ksize=3, stride=2, pad=1):
    """3x3/s2 max pool via a running maximum; XLA glue (padded channels stay 0)."""
    N, H, W, C = x.shape
    Ho = (H + 2 * pad - ksize) // stride + 1
    Wo = (W + 2 * pad - ksize) // stride + 1
    xp = jnp.pad(x, ((0, 0), (pad, pad), (pad, pad), (0, 0)),
                 constant_values=-jnp.inf)
    out = None
    for kh in range(ksize):
        for kw in range(ksize):
            win = xp[:, kh:kh + stride * Ho:stride, kw:kw + stride * Wo:stride, :]
            out = win if out is None else jnp.maximum(out, win)
    return out


# -----------------------------------------------------------------------------
# ResNet50 pieces (per-stage jit so identical-shape blocks share compilations)
# -----------------------------------------------------------------------------
_LAYER_CFG = [(64, 3, 1), (128, 4, 2), (256, 6, 2), (512, 3, 1)]  # layer4 stride -> 1


def _stem_body(frames, p):
    x = conv2d_bn(frames, p['conv1'], p['bn1'][0], p['bn1'][1],
                  kh=7, kw=7, stride=2, pad=3, relu=True)
    return max_pool2d(x, ksize=3, stride=2, pad=1)


_stem_jit = jax.jit(_stem_body)


def _bottleneck_body(x, p, stride, conv2_k, has_down):
    """Bottleneck / Bottleneck1x1: conv-bn-relu x2, conv-bn, +residual, relu."""
    residual = x
    out = conv2d_bn(x, p['conv1'], p['bn1'][0], p['bn1'][1], kh=1, kw=1,
                    stride=1, pad=0, relu=True)
    out = conv2d_bn(out, p['conv2'], p['bn2'][0], p['bn2'][1], kh=conv2_k,
                    kw=conv2_k, stride=stride, pad=(conv2_k - 1) // 2, relu=True)
    if has_down:
        residual = conv2d_bn(x, p['down_conv'], p['down_bn'][0], p['down_bn'][1],
                             kh=1, kw=1, stride=stride, pad=0, relu=False)
    out = conv2d_bn(out, p['conv3'], p['bn3'][0], p['bn3'][1], kh=1, kw=1,
                    stride=1, pad=0, relu=True, residual=residual)
    return out


@functools.lru_cache(maxsize=None)
def _bottleneck_jit(stride, conv2_k, has_down):
    def fn(x, p):
        return _bottleneck_body(x, p, stride, conv2_k, has_down)
    return jax.jit(fn)


def resnet50_forward(frames, params):
    x = _stem_jit(frames, {'conv1': params['conv1'], 'bn1': params['bn1']})
    for li, (_, nblocks, stride) in enumerate(_LAYER_CFG):
        for bi in range(nblocks):
            s = stride if bi == 0 else 1
            x = _bottleneck_jit(s, 3, bi == 0)(x, params['layers'][li][bi])
    return x


# -----------------------------------------------------------------------------
# Deterministic parameter construction (synthetic; no checkpoint load)
# -----------------------------------------------------------------------------
class ParamGen:
    def __init__(self, seed):
        self._key = jax.random.PRNGKey(seed)

    def _next(self):
        self._key, sub = jax.random.split(self._key)
        return sub

    def conv(self, cout, cin, kh, kw):
        fan_in = float(cin * kh * kw)
        return (jax.random.normal(self._next(), (cout, cin, kh, kw), jnp.float32)
                / jnp.sqrt(fan_in))

    def linear(self, cout, cin):
        w = jax.random.normal(self._next(), (cout, cin), jnp.float32) / jnp.sqrt(float(cin))
        return w, jnp.zeros((cout,), jnp.float32)

    def bn(self, c):
        """gamma=1 / beta=0 for real channels, zero-padded to the 128-padded width so
        padded output channels stay exactly zero through BN/ReLU/residual."""
        cp = _round_up(c, 128)
        gamma = jnp.zeros((cp,), jnp.float32).at[:c].set(1.0)
        return gamma, jnp.zeros((cp,), jnp.float32)


def prep_conv(w, pad_cin=True):
    """torch (Cout, Cin, KH, KW) -> bf16 (K, Np) matrix, pre-padded once at
    construction time.  With pad_cin, Cin is padded to 128 *per tap* so the weight
    rows line up with channel-padded activations; the stem (Cin=3) keeps raw Cin and
    pads K only at the end (matching the im2col's trailing zero block)."""
    cout, cin, kh, kw = w.shape
    coutp = _round_up(cout, 128)
    wt = jnp.transpose(w, (2, 3, 1, 0))                      # (kh, kw, cin, cout)
    if pad_cin:
        cinp = _round_up(cin, 128)
        wt = jnp.pad(wt, ((0, 0), (0, 0), (0, cinp - cin), (0, coutp - cout)))
        wmat = wt.reshape(kh * kw * cinp, coutp)
    else:
        wt = jnp.pad(wt, ((0, 0), (0, 0), (0, 0), (0, coutp - cout)))
        wmat = wt.reshape(kh * kw * cin, coutp)
        K = wmat.shape[0]
        wmat = jnp.pad(wmat, ((0, _round_up(K, 128) - K), (0, 0)))
    return wmat.astype(jnp.bfloat16)


def prep_linear(w, b):
    """torch Linear (out, in) weight -> pre-padded bf16 (in, out); bias kept f32."""
    cout, cin = w.shape
    wmat = jnp.pad(w.T, ((0, _round_up(cin, 128) - cin),
                         (0, _round_up(cout, 128) - cout))).astype(jnp.bfloat16)
    return wmat, b


def make_bottleneck_params(pg, inplanes, planes, conv2_k, with_downsample):
    p = {'conv1': prep_conv(pg.conv(planes, inplanes, 1, 1)), 'bn1': pg.bn(planes),
         'conv2': prep_conv(pg.conv(planes, planes, conv2_k, conv2_k)), 'bn2': pg.bn(planes),
         'conv3': prep_conv(pg.conv(planes * 4, planes, 1, 1)), 'bn3': pg.bn(planes * 4)}
    if with_downsample:
        p['down_conv'] = prep_conv(pg.conv(planes * 4, inplanes, 1, 1))
        p['down_bn'] = pg.bn(planes * 4)
    return p


def make_resnet50_params(pg):
    params = {'conv1': prep_conv(pg.conv(64, 3, 7, 7), pad_cin=False),
              'bn1': pg.bn(64)}
    layers = []
    inplanes = 64
    for planes, nblocks, _ in _LAYER_CFG:
        layer = []
        for bi in range(nblocks):
            layer.append(make_bottleneck_params(pg, inplanes, planes, 3, bi == 0))
            inplanes = planes * 4
        layers.append(layer)
    params['layers'] = layers
    return params


def make_model_params(pg, num_classes):
    return {
        'base_appearance': make_resnet50_params(pg),
        'base_gait': make_resnet50_params(pg),
        'bn': pg.bn(2048),                                   # BatchNorm1d(2048)
        'classifier': prep_linear(*pg.linear(num_classes, 2048)),
        'att_conv1': prep_conv(pg.conv(512, 2048, 1, 1)), 'att_bn1': pg.bn(512),
        'att_conv2': prep_conv(pg.conv(64, 512, 1, 1)), 'att_bn2': pg.bn(64),
        'att_conv3': prep_conv(pg.conv(1, 64, 1, 1)), 'att_bn3': pg.bn(1),
        'groupingbn': pg.bn(2048),                           # BatchNorm2d(2048)
        'nonlinear': make_bottleneck_params(pg, 2048, 512, 1, False),   # Bottleneck1x1
        # TODO(synk): the `head` sub-network (Linear-BN-ReLU-Linear-ReLU) only feeds
        # htri/cent losses; dead for loss == {'xent'} so its params are omitted.
    }


# -----------------------------------------------------------------------------
# ResNet50_2Branch_TP_KD forward (training path, loss == {'xent'} -> returns y)
# -----------------------------------------------------------------------------
def branch_features(v, base_params):
    # v: (b, 3, t, H, W) -> (b, 2048, t)
    b, c, t, H, W = v.shape
    frames = jnp.transpose(v, (0, 2, 3, 4, 1)).reshape(b * t, H, W, c)   # NHWC frames
    feat = resnet50_forward(frames, base_params)                         # (b*t, h, w, 2048)
    bt, h, w, C = feat.shape
    pooled = meanpool_pallas(feat.reshape(bt, h * w, C))                 # global avg pool
    return jnp.transpose(pooled.reshape(b, t, C), (0, 2, 1))             # (b, 2048, t)


def _head_body(p, xa, xg):
    b = xa.shape[0]
    # F.avg_pool1d over the whole temporal axis
    f_a = meanpool_pallas(jnp.transpose(xa, (0, 2, 1)))                  # (b, 2048)
    f_g = meanpool_pallas(jnp.transpose(xg, (0, 2, 1)))                  # (b, 2048)

    # f_cat: torch (b, 2048, 2, 1) NCHW -> here NHWC (b, 2, 1, 2048)
    f_cat = jnp.stack([f_a, f_g], axis=1)[:, :, None, :]

    # attconv: 1x1 conv(+bias) -> BN2d(train) -> ReLU, x3.  A conv bias immediately
    # followed by training-mode BN cancels exactly, so it is not applied.
    a = conv2d_bn(f_cat, p['att_conv1'], p['att_bn1'][0], p['att_bn1'][1],
                  kh=1, kw=1, relu=True)
    a = conv2d_bn(a, p['att_conv2'], p['att_bn2'][0], p['att_bn2'][1],
                  kh=1, kw=1, relu=True)
    att = conv2d_bn(a, p['att_conv3'], p['att_bn3'][0], p['att_bn3'][1],
                    kh=1, kw=1, relu=True)                               # (b, 2, 1, 128p)

    # softmax over torch dim=2 (the size-2 axis == NHWC axis 1); only the single real
    # output channel of the attention conv participates.
    att = jax.nn.softmax(att[..., :1].astype(jnp.float32), axis=1)       # (b, 2, 1, 1)

    out = f_cat * att                                                    # (b, 2, 1, 2048)
    f = out[:, 0, 0, :] + out[:, 1, 0, :]                                # (b, 2048)

    f = batchnorm_train(f, p['groupingbn'][0], p['groupingbn'][1])       # BatchNorm2d(2048)
    f = _bottleneck_body(f[:, None, None, :], p['nonlinear'],
                         stride=1, conv2_k=1, has_down=False)            # Bottleneck1x1
    f = f.reshape(b, -1).astype(jnp.float32)
    f = batchnorm_train(f, p['bn'][0], p['bn'][1])                       # BatchNorm1d(2048)
    return linear(f, p['classifier'][0], p['classifier'][1])             # (b, num_classes)


_head_jit = jax.jit(_head_body)

_HEAD_KEYS = ('att_conv1', 'att_bn1', 'att_conv2', 'att_bn2', 'att_conv3', 'att_bn3',
              'groupingbn', 'nonlinear', 'bn', 'classifier')


def model_forward(params, x, x_g, training=True):
    xa = branch_features(x, params['base_appearance'])                   # (b, 2048, t)
    if not training:
        return xa
    xg = branch_features(x_g, params['base_gait'])                       # (b, 2048, t)
    return _head_jit({k: params[k] for k in _HEAD_KEYS}, xa, xg)         # loss == {'xent'}


if __name__ == "__main__":
    num_classes = 10
    b, t, H, W = 2, 4, 32, 32
    key = jax.random.PRNGKey(0)
    kx, kg = jax.random.split(key)
    x = jax.random.normal(kx, (b, 3, t, H, W), jnp.float32)
    x_g = jax.random.normal(kg, (b, 3, t, H, W), jnp.float32)

    params = make_model_params(ParamGen(seed=42), num_classes)

    y = model_forward(params, x, x_g, training=True)
    y = jax.block_until_ready(y)
    assert y.shape == (b, num_classes) and y.dtype == jnp.float32
    print("KERNEL_OK")
</pallas_src>

<mosaic_0001>
module attributes {stable_mosaic.version = 11 : i64} {
  func.func @_matmul_stats_kernel(%arg0: i32, %arg1: i32, %arg2: i32, %arg3: memref<512x256xbf16, #tpu.memory_space<vmem>>, %arg4: memref<256x128xbf16, #tpu.memory_space<vmem>>, %arg5: memref<512x128xbf16, #tpu.memory_space<vmem>>, %arg6: memref<8x128xf32, #tpu.memory_space<vmem>>, %arg7: memref<8x128xf32, #tpu.memory_space<vmem>>, %arg8: memref<512x128xf32, #tpu.memory_space<vmem>>) attributes {dimension_semantics = [#tpu.dimension_semantics<parallel>, #tpu.dimension_semantics<parallel>, #tpu.dimension_semantics<arbitrary>], iteration_bounds = array<i64: 4, 1, 1>, scalar_prefetch = 0 : i64, scratch_operands = 1 : i64, tpu.core_type = #tpu.core_type<tc>, window_params = [{transform_indices = @transform_0, window_bounds = array<i64: 512, 256>}, {transform_indices = @transform_1, window_bounds = array<i64: 256, 128>}, {transform_indices = @transform_2, window_bounds = array<i64: 512, 128>}, {transform_indices = @transform_3, window_bounds = array<i64: 8, 128>}, {transform_indices = @transform_4, window_bounds = array<i64: 8, 128>}]} {
    %c0_i32 = arith.constant 0 : i32
    %0 = arith.cmpi eq, %arg2, %c0_i32 : i32
    %1 = arith.extui %0 : i1 to i32
    %c0_i32_0 = arith.constant 0 : i32
    %2 = arith.cmpi ne, %1, %c0_i32_0 : i32
    scf.if %2 {
      %cst_10 = arith.constant 0.000000e+00 : f32
      %12 = vector.broadcast %cst_10 : f32 to vector<512x128xf32>
      %c0_11 = arith.constant 0 : index
      %c0_12 = arith.constant 0 : index
      %13 = vector.load %arg8[%c0_11, %c0_12] : memref<512x128xf32, #tpu.memory_space<vmem>>, vector<512x128xf32>
      tpu.vector_store %arg8[%c0_11, %c0_12], %12 {strides = array<i32>} : memref<512x128xf32, #tpu.memory_space<vmem>>, vector<512x128xf32>,
    } else {
    }
    %c0 = arith.constant 0 : index
    %c0_1 = arith.constant 0 : index
    %3 = vector.load %arg8[%c0, %c0_1] : memref<512x128xf32, #tpu.memory_space<vmem>>, vector<512x128xf32>
    %c0_2 = arith.constant 0 : index
    %c0_3 = arith.constant 0 : index
    %4 = vector.load %arg3[%c0_2, %c0_3] : memref<512x256xbf16, #tpu.memory_space<vmem>>, vector<512x256xbf16>
    %c0_4 = arith.constant 0 : index
    %c0_5 = arith.constant 0 : index
    %5 = vector.load %arg4[%c0_4, %c0_5] : memref<256x128xbf16, #tpu.memory_space<vmem>>, vector<256x128xbf16>
    %cst = arith.constant dense<0.000000e+00> : vector<512x128xf32>
    %6 = tpu.matmul %4, %5, %cst {dimension_numbers = #tpu.dot_dimension_numbers<[1], [0], [0], [1], [0, 0, 1, 1], [], []>} : vector<512x256xbf16>, vector<256x128xbf16>, vector<512x128xf32> -> vector<512x128xf32>
    %7 = arith.addf %3, %6 : vector<512x128xf32>
    %c0_6 = arith.constant 0 : index
    %c0_7 = arith.constant 0 : index
    %8 = vector.load %arg8[%c0_6, %c0_7] : memref<512x128xf32, #tpu.memory_space<vmem>>, vector<512x128xf32>
    tpu.vector_store %arg8[%c0_6, %c0_7], %7 {strides = array<i32>} : memref<512x128xf32, #tpu.memory_space<vmem>>, vector<512x128xf32>,
    %c0_i32_8 = arith.constant 0 : i32
    %9 = arith.cmpi eq, %arg2, %c0_i32_8 : i32
    %10 = arith.extui %9 : i1 to i32
    %c0_i32_9 = arith.constant 0 : i32
    %11 = arith.cmpi ne, %10, %c0_i32_9 : i32
    scf.if %11 {
      %c0_10 = arith.constant 0 : index
      %c0_11 = arith.constant 0 : index
      %12 = vector.load %arg8[%c0_10, %c0_11] : memref<512x128xf32, #tpu.memory_space<vmem>>, vector<512x128xf32>
      %13 = arith.truncf %12 : vector<512x128xf32> to vector<512x128xbf16>
      %c0_12 = arith.constant 0 : index
      %c0_13 = arith.constant 0 : index
      %14 = vector.load %arg5[%c0_12, %c0_13] : memref<512x128xbf16, #tpu.memory_space<vmem>>, vector<512x128xbf16>
      tpu.vector_store %arg5[%c0_12, %c0_13], %13 {strides = array<i32>} : memref<512x128xbf16, #tpu.memory_space<vmem>>, vector<512x128xbf16>,
      %cst_14 = arith.constant dense<0.000000e+00> : vector<128xf32>
      %15 = vector.multi_reduction <add>, %12, %cst_14 [0] : vector<512x128xf32> to vector<128xf32>
      %16 = vector.shape_cast %15 : vector<128xf32> to vector<1x128xf32>
      %c0_15 = arith.constant 0 : index
      %c0_16 = arith.constant 0 : index
      %17 = vector.load %arg6[%c0_15, %c0_16] : memref<8x128xf32, #tpu.memory_space<vmem>>, vector<1x128xf32>
      tpu.vector_store %arg6[%c0_15, %c0_16], %16 {strides = array<i32>} : memref<8x128xf32, #tpu.memory_space<vmem>>, vector<1x128xf32>,
      %18 = arith.mulf %12, %12 : vector<512x128xf32>
      %cst_17 = arith.constant dense<0.000000e+00> : vector<128xf32>
      %19 = vector.multi_reduction <add>, %18, %cst_17 [0] : vector<512x128xf32> to vector<128xf32>
      %20 = vector.shape_cast %19 : vector<128xf32> to vector<1x128xf32>
      %c0_18 = arith.constant 0 : index
      %c0_19 = arith.constant 0 : index
      %21 = vector.load %arg7[%c0_18, %c0_19] : memref<8x128xf32, #tpu.memory_space<vmem>>, vector<1x128xf32>
      tpu.vector_store %arg7[%c0_18, %c0_19], %20 {strides = array<i32>} : memref<8x128xf32, #tpu.memory_space<vmem>>, vector<1x128xf32>,
    } else {
    }
    return
  }
  func.func @transform_0(%arg0: i32, %arg1: i32, %arg2: i32) -> (i32, i32) {
    %c0_i32 = arith.constant 0 : i32
    return %arg0, %arg2 : i32, i32
  }
  func.func @transform_1(%arg0: i32, %arg1: i32, %arg2: i32) -> (i32, i32) {
    %c0_i32 = arith.constant 0 : i32
    return %arg2, %arg1 : i32, i32
  }
  func.func @transform_2(%arg0: i32, %arg1: i32, %arg2: i32) -> (i32, i32) {
    %c0_i32 = arith.constant 0 : i32
    return %arg0, %arg1 : i32, i32
  }
  func.func @transform_3(%arg0: i32, %arg1: i32, %arg2: i32) -> (i32, i32) {
    %c0_i32 = arith.constant 0 : i32
    return %arg0, %arg1 : i32, i32
  }
  func.func @transform_4(%arg0: i32, %arg1: i32, %arg2: i32) -> (i32, i32) {
    %c0_i32 = arith.constant 0 : i32
    return %arg0, %arg1 : i32, i32
  }
}

module attributes {stable_mosaic.version = 11 : i64} {
  func.func @_affine_kernel(%arg0: i32, %arg1: memref<2048x128xbf16, #tpu.memory_space<vmem>>, %arg2: memref<1x128xf32, #tpu.memory_space<vmem>>, %arg3: memref<1x128xf32, #tpu.memory_space<vmem>>, %arg4: memref<2048x128xbf16, #tpu.memory_space<vmem>>) attributes {dimension_semantics = [#tpu.dimension_semantics<parallel>], iteration_bounds = array<i64: 1>, scalar_prefetch = 0 : i64, scratch_operands = 0 : i64, tpu.core_type = #tpu.core_type<tc>, window_params = [{transform_indices = @transform_0, window_bounds = array<i64: 2048, 128>}, {pipeline_mode = #tpu.pipeline_mode<synchronous>, transform_indices = @transform_1, window_bounds = array<i64: 1, 128>}, {pipeline_mode = #tpu.pipeline_mode<synchronous>, transform_indices = @transform_2, window_bounds = array<i64: 1, 128>}, {transform_indices = @transform_3, window_bounds = array<i64: 2048, 128>}]} {
    %c0 = arith.constant 0 : index
    %c0_0 = arith.constant 0 : index
    %0 = vector.load %arg1[%c0, %c0_0] : memref<2048x128xbf16, #tpu.memory_space<vmem>>, vector<2048x128xbf16>
    %1 = arith.extf %0 : vector<2048x128xbf16> to vector<2048x128xf32>
    %c0_1 = arith.constant 0 : index
    %c0_2 = arith.constant 0 : index
    %2 = vector.load %arg2[%c0_1, %c0_2] : memref<1x128xf32, #tpu.memory_space<vmem>>, vector<1x128xf32>
    %3 = vector.broadcast %2 : vector<1x128xf32> to vector<2048x128xf32>
    %4 = arith.mulf %1, %3 : vector<2048x128xf32>
    %c0_3 = arith.constant 0 : index
    %c0_4 = arith.constant 0 : index
    %5 = vector.load %arg3[%c0_3, %c0_4] : memref<1x128xf32, #tpu.memory_space<vmem>>, vector<1x128xf32>
    %6 = vector.broadcast %5 : vector<1x128xf32> to vector<2048x128xf32>
    %7 = arith.addf %4, %6 : vector<2048x128xf32>
    %cst = arith.constant 0.000000e+00 : f32
    %8 = vector.broadcast %cst : f32 to vector<2048x128xf32>
    %9 = arith.maximumf %7, %8 : vector<2048x128xf32>
    %10 = arith.truncf %9 : vector<2048x128xf32> to vector<2048x128xbf16>
    %c0_5 = arith.constant 0 : index
    %c0_6 = arith.constant 0 : index
    %11 = vector.load %arg4[%c0_5, %c0_6] : memref<2048x128xbf16, #tpu.memory_space<vmem>>, vector<2048x128xbf16>
    tpu.vector_store %arg4[%c0_5, %c0_6], %10 {strides = array<i32>} : memref<2048x128xbf16, #tpu.memory_space<vmem>>, vector<2048x128xbf16>,
    return
  }
  func.func @transform_0(%arg0: i32) -> (i32, i32) {
    %c0_i32 = arith.constant 0 : i32
    %c0_i32_0 = arith.constant 0 : i32
    return %arg0, %c0_i32 : i32, i32
  }
  func.func @transform_1(%arg0: i32) -> (i32, i32) {
    %c0_i32 = arith.constant 0 : i32
    %c0_i32_0 = arith.constant 0 : i32
    %c0_i32_1 = arith.constant 0 : i32
    return %c0_i32, %c0_i32_0 : i32, i32
  }
  func.func @transform_2(%arg0: i32) -> (i32, i32) {
    %c0_i32 = arith.constant 0 : i32
    %c0_i32_0 = arith.constant 0 : i32
    %c0_i32_1 = arith.constant 0 : i32
    return %c0_i32, %c0_i32_0 : i32, i32
  }
  func.func @transform_3(%arg0: i32) -> (i32, i32) {
    %c0_i32 = arith.constant 0 : i32
    %c0_i32_0 = arith.constant 0 : i32
    return %arg0, %c0_i32 : i32, i32
  }
}

</mosaic_0001>

<bundles_post_ra>
// kernel: _stem_body.2
= control target key start
LH: loop header
LB: loop body
LE: loop exit
PB: predicated region body
PF: predicated region fallthrough
CT: control target
= control target key end

     0   :  { %s2788_s15 = smov 0   ;;  %s2790_s16 = smov 0   ;;  %s3208_s0 = inlined_call_operand.vmem [shape: bf16[2048,256], index: 0, kind: input, shape index: {}]   ;;  %s3209_s1 = inlined_call_operand.vmem [shape: bf16[256,128], index: 1, kind: input, shape index: {}]   ;;  %s3210_s2 = inlined_call_operand.vmem [shape: bf16[2048,128], index: 2, kind: output, shape index: {0}]   ;;  %s3211_s3 = inlined_call_operand.vmem [shape: f32[32,128], index: 3, kind: output, shape index: {1}]   ;;  %s3212_s4 = inlined_call_operand.vmem [shape: f32[32,128], index: 4, kind: output, shape index: {2}]  }
   0x1   :  { %s2792_s17 = smov 0  }
   0x2 LB: > { %s34_s18 = sadd.s32 1, %s2756_s16  ;;  %p2159_p0 = scmp.ge.s32.totalorder %s2760_s17, 1  ;;  %s2760_s17 = sphi %s2792_s17, %s15_s17   ;;  %s2756_s16 = sphi %s2790_s16, %s3214_s16   ;;  %s2752_s15 = sphi %s2788_s15, %s3213_s15  }
   0x3   : > { %p36_p1 = scmp.ge.s32.totalorder %s34_s18, 4  ;;  %p217_p2 = scmp.lt.s32.totalorder %s2760_s17, 5 }
   0x5   : > { %s3216_s18 = smov (%p36_p1, %s34_s18), 0  ;;  %p218_p3 = pnand %p2159_p0, %p217_p2 }
   0x6   : > { %v2626_v0 = vld [vmem:[%s3209_s1] sm:$0xff] (!%p218_p3)   ;;  %v2762_v1 = vmov (!%p218_p3), 0   ;;  %s2160_s21 = sshll.u32 (!%p218_p3), %s2752_s15, 6  ;;  %v2627_v2 = vld [vmem:[%s3209_s1 + $0x8] sm:$0xff] (!%p218_p3)   ;;  %v2628_v3 = vld [vmem:[%s3209_s1 + $0x10] sm:$0xff] (!%p218_p3)   ;;  %p303_p5 = scmp.lt.s32.totalorder (!%p218_p3), %s2752_s15, 3 }
   0x7   : > { %221 = sbr.rel (%p218_p3) target bundleno = 486 (0x1e6), region = 28  ;;  %962 = vmatprep.subr.bf16.mxu0 (!%p218_p3), %v2762_v1  ;;  %2569 = vmatprep.subr.bf16.mxu1 (!%p218_p3), %v2762_v1  ;;  %p275_p4 = scmp.lt.s32.totalorder (!%p218_p3), %s2160_s21, 255  ;;  %v2629_v4 = vld [vmem:[%s3209_s1 + $0x18] sm:$0xff] (!%p218_p3)   ;;  %v2630_v5 = vld [vmem:[%s3209_s1 + $0x20] sm:$0xff] (!%p218_p3)   ;;  %v2631_v7 = vld [vmem:[%s3209_s1 + $0x28] sm:$0xff] (!%p218_p3)  }
   0x8   : > { %963 = vmatpush1.bf16.msra.mxu0 (!%p218_p3), %v2626_v0  ;;  %2585 = vmatpush1.bf16.msra.mxu1 (!%p218_p3), %v2626_v0  ;;  %v2632_v8 = vld [vmem:[%s3209_s1 + $0x30] sm:$0xff] (!%p218_p3)   ;;  %v2633_v9 = vld [vmem:[%s3209_s1 + $0x38] sm:$0xff] (!%p218_p3)   ;;  %v2634_v11 = vld [vmem:[%s3209_s1 + $0x40] sm:$0xff] (!%p218_p3)  }
   0x9   : > { %964 = vmatprep.subr.bf16.mxu0 (!%p218_p3), %v2762_v1  ;;  %2570 = vmatprep.subr.bf16.mxu1 (!%p218_p3), %v2762_v1  ;;  %v2635_v12 = vld [vmem:[%s3209_s1 + $0x48] sm:$0xff] (!%p218_p3)   ;;  %v2636_v13 = vld [vmem:[%s3209_s1 + $0x50] sm:$0xff] (!%p218_p3)   ;;  %v2637_v14 = vld [vmem:[%s3209_s1 + $0x58] sm:$0xff] (!%p218_p3)  }
   0xa   : > { %v2638_v15 = vld [vmem:[%s3209_s1 + $0x60] sm:$0xff] (!%p218_p3)   ;;  %v2639_v16 = vld [vmem:[%s3209_s1 + $0x68] sm:$0xff] (!%p218_p3)   ;;  %v2640_v17 = vld [vmem:[%s3209_s1 + $0x70] sm:$0xff] (!%p218_p3)  }
   0xb   : > { %v2641_v18 = vld [vmem:[%s3209_s1 + $0x78] sm:$0xff] (!%p218_p3)  }
   0xc   : > { %965 = vmatpush1.bf16.msra.mxu0 (!%p218_p3), %v2627_v2  ;;  %2586 = vmatpush1.bf16.msra.mxu1 (!%p218_p3), %v2627_v2 }
   0xd   : > { %966 = vmatprep.subr.bf16.mxu0 (!%p218_p3), %v2762_v1  ;;  %2571 = vmatprep.subr.bf16.mxu1 (!%p218_p3), %v2762_v1 }
   0xe   : > { %s3218_s21 = smov (!%p275_p4, %s2160_s21), 255  ;;  %s3220_s15 = smov (!%p303_p5, %s2752_s15), 3 }
   0xf   : > { %s2313_s28 = sshll.u32 %s3218_s21, 3  ;;  %s2164_s10 = sshll.u32 %s3218_s21, 2 }
  0x10   : > { %967 = vmatpush1.bf16.msra.mxu0 %v2628_v3  ;;  %2587 = vmatpush1.bf16.msra.mxu1 %v2628_v3  ;;  %s2838_s7 = scalar_lea.vmem %s3208_s0, %s2313_s28  ;;  %s2967_s13 = scalar_lea.vmem %s3210_s2, %s2164_s10 }
  0x11   : > { %968 = vmatprep.subr.bf16.mxu0 %v2762_v1  ;;  %2572 = vmatprep.subr.bf16.mxu1 %v2762_v1  ;;  %v2644_v6 = vld [vmem:[%s2838_s7 + $0x4] ss:$8 sps:$4 sm:$0xff]   ;;  %v2642_v19 = vld [vmem:[%s2838_s7] ss:$8 sps:$4 sm:$0xff]   ;;  %v2645_v21 = vld [vmem:[%s2838_s7 + $0x14] ss:$8 sps:$4 sm:$0xff]  }
  0x12   : > { %994 = vmatprep.mubr.bf16.mxu0 %v2644_v6  ;;  %v2668_v10 = vld [vmem:[%s2838_s7 + $0x104] ss:$8 sps:$4 sm:$0xff]   ;;  %v2666_v20 = vld [vmem:[%s2838_s7 + $0x100] ss:$8 sps:$4 sm:$0xff]   ;;  %v2672_v22 = vld [vmem:[%s2838_s7 + $0x114] ss:$8 sps:$4 sm:$0xff]  }
  0x13   : > { %1122 = vmatprep.mubr.bf16.mxu1 %v2668_v10  ;;  %v2647_v23 = vld [vmem:[%s2838_s7 + $0x10] ss:$8 sps:$4 sm:$0xff]   ;;  %v2648_v25 = vld [vmem:[%s2838_s7 + $0x24] ss:$8 sps:$4 sm:$0xff]   ;;  %v2650_v27 = vld [vmem:[%s2838_s7 + $0x20] ss:$8 sps:$4 sm:$0xff]  }
  0x14   : > { %969 = vmatpush1.bf16.msra.mxu0 %v2629_v4  ;;  %2588 = vmatpush1.bf16.msra.mxu1 %v2629_v4  ;;  %v2674_v24 = vld [vmem:[%s2838_s7 + $0x110] ss:$8 sps:$4 sm:$0xff]   ;;  %v2678_v26 = vld [vmem:[%s2838_s7 + $0x124] ss:$8 sps:$4 sm:$0xff]   ;;  %v2680_v28 = vld [vmem:[%s2838_s7 + $0x120] ss:$8 sps:$4 sm:$0xff]  }
  0x15   : > { %970 = vmatprep.subr.bf16.mxu0 %v2762_v1  ;;  %2573 = vmatprep.subr.bf16.mxu1 %v2762_v1  ;;  %v2651_v29 = vld [vmem:[%s2838_s7 + $0x34] ss:$8 sps:$4 sm:$0xff]   ;;  %v2653_v31 = vld [vmem:[%s2838_s7 + $0x30] ss:$8 sps:$4 sm:$0xff]   ;;  %v2654_v33 = vld [vmem:[%s2838_s7 + $0x44] ss:$8 sps:$4 sm:$0xff]  }
  0x16   : > { %v2684_v30 = vld [vmem:[%s2838_s7 + $0x134] ss:$8 sps:$4 sm:$0xff]   ;;  %v2686_v32 = vld [vmem:[%s2838_s7 + $0x130] ss:$8 sps:$4 sm:$0xff]   ;;  %v2690_v34 = vld [vmem:[%s2838_s7 + $0x144] ss:$8 sps:$4 sm:$0xff]  }
  0x17   : > { %v2656_v35 = vld [vmem:[%s2838_s7 + $0x40] ss:$8 sps:$4 sm:$0xff]   ;;  %v2657_v37 = vld [vmem:[%s2838_s7 + $0x54] ss:$8 sps:$4 sm:$0xff]   ;;  %v2659_v39 = vld [vmem:[%s2838_s7 + $0x50] ss:$8 sps:$4 sm:$0xff]  }
  0x18   : > { %971 = vmatpush1.bf16.msra.mxu0 %v2630_v5  ;;  %2589 = vmatpush1.bf16.msra.mxu1 %v2630_v5  ;;  %v2692_v36 = vld [vmem:[%s2838_s7 + $0x140] ss:$8 sps:$4 sm:$0xff]   ;;  %v2696_v38 = vld [vmem:[%s2838_s7 + $0x154] ss:$8 sps:$4 sm:$0xff]   ;;  %v2698_v40 = vld [vmem:[%s2838_s7 + $0x150] ss:$8 sps:$4 sm:$0xff]  }
  0x19   : > { %972 = vmatprep.subr.bf16.mxu0 %v2762_v1  ;;  %2574 = vmatprep.subr.bf16.mxu1 %v2762_v1  ;;  %v2660_v41 = vld [vmem:[%s2838_s7 + $0x64] ss:$8 sps:$4 sm:$0xff]   ;;  %v2662_v43 = vld [vmem:[%s2838_s7 + $0x60] ss:$8 sps:$4 sm:$0xff]   ;;  %v2663_v45 = vld [vmem:[%s2838_s7 + $0x74] ss:$8 sps:$4 sm:$0xff]  }
  0x1a   : > { %v2702_v42 = vld [vmem:[%s2838_s7 + $0x164] ss:$8 sps:$4 sm:$0xff]   ;;  %v2704_v44 = vld [vmem:[%s2838_s7 + $0x160] ss:$8 sps:$4 sm:$0xff]   ;;  %v2708_v46 = vld [vmem:[%s2838_s7 + $0x174] ss:$8 sps:$4 sm:$0xff]  }
  0x1b   : > { %v2665_v47 = vld [vmem:[%s2838_s7 + $0x70] ss:$8 sps:$4 sm:$0xff]   ;;  %v2669_v49 = vld [vmem:[%s2838_s7 + $0x84] ss:$8 sps:$4 sm:$0xff]   ;;  %v2671_v51 = vld [vmem:[%s2838_s7 + $0x80] ss:$8 sps:$4 sm:$0xff]  }
  0x1c   : > { %973 = vmatpush1.bf16.msra.mxu0 %v2631_v7  ;;  %2590 = vmatpush1.bf16.msra.mxu1 %v2631_v7  ;;  %v2710_v48 = vld [vmem:[%s2838_s7 + $0x170] ss:$8 sps:$4 sm:$0xff]   ;;  %v2714_v50 = vld [vmem:[%s2838_s7 + $0x184] ss:$8 sps:$4 sm:$0xff]   ;;  %v2716_v52 = vld [vmem:[%s2838_s7 + $0x180] ss:$8 sps:$4 sm:$0xff]  }
  0x1d   : > { %974 = vmatprep.subr.bf16.mxu0 %v2762_v1  ;;  %2575 = vmatprep.subr.bf16.mxu1 %v2762_v1  ;;  %v2675_v53 = vld [vmem:[%s2838_s7 + $0x94] ss:$8 sps:$4 sm:$0xff]   ;;  %v2677_v55 = vld [vmem:[%s2838_s7 + $0x90] ss:$8 sps:$4 sm:$0xff]   ;;  %v2681_v57 = vld [vmem:[%s2838_s7 + $0xa4] ss:$8 sps:$4 sm:$0xff]  }
  0x1e   : > { %v2717_v54 = vld [vmem:[%s2838_s7 + $0x194] ss:$8 sps:$4 sm:$0xff]   ;;  %v2719_v56 = vld [vmem:[%s2838_s7 + $0x190] ss:$8 sps:$4 sm:$0xff]   ;;  %v2720_v58 = vld [vmem:[%s2838_s7 + $0x1a4] ss:$8 sps:$4 sm:$0xff]  }
  0x1f   : > { %v2683_v59 = vld [vmem:[%s2838_s7 + $0xa0] ss:$8 sps:$4 sm:$0xff]   ;;  %v2687_v61 = vld [vmem:[%s2838_s7 + $0xb4] ss:$8 sps:$4 sm:$0xff]   ;;  %v2689_v63 = vld [vmem:[%s2838_s7 + $0xb0] ss:$8 sps:$4 sm:$0xff]  }
  0x20   : > { %975 = vmatpush1.bf16.msra.mxu0 %v2632_v8  ;;  %2591 = vmatpush1.bf16.msra.mxu1 %v2632_v8  ;;  %v2722_v60 = vld [vmem:[%s2838_s7 + $0x1a0] ss:$8 sps:$4 sm:$0xff]   ;;  %v2723_v62 = vld [vmem:[%s2838_s7 + $0x1b4] ss:$8 sps:$4 sm:$0xff]   ;;  %v2725_v0 = vld [vmem:[%s2838_s7 + $0x1b0] ss:$8 sps:$4 sm:$0xff]  }
  0x21   : > { %976 = vmatprep.subr.bf16.mxu0 %v2762_v1  ;;  %2576 = vmatprep.subr.bf16.mxu1 %v2762_v1  ;;  %v2726_v2 = vld [vmem:[%s2838_s7 + $0x1c4] ss:$8 sps:$4 sm:$0xff]   ;;  %v2695_v3 = vld [vmem:[%s2838_s7 + $0xc0] ss:$8 sps:$4 sm:$0xff]   ;;  %v2699_v5 = vld [vmem:[%s2838_s7 + $0xd4] ss:$8 sps:$4 sm:$0xff]  }
  0x22   : > { %v2728_v4 = vld [vmem:[%s2838_s7 + $0x1c0] ss:$8 sps:$4 sm:$0xff]   ;;  %v2729_v6 = vld [vmem:[%s2838_s7 + $0x1d4] ss:$8 sps:$4 sm:$0xff]   ;;  %v2701_v7 = vld [vmem:[%s2838_s7 + $0xd0] ss:$8 sps:$4 sm:$0xff]  }
  0x23   : > { %v2731_v8 = vld [vmem:[%s2838_s7 + $0x1d0] ss:$8 sps:$4 sm:$0xff]   ;;  %v2732_v10 = vld [vmem:[%s2838_s7 + $0x1e4] ss:$8 sps:$4 sm:$0xff]   ;;  %s2165_s21 = sshll.u32 %s3220_s15, 3 }
  0x24   : > { %977 = vmatpush1.bf16.msra.mxu0 %v2633_v9  ;;  %2592 = vmatpush1.bf16.msra.mxu1 %v2633_v9  ;;  %v2705_v9 = vld [vmem:[%s2838_s7 + $0xe4] ss:$8 sps:$4 sm:$0xff]   ;;  %s309_s19 = scalar_lea.vmem %s3211_s3, %s2165_s21  ;;  %s316_s23 = scalar_lea.vmem %s3212_s4, %s2165_s21 }
  0x25   : > { %978 = vmatprep.subr.bf16.mxu0 %v2762_v1  ;;  %2577 = vmatprep.subr.bf16.mxu1 %v2762_v1 }
  0x28   : > { %979 = vmatpush1.bf16.msra.mxu0 %v2634_v11  ;;  %2593 = vmatpush1.bf16.msra.mxu1 %v2634_v11  ;;  %v2707_v11 = vld [vmem:[%s2838_s7 + $0xe0] ss:$8 sps:$4 sm:$0xff]  }
  0x29   : > { %980 = vmatprep.subr.bf16.mxu0 %v2762_v1  ;;  %2578 = vmatprep.subr.bf16.mxu1 %v2762_v1 }
  0x2c   : > { %981 = vmatpush1.bf16.msra.mxu0 %v2635_v12  ;;  %2594 = vmatpush1.bf16.msra.mxu1 %v2635_v12  ;;  %v2734_v12 = vld [vmem:[%s2838_s7 + $0x1e0] ss:$8 sps:$4 sm:$0xff]  }
  0x2d   : > { %982 = vmatprep.subr.bf16.mxu0 %v2762_v1  ;;  %2579 = vmatprep.subr.bf16.mxu1 %v2762_v1 }
  0x30   : > { %983 = vmatpush1.bf16.msra.mxu0 %v2636_v13  ;;  %2595 = vmatpush1.bf16.msra.mxu1 %v2636_v13  ;;  %v2711_v13 = vld [vmem:[%s2838_s7 + $0xf4] ss:$8 sps:$4 sm:$0xff]  }
  0x31   : > { %984 = vmatprep.subr.bf16.mxu0 %v2762_v1  ;;  %2580 = vmatprep.subr.bf16.mxu1 %v2762_v1 }
  0x34   : > { %985 = vmatpush1.bf16.msra.mxu0 %v2637_v14  ;;  %2596 = vmatpush1.bf16.msra.mxu1 %v2637_v14  ;;  %v2735_v14 = vld [vmem:[%s2838_s7 + $0x1f4] ss:$8 sps:$4 sm:$0xff]  }
  0x35   : > { %986 = vmatprep.subr.bf16.mxu0 %v2762_v1  ;;  %2581 = vmatprep.subr.bf16.mxu1 %v2762_v1 }
  0x38   : > { %987 = vmatpush1.bf16.msra.mxu0 %v2638_v15  ;;  %2597 = vmatpush1.bf16.msra.mxu1 %v2638_v15  ;;  %v2713_v15 = vld [vmem:[%s2838_s7 + $0xf0] ss:$8 sps:$4 sm:$0xff]  }
  0x39   : > { %988 = vmatprep.subr.bf16.mxu0 %v2762_v1  ;;  %2582 = vmatprep.subr.bf16.mxu1 %v2762_v1 }
  0x3c   : > { %989 = vmatpush1.bf16.msra.mxu0 %v2639_v16  ;;  %2598 = vmatpush1.bf16.msra.mxu1 %v2639_v16  ;;  %v2737_v16 = vld [vmem:[%s2838_s7 + $0x1f0] ss:$8 sps:$4 sm:$0xff]  }
  0x3d   : > { %990 = vmatprep.subr.bf16.mxu0 %v2762_v1  ;;  %2583 = vmatprep.subr.bf16.mxu1 %v2762_v1 }
  0x40   : > { %991 = vmatpush1.bf16.msra.mxu0 %v2640_v17  ;;  %2599 = vmatpush1.bf16.msra.mxu1 %v2640_v17 }
  0x41   : > { %992 = vmatprep.subr.bf16.mxu0 %v2762_v1  ;;  %2584 = vmatprep.subr.bf16.mxu1 %v2762_v1  ;;  %v2693_v1 = vld [vmem:[%s2838_s7 + $0xc4] ss:$8 sps:$4 sm:$0xff]  }
  0x44   : > { %993 = vmatpush1.bf16.msra.mxu0 %v2641_v18  ;;  %2600 = vmatpush1.bf16.msra.mxu1 %v2641_v18 }
  0x47   : > { %995 = vmatmul.mubr.bf16.vlgmr.msra.gmra.mrb[0].mxu0 %v2642_v19  ;;  %1123 = vmatmul.mubr.bf16.vlgmr.msra.gmra.mrb[0].mxu1 %v2666_v20 }
  0x48   : > { %1002 = vmatprep.mubr.bf16.mxu0 %v2645_v21  ;;  %1130 = vmatprep.mubr.bf16.mxu1 %v2672_v22 }
  0x4f   : > { %1003 = vmatmul.mubr.bf16.gmra.mrb[4].mxu0 %v2647_v23  ;;  %1131 = vmatmul.mubr.bf16.gmra.mrb[4].mxu1 %v2674_v24 }
  0x50   : > { %1010 = vmatprep.mubr.bf16.mxu0 %v2648_v25  ;;  %1138 = vmatprep.mubr.bf16.mxu1 %v2678_v26 }
  0x57   : > { %1011 = vmatmul.mubr.bf16.gmra.mrb[8].mxu0 %v2650_v27  ;;  %1139 = vmatmul.mubr.bf16.gmra.mrb[8].mxu1 %v2680_v28 }
  0x58   : > { %1018 = vmatprep.mubr.bf16.mxu0 %v2651_v29  ;;  %1146 = vmatprep.mubr.bf16.mxu1 %v2684_v30 }
  0x5f   : > { %1019 = vmatmul.mubr.bf16.gmra.mrb[12].mxu0 %v2653_v31  ;;  %1147 = vmatmul.mubr.bf16.gmra.mrb[12].mxu1 %v2686_v32 }
  0x60   : > { %1026 = vmatprep.mubr.bf16.mxu0 %v2654_v33  ;;  %1154 = vmatprep.mubr.bf16.mxu1 %v2690_v34 }
  0x67   : > { %1027 = vmatmul.mubr.bf16.gmra.mrb[16].mxu0 %v2656_v35  ;;  %1155 = vmatmul.mubr.bf16.gmra.mrb[16].mxu1 %v2692_v36 }
  0x68   : > { %1034 = vmatprep.mubr.bf16.mxu0 %v2657_v37  ;;  %1162 = vmatprep.mubr.bf16.mxu1 %v2696_v38 }
  0x6f   : > { %1035 = vmatmul.mubr.bf16.gmra.mrb[20].mxu0 %v2659_v39  ;;  %1163 = vmatmul.mubr.bf16.gmra.mrb[20].mxu1 %v2698_v40 }
  0x70   : > { %1042 = vmatprep.mubr.bf16.mxu0 %v2660_v41  ;;  %1170 = vmatprep.mubr.bf16.mxu1 %v2702_v42 }
  0x77   : > { %1043 = vmatmul.mubr.bf16.gmra.mrb[24].mxu0 %v2662_v43  ;;  %1171 = vmatmul.mubr.bf16.gmra.mrb[24].mxu1 %v2704_v44 }
  0x78   : > { %1050 = vmatprep.mubr.bf16.mxu0 %v2663_v45  ;;  %1178 = vmatprep.mubr.bf16.mxu1 %v2708_v46 }
  0x7f   : > { %1051 = vmatmul.mubr.bf16.gmra.mrb[28].mxu0 %v2665_v47  ;;  %1179 = vmatmul.mubr.bf16.gmra.mrb[28].mxu1 %v2710_v48 }
  0x80   : > { %1058 = vmatprep.mubr.bf16.mxu0 %v2669_v49  ;;  %1186 = vmatprep.mubr.bf16.mxu1 %v2714_v50 }
  0x87   : > { %1059 = vmatmul.mubr.bf16.gmra.mrb[32].mxu0 %v2671_v51  ;;  %1187 = vmatmul.mubr.bf16.gmra.mrb[32].mxu1 %v2716_v52 }
  0x88   : > { %1066 = vmatprep.mubr.bf16.mxu0 %v2675_v53  ;;  %1194 = vmatprep.mubr.bf16.mxu1 %v2717_v54 }
  0x8f   : > { %1067 = vmatmul.mubr.bf16.gmra.mrb[36].mxu0 %v2677_v55  ;;  %1195 = vmatmul.mubr.bf16.gmra.mrb[36].mxu1 %v2719_v56 }
  0x90   : > { %1074 = vmatprep.mubr.bf16.mxu0 %v2681_v57  ;;  %1202 = vmatprep.mubr.bf16.mxu1 %v2720_v58 }
  0x97   : > { %1075 = vmatmul.mubr.bf16.gmra.mrb[40].mxu0 %v2683_v59  ;;  %1203 = vmatmul.mubr.bf16.gmra.mrb[40].mxu1 %v2722_v60 }
  0x98   : > { %1082 = vmatprep.mubr.bf16.mxu0 %v2687_v61  ;;  %1210 = vmatprep.mubr.bf16.mxu1 %v2723_v62 }
  0x9f   : > { %1083 = vmatmul.mubr.bf16.gmra.mrb[44].mxu0 %v2689_v63  ;;  %1211 = vmatmul.mubr.bf16.gmra.mrb[44].mxu1 %v2725_v0 }
  0xa0   : > { %1090 = vmatprep.mubr.bf16.mxu0 %v2693_v1  ;;  %1218 = vmatprep.mubr.bf16.mxu1 %v2726_v2 }
  0xa7   : > { %1091 = vmatmul.mubr.bf16.gmra.mrb[48].mxu0 %v2695_v3  ;;  %1219 = vmatmul.mubr.bf16.gmra.mrb[48].mxu1 %v2728_v4 }
  0xa8   : > { %1098 = vmatprep.mubr.bf16.mxu0 %v2699_v5  ;;  %1226 = vmatprep.mubr.bf16.mxu1 %v2729_v6 }
  0xaf   : > { %1099 = vmatmul.mubr.bf16.gmra.mrb[52].mxu0 %v2701_v7  ;;  %1227 = vmatmul.mubr.bf16.gmra.mrb[52].mxu1 %v2731_v8 }
  0xb0   : > { %1106 = vmatprep.mubr.bf16.mxu0 %v2705_v9  ;;  %1234 = vmatprep.mubr.bf16.mxu1 %v2732_v10 }
  0xb7   : > { %1107 = vmatmul.mubr.bf16.gmra.mrb[56].mxu0 %v2707_v11  ;;  %1235 = vmatmul.mubr.bf16.gmra.mrb[56].mxu1 %v2734_v12 }
  0xb8   : > { %1114 = vmatprep.mubr.bf16.mxu0 %v2711_v13  ;;  %1242 = vmatprep.mubr.bf16.mxu1 %v2735_v14 }
  0xbf   : > { %1115 = vmatmul.mubr.bf16.gmra.mrb[60].mxu0 %v2713_v15  ;;  %1243 = vmatmul.mubr.bf16.gmra.mrb[60].mxu1 %v2737_v16 }
 0x11a   : > { %v996_v17 = vpop.f32.mrb[0].mxu0  ;;  %v2962_v18 = vpop.f32.mrb[0].mxu1 }
 0x11b   : > { %v998_v19 = vpop.f32.mrb[1].mxu0  ;;  %v1126_v20 = vpop.f32.mrb[1].mxu1  ;;  %v1836_v21 = vmul.f32 %v996_v17, %v996_v17 }
 0x11c   : > { %v999_v22 = vpop.f32.mrb[2].mxu0  ;;  %v2969_v23 = vpop.f32.mrb[2].mxu1 }
 0x11d   : > { %v2381_v24 = vpack.c.bf16 %v999_v22, %v996_v17  ;;  %v1766_v25 = vadd.f32 %v999_v22, %v996_v17  ;;  %v1837_v26 = vmul.f32 %v999_v22, %v999_v22  ;;  %v1001_v27 = vpop.f32.mrb[3].mxu0  ;;  %v2461_v28 = vpack.c.bf16 %v2969_v23, %v2962_v18  ;;  %v1129_v29 = vpop.f32.mrb[3].mxu1 }
 0x11f   : > { %2382 = vst [vmem:[%s2967_s13] sm:$0xff] %v2381_v24   ;;  %v1900_v30 = vadd.f32 %v1837_v26, %v1836_v21  ;;  %2553 = vst [vmem:[%s2967_s13 + $0x80] sm:$0xff] %v2461_v28  }
 0x122   : > { %v1004_v31 = vpop.f32.mrb[4].mxu0  ;;  %v2975_v32 = vpop.f32.mrb[4].mxu1 }
 0x123   : > { %v1767_v33 = vadd.f32 %v1766_v25, %v1004_v31  ;;  %v1838_v34 = vmul.f32 %v1004_v31, %v1004_v31  ;;  %v1006_v35 = vpop.f32.mrb[5].mxu0  ;;  %v1134_v36 = vpop.f32.mrb[5].mxu1 }
 0x124   : > { %v1007_v37 = vpop.f32.mrb[6].mxu0  ;;  %v2977_v38 = vpop.f32.mrb[6].mxu1 }
 0x125   : > { %v1901_v39 = vadd.f32 %v1900_v30, %v1838_v34  ;;  %v2386_v40 = vpack.c.bf16 %v1007_v37, %v1004_v31  ;;  %v1768_v41 = vadd.f32 %v1767_v33, %v1007_v37  ;;  %v1839_v42 = vmul.f32 %v1007_v37, %v1007_v37  ;;  %v1009_v43 = vpop.f32.mrb[7].mxu0  ;;  %v1137_v44 = vpop.f32.mrb[7].mxu1 }
 0x126   : > { %v2466_v45 = vpack.c.bf16 %v2977_v38, %v2975_v32 }
 0x127   : > { %2538 = vst [vmem:[%s2967_s13 + $0x8] sm:$0xff] %v2386_v40   ;;  %v1902_v46 = vadd.f32 %v1901_v39, %v1839_v42 }
 0x128   : > { %2554 = vst [vmem:[%s2967_s13 + $0x88] sm:$0xff] %v2466_v45  }
 0x12a   : > { %v1012_v47 = vpop.f32.mrb[8].mxu0  ;;  %v2983_v48 = vpop.f32.mrb[8].mxu1 }
 0x12b   : > { %v1769_v49 = vadd.f32 %v1768_v41, %v1012_v47  ;;  %v1840_v50 = vmul.f32 %v1012_v47, %v1012_v47  ;;  %v1014_v51 = vpop.f32.mrb[9].mxu0  ;;  %v1142_v52 = vpop.f32.mrb[9].mxu1 }
 0x12c   : > { %v1015_v53 = vpop.f32.mrb[10].mxu0  ;;  %v2985_v54 = vpop.f32.mrb[10].mxu1 }
 0x12d   : > { %v1903_v55 = vadd.f32 %v1902_v46, %v1840_v50  ;;  %v2391_v56 = vpack.c.bf16 %v1015_v53, %v1012_v47  ;;  %v1770_v57 = vadd.f32 %v1769_v49, %v1015_v53  ;;  %v1841_v58 = vmul.f32 %v1015_v53, %v1015_v53  ;;  %v1017_v59 = vpop.f32.mrb[11].mxu0  ;;  %v1145_v60 = vpop.f32.mrb[11].mxu1 }
 0x12e   : > { %v2471_v61 = vpack.c.bf16 %v2985_v54, %v2983_v48 }
 0x12f   : > { %2539 = vst [vmem:[%s2967_s13 + $0x10] sm:$0xff] %v2391_v56   ;;  %v1904_v62 = vadd.f32 %v1903_v55, %v1841_v58 }
 0x130   : > { %2555 = vst [vmem:[%s2967_s13 + $0x90] sm:$0xff] %v2471_v61  }
 0x132   : > { %v1020_v63 = vpop.f32.mrb[12].mxu0  ;;  %v2991_v0 = vpop.f32.mrb[12].mxu1 }
 0x133   : > { %v1771_v1 = vadd.f32 %v1770_v57, %v1020_v63  ;;  %v1842_v2 = vmul.f32 %v1020_v63, %v1020_v63  ;;  %v1022_v3 = vpop.f32.mrb[13].mxu0  ;;  %v1150_v4 = vpop.f32.mrb[13].mxu1 }
 0x134   : > { %v1023_v5 = vpop.f32.mrb[14].mxu0  ;;  %v2993_v6 = vpop.f32.mrb[14].mxu1 }
 0x135   : > { %v1905_v7 = vadd.f32 %v1904_v62, %v1842_v2  ;;  %v2396_v8 = vpack.c.bf16 %v1023_v5, %v1020_v63  ;;  %v1772_v9 = vadd.f32 %v1771_v1, %v1023_v5  ;;  %v1843_v10 = vmul.f32 %v1023_v5, %v1023_v5  ;;  %v1025_v11 = vpop.f32.mrb[15].mxu0  ;;  %v1153_v12 = vpop.f32.mrb[15].mxu1 }
 0x136   : > { %v2476_v13 = vpack.c.bf16 %v2993_v6, %v2991_v0 }
 0x137   : > { %2540 = vst [vmem:[%s2967_s13 + $0x18] sm:$0xff] %v2396_v8   ;;  %v1906_v14 = vadd.f32 %v1905_v7, %v1843_v10 }
 0x138   : > { %2556 = vst [vmem:[%s2967_s13 + $0x98] sm:$0xff] %v2476_v13  }
 0x13a   : > { %v1028_v15 = vpop.f32.mrb[16].mxu0  ;;  %v2999_v16 = vpop.f32.mrb[16].mxu1 }
 0x13b   : > { %v1773_v17 = vadd.f32 %v1772_v9, %v1028_v15  ;;  %v1844_v19 = vmul.f32 %v1028_v15, %v1028_v15  ;;  %v1030_v20 = vpop.f32.mrb[17].mxu0  ;;  %v1158_v21 = vpop.f32.mrb[17].mxu1 }
 0x13c   : > { %v1031_v22 = vpop.f32.mrb[18].mxu0  ;;  %v3001_v24 = vpop.f32.mrb[18].mxu1 }
 0x13d   : > { %v1907_v25 = vadd.f32 %v1906_v14, %v1844_v19  ;;  %v2401_v26 = vpack.c.bf16 %v1031_v22, %v1028_v15  ;;  %v1774_v27 = vadd.f32 %v1773_v17, %v1031_v22  ;;  %v1845_v28 = vmul.f32 %v1031_v22, %v1031_v22  ;;  %v1033_v29 = vpop.f32.mrb[19].mxu0  ;;  %v1161_v30 = vpop.f32.mrb[19].mxu1 }
 0x13e   : > { %v2481_v31 = vpack.c.bf16 %v3001_v24, %v2999_v16 }
 0x13f   : > { %2541 = vst [vmem:[%s2967_s13 + $0x20] sm:$0xff] %v2401_v26   ;;  %v1908_v33 = vadd.f32 %v1907_v25, %v1845_v28 }
 0x140   : > { %2557 = vst [vmem:[%s2967_s13 + $0xa0] sm:$0xff] %v2481_v31  }
 0x142   : > { %v1036_v34 = vpop.f32.mrb[20].mxu0  ;;  %v3007_v35 = vpop.f32.mrb[20].mxu1 }
 0x143   : > { %v1775_v36 = vadd.f32 %v1774_v27, %v1036_v34  ;;  %v1846_v37 = vmul.f32 %v1036_v34, %v1036_v34  ;;  %v1038_v39 = vpop.f32.mrb[21].mxu0  ;;  %v1166_v40 = vpop.f32.mrb[21].mxu1 }
 0x144   : > { %v1039_v41 = vpop.f32.mrb[22].mxu0  ;;  %v3009_v42 = vpop.f32.mrb[22].mxu1 }
 0x145   : > { %v1909_v43 = vadd.f32 %v1908_v33, %v1846_v37  ;;  %v2406_v44 = vpack.c.bf16 %v1039_v41, %v1036_v34  ;;  %v1776_v45 = vadd.f32 %v1775_v36, %v1039_v41  ;;  %v1847_v46 = vmul.f32 %v1039_v41, %v1039_v41  ;;  %v1041_v47 = vpop.f32.mrb[23].mxu0  ;;  %v1169_v49 = vpop.f32.mrb[23].mxu1 }
 0x146   : > { %v2486_v50 = vpack.c.bf16 %v3009_v42, %v3007_v35 }
 0x147   : > { %2542 = vst [vmem:[%s2967_s13 + $0x28] sm:$0xff] %v2406_v44   ;;  %v1910_v51 = vadd.f32 %v1909_v43, %v1847_v46 }
 0x148   : > { %2558 = vst [vmem:[%s2967_s13 + $0xa8] sm:$0xff] %v2486_v50  }
 0x14a   : > { %v1044_v52 = vpop.f32.mrb[24].mxu0  ;;  %v3015_v53 = vpop.f32.mrb[24].mxu1 }
 0x14b   : > { %v1777_v55 = vadd.f32 %v1776_v45, %v1044_v52  ;;  %v1848_v56 = vmul.f32 %v1044_v52, %v1044_v52  ;;  %v1046_v57 = vpop.f32.mrb[25].mxu0  ;;  %v1174_v58 = vpop.f32.mrb[25].mxu1 }
 0x14c   : > { %v1047_v59 = vpop.f32.mrb[26].mxu0  ;;  %v3017_v60 = vpop.f32.mrb[26].mxu1 }
 0x14d   : > { %v1911_v61 = vadd.f32 %v1910_v51, %v1848_v56  ;;  %v2411_v62 = vpack.c.bf16 %v1047_v59, %v1044_v52  ;;  %v1778_v63 = vadd.f32 %v1777_v55, %v1047_v59  ;;  %v1849_v1 = vmul.f32 %v1047_v59, %v1047_v59  ;;  %v1049_v2 = vpop.f32.mrb[27].mxu0  ;;  %v1177_v3 = vpop.f32.mrb[27].mxu1 }
 0x14e   : > { %v2491_v4 = vpack.c.bf16 %v3017_v60, %v3015_v53 }
 0x14f   : > { %2543 = vst [vmem:[%s2967_s13 + $0x30] sm:$0xff] %v2411_v62   ;;  %v1912_v5 = vadd.f32 %v1911_v61, %v1849_v1 }
 0x150   : > { %2559 = vst [vmem:[%s2967_s13 + $0xb0] sm:$0xff] %v2491_v4  }
 0x152   : > { %v1052_v7 = vpop.f32.mrb[28].mxu0  ;;  %v3023_v8 = vpop.f32.mrb[28].mxu1 }
 0x153   : > { %v1779_v9 = vadd.f32 %v1778_v63, %v1052_v7  ;;  %v1850_v10 = vmul.f32 %v1052_v7, %v1052_v7  ;;  %v1054_v11 = vpop.f32.mrb[29].mxu0  ;;  %v1182_v12 = vpop.f32.mrb[29].mxu1 }
 0x154   : > { %v1055_v13 = vpop.f32.mrb[30].mxu0  ;;  %v3025_v14 = vpop.f32.mrb[30].mxu1 }
 0x155   : > { %v1913_v15 = vadd.f32 %v1912_v5, %v1850_v10  ;;  %v2416_v17 = vpack.c.bf16 %v1055_v13, %v1052_v7  ;;  %v1780_v19 = vadd.f32 %v1779_v9, %v1055_v13  ;;  %v1851_v20 = vmul.f32 %v1055_v13, %v1055_v13  ;;  %v1057_v21 = vpop.f32.mrb[31].mxu0  ;;  %v1185_v22 = vpop.f32.mrb[31].mxu1 }
 0x156   : > { %v2496_v25 = vpack.c.bf16 %v3025_v14, %v3023_v8 }
 0x157   : > { %2544 = vst [vmem:[%s2967_s13 + $0x38] sm:$0xff] %v2416_v17   ;;  %v1914_v26 = vadd.f32 %v1913_v15, %v1851_v20 }
 0x158   : > { %2560 = vst [vmem:[%s2967_s13 + $0xb8] sm:$0xff] %v2496_v25  }
 0x15a   : > { %v1060_v27 = vpop.f32.mrb[32].mxu0  ;;  %v3031_v28 = vpop.f32.mrb[32].mxu1 }
 0x15b   : > { %v1781_v29 = vadd.f32 %v1780_v19, %v1060_v27  ;;  %v1852_v30 = vmul.f32 %v1060_v27, %v1060_v27  ;;  %v1062_v31 = vpop.f32.mrb[33].mxu0  ;;  %v1190_v33 = vpop.f32.mrb[33].mxu1 }
 0x15c   : > { %v1063_v34 = vpop.f32.mrb[34].mxu0  ;;  %v3033_v36 = vpop.f32.mrb[34].mxu1 }
 0x15d   : > { %v1915_v37 = vadd.f32 %v1914_v26, %v1852_v30  ;;  %v2421_v39 = vpack.c.bf16 %v1063_v34, %v1060_v27  ;;  %v1782_v40 = vadd.f32 %v1781_v29, %v1063_v34  ;;  %v1853_v41 = vmul.f32 %v1063_v34, %v1063_v34  ;;  %v1065_v43 = vpop.f32.mrb[35].mxu0  ;;  %v1193_v44 = vpop.f32.mrb[35].mxu1 }
 0x15e   : > { %v2501_v45 = vpack.c.bf16 %v3033_v36, %v3031_v28 }
 0x15f   : > { %2545 = vst [vmem:[%s2967_s13 + $0x40] sm:$0xff] %v2421_v39   ;;  %v1916_v46 = vadd.f32 %v1915_v37, %v1853_v41 }
 0x160   : > { %2561 = vst [vmem:[%s2967_s13 + $0xc0] sm:$0xff] %v2501_v45  }
 0x162   : > { %v1068_v47 = vpop.f32.mrb[36].mxu0  ;;  %v3039_v49 = vpop.f32.mrb[36].mxu1 }
 0x163   : > { %v1783_v50 = vadd.f32 %v1782_v40, %v1068_v47  ;;  %v1854_v51 = vmul.f32 %v1068_v47, %v1068_v47  ;;  %v1070_v52 = vpop.f32.mrb[37].mxu0  ;;  %v1198_v55 = vpop.f32.mrb[37].mxu1 }
 0x164   : > { %v1071_v56 = vpop.f32.mrb[38].mxu0  ;;  %v3041_v57 = vpop.f32.mrb[38].mxu1 }
 0x165   : > { %v1917_v58 = vadd.f32 %v1916_v46, %v1854_v51  ;;  %v2426_v59 = vpack.c.bf16 %v1071_v56, %v1068_v47  ;;  %v1784_v61 = vadd.f32 %v1783_v50, %v1071_v56  ;;  %v1855_v62 = vmul.f32 %v1071_v56, %v1071_v56  ;;  %v1073_v63 = vpop.f32.mrb[39].mxu0  ;;  %v1201_v1 = vpop.f32.mrb[39].mxu1 }
 0x166   : > { %v2506_v2 = vpack.c.bf16 %v3041_v57, %v3039_v49 }
 0x167   : > { %2546 = vst [vmem:[%s2967_s13 + $0x48] sm:$0xff] %v2426_v59   ;;  %v1918_v3 = vadd.f32 %v1917_v58, %v1855_v62 }
 0x168   : > { %2562 = vst [vmem:[%s2967_s13 + $0xc8] sm:$0xff] %v2506_v2  }
 0x16a   : > { %v1076_v4 = vpop.f32.mrb[40].mxu0  ;;  %v3047_v5 = vpop.f32.mrb[40].mxu1 }
 0x16b   : > { %v1785_v7 = vadd.f32 %v1784_v61, %v1076_v4  ;;  %v1856_v9 = vmul.f32 %v1076_v4, %v1076_v4  ;;  %v1078_v10 = vpop.f32.mrb[41].mxu0  ;;  %v1206_v11 = vpop.f32.mrb[41].mxu1 }
 0x16c   : > { %v1079_v12 = vpop.f32.mrb[42].mxu0  ;;  %v3049_v13 = vpop.f32.mrb[42].mxu1 }
 0x16d   : > { %v1919_v15 = vadd.f32 %v1918_v3, %v1856_v9  ;;  %v2431_v17 = vpack.c.bf16 %v1079_v12, %v1076_v4  ;;  %v1786_v19 = vadd.f32 %v1785_v7, %v1079_v12  ;;  %v1857_v20 = vmul.f32 %v1079_v12, %v1079_v12  ;;  %v1081_v21 = vpop.f32.mrb[43].mxu0  ;;  %v1209_v22 = vpop.f32.mrb[43].mxu1 }
 0x16e   : > { %v2511_v25 = vpack.c.bf16 %v3049_v13, %v3047_v5 }
 0x16f   : > { %2547 = vst [vmem:[%s2967_s13 + $0x50] sm:$0xff] %v2431_v17   ;;  %v1920_v26 = vadd.f32 %v1919_v15, %v1857_v20 }
 0x170   : > { %2563 = vst [vmem:[%s2967_s13 + $0xd0] sm:$0xff] %v2511_v25  }
 0x172   : > { %v1084_v27 = vpop.f32.mrb[44].mxu0  ;;  %v3055_v29 = vpop.f32.mrb[44].mxu1 }
 0x173   : > { %v1787_v30 = vadd.f32 %v1786_v19, %v1084_v27  ;;  %v1858_v31 = vmul.f32 %v1084_v27, %v1084_v27  ;;  %v1086_v33 = vpop.f32.mrb[45].mxu0  ;;  %v1214_v34 = vpop.f32.mrb[45].mxu1 }
 0x174   : > { %v1087_v37 = vpop.f32.mrb[46].mxu0  ;;  %v3057_v39 = vpop.f32.mrb[46].mxu1 }
 0x175   : > { %v1921_v40 = vadd.f32 %v1920_v26, %v1858_v31  ;;  %v2436_v41 = vpack.c.bf16 %v1087_v37, %v1084_v27  ;;  %v1788_v43 = vadd.f32 %v1787_v30, %v1087_v37  ;;  %v1859_v44 = vmul.f32 %v1087_v37, %v1087_v37  ;;  %v1089_v45 = vpop.f32.mrb[47].mxu0  ;;  %v1217_v46 = vpop.f32.mrb[47].mxu1 }
 0x176   : > { %v2516_v47 = vpack.c.bf16 %v3057_v39, %v3055_v29 }
 0x177   : > { %2548 = vst [vmem:[%s2967_s13 + $0x58] sm:$0xff] %v2436_v41   ;;  %v1922_v50 = vadd.f32 %v1921_v40, %v1859_v44 }
 0x178   : > { %2564 = vst [vmem:[%s2967_s13 + $0xd8] sm:$0xff] %v2516_v47  }
 0x17a   : > { %v1092_v51 = vpop.f32.mrb[48].mxu0  ;;  %v3063_v52 = vpop.f32.mrb[48].mxu1 }
 0x17b   : > { %v1789_v55 = vadd.f32 %v1788_v43, %v1092_v51  ;;  %v1860_v56 = vmul.f32 %v1092_v51, %v1092_v51  ;;  %v1094_v58 = vpop.f32.mrb[49].mxu0  ;;  %v1222_v59 = vpop.f32.mrb[49].mxu1 }
 0x17c   : > { %v1095_v61 = vpop.f32.mrb[50].mxu0  ;;  %v3065_v62 = vpop.f32.mrb[50].mxu1 }
 0x17d   : > { %v1923_v63 = vadd.f32 %v1922_v50, %v1860_v56  ;;  %v2441_v1 = vpack.c.bf16 %v1095_v61, %v1092_v51  ;;  %v1790_v2 = vadd.f32 %v1789_v55, %v1095_v61  ;;  %v1861_v3 = vmul.f32 %v1095_v61, %v1095_v61  ;;  %v1097_v4 = vpop.f32.mrb[51].mxu0  ;;  %v1225_v7 = vpop.f32.mrb[51].mxu1 }
 0x17e   : > { %v2521_v9 = vpack.c.bf16 %v3065_v62, %v3063_v52 }
 0x17f   : > { %2549 = vst [vmem:[%s2967_s13 + $0x60] sm:$0xff] %v2441_v1   ;;  %v1924_v10 = vadd.f32 %v1923_v63, %v1861_v3 }
 0x180   : > { %2565 = vst [vmem:[%s2967_s13 + $0xe0] sm:$0xff] %v2521_v9  }
 0x182   : > { %v1100_v11 = vpop.f32.mrb[52].mxu0  ;;  %v3071_v12 = vpop.f32.mrb[52].mxu1 }
 0x183   : > { %v1791_v15 = vadd.f32 %v1790_v2, %v1100_v11  ;;  %v1862_v17 = vmul.f32 %v1100_v11, %v1100_v11  ;;  %v1102_v19 = vpop.f32.mrb[53].mxu0  ;;  %v1230_v20 = vpop.f32.mrb[53].mxu1 }
 0x184   : > { %v1103_v21 = vpop.f32.mrb[54].mxu0  ;;  %v3073_v22 = vpop.f32.mrb[54].mxu1 }
 0x185   : > { %v1925_v25 = vadd.f32 %v1924_v10, %v1862_v17  ;;  %v2446_v26 = vpack.c.bf16 %v1103_v21, %v1100_v11  ;;  %v1792_v27 = vadd.f32 %v1791_v15, %v1103_v21  ;;  %v1863_v30 = vmul.f32 %v1103_v21, %v1103_v21  ;;  %v1105_v31 = vpop.f32.mrb[55].mxu0  ;;  %v1233_v33 = vpop.f32.mrb[55].mxu1 }
 0x186   : > { %v2526_v34 = vpack.c.bf16 %v3073_v22, %v3071_v12 }
 0x187   : > { %2550 = vst [vmem:[%s2967_s13 + $0x68] sm:$0xff] %v2446_v26   ;;  %v1926_v37 = vadd.f32 %v1925_v25, %v1863_v30  ;;  %v1868_v30 = vmul.f32 %v2962_v18, %v2962_v18 }
 0x188   : > { %2566 = vst [vmem:[%s2967_s13 + $0xe8] sm:$0xff] %v2526_v34   ;;  %v1869_v34 = vmul.f32 %v2969_v23, %v2969_v23 }
 0x18a   : > { %v1108_v40 = vpop.f32.mrb[56].mxu0  ;;  %v3079_v41 = vpop.f32.mrb[56].mxu1 }
 0x18b   : > { %v1793_v43 = vadd.f32 %v1792_v27, %v1108_v40  ;;  %v1864_v44 = vmul.f32 %v1108_v40, %v1108_v40  ;;  %v1110_v45 = vpop.f32.mrb[57].mxu0  ;;  %v1238_v46 = vpop.f32.mrb[57].mxu1 }
 0x18c   : > { %v1111_v47 = vpop.f32.mrb[58].mxu0  ;;  %v3081_v50 = vpop.f32.mrb[58].mxu1  ;;  %v1871_v46 = vmul.f32 %v2977_v38, %v2977_v38 }
 0x18d   : > { %v1927_v51 = vadd.f32 %v1926_v37, %v1864_v44  ;;  %v2451_v55 = vpack.c.bf16 %v1111_v47, %v1108_v40  ;;  %v1794_v56 = vadd.f32 %v1793_v43, %v1111_v47  ;;  %v1865_v58 = vmul.f32 %v1111_v47, %v1111_v47  ;;  %v1113_v59 = vpop.f32.mrb[59].mxu0  ;;  %v1241_v61 = vpop.f32.mrb[59].mxu1 }
 0x18e   : > { %v2531_v63 = vpack.c.bf16 %v3081_v50, %v3079_v41  ;;  %v1870_v43 = vmul.f32 %v2975_v32, %v2975_v32 }
 0x18f   : > { %2551 = vst [vmem:[%s2967_s13 + $0x70] sm:$0xff] %v2451_v55   ;;  %v1928_v1 = vadd.f32 %v1927_v51, %v1865_v58  ;;  %v1872_v51 = vmul.f32 %v2983_v48, %v2983_v48 }
 0x190   : > { %2567 = vst [vmem:[%s2967_s13 + $0xf0] sm:$0xff] %v2531_v63  }
 0x192   : > { %v1116_v2 = vpop.f32.mrb[60].mxu0  ;;  %v3087_v3 = vpop.f32.mrb[60].mxu1 }
 0x193   : > { %v1795_v4 = vadd.f32 %v1794_v56, %v1116_v2  ;;  %v1866_v7 = vmul.f32 %v1116_v2, %v1116_v2  ;;  %v1118_v9 = vpop.f32.mrb[61].mxu0  ;;  %v1246_v10 = vpop.f32.mrb[61].mxu1 }
 0x194   : > { %v1119_v11 = vpop.f32.mrb[62].mxu0  ;;  %v3089_v15 = vpop.f32.mrb[62].mxu1 }
 0x195   : > { %v1929_v17 = vadd.f32 %v1928_v1, %v1866_v7  ;;  %v2456_v19 = vpack.c.bf16 %v1119_v11, %v1116_v2  ;;  %v1796_v20 = vadd.f32 %v1795_v4, %v1119_v11  ;;  %v1867_v21 = vmul.f32 %v1119_v11, %v1119_v11  ;;  %v1121_v25 = vpop.f32.mrb[63].mxu0  ;;  %v1249_v26 = vpop.f32.mrb[63].mxu1 }
 0x196   : > { %v2536_v27 = vpack.c.bf16 %v3089_v15, %v3087_v3 }
 0x197   : > { %2552 = vst [vmem:[%s2967_s13 + $0x78] sm:$0xff] %v2456_v19   ;;  %v1797_v31 = vadd.f32 %v1796_v20, %v2962_v18  ;;  %v1930_v33 = vadd.f32 %v1929_v17, %v1867_v21 }
 0x198   : > { %2568 = vst [vmem:[%s2967_s13 + $0xf8] sm:$0xff] %v2536_v27  }
 0x199   : > { %v1798_v37 = vadd.f32 %v1797_v31, %v2969_v23  ;;  %v1931_v40 = vadd.f32 %v1930_v33, %v1868_v30  ;;  %v1873_v23 = vmul.f32 %v2985_v54, %v2985_v54 }
 0x19b   : > { %v1799_v44 = vadd.f32 %v1798_v37, %v2975_v32  ;;  %v1932_v45 = vadd.f32 %v1931_v40, %v1869_v34  ;;  %v1874_v32 = vmul.f32 %v2991_v0, %v2991_v0  ;;  %v1884_v37 = vmul.f32 %v3031_v28, %v3031_v28 }
 0x19d   : > { %v1800_v47 = vadd.f32 %v1799_v44, %v2977_v38  ;;  %v1933_v18 = vadd.f32 %v1932_v45, %v1870_v43  ;;  %v1875_v38 = vmul.f32 %v2993_v6, %v2993_v6  ;;  %v1885_v44 = vmul.f32 %v3033_v36, %v3033_v36 }
 0x19f   : > { %v1801_v55 = vadd.f32 %v1800_v47, %v2983_v48  ;;  %v1934_v56 = vadd.f32 %v1933_v18, %v1871_v46  ;;  %v1876_v48 = vmul.f32 %v2999_v16, %v2999_v16  ;;  %v1886_v46 = vmul.f32 %v3039_v49, %v3039_v49 }
 0x1a0   : > { %v1887_v18 = vmul.f32 %v3041_v57, %v3041_v57 }
 0x1a1   : > { %v1802_v58 = vadd.f32 %v1801_v55, %v2985_v54  ;;  %v1935_v59 = vadd.f32 %v1934_v56, %v1872_v51  ;;  %v1877_v54 = vmul.f32 %v3001_v24, %v3001_v24  ;;  %v1888_v55 = vmul.f32 %v3047_v5, %v3047_v5 }
 0x1a3   : > { %v1803_v61 = vadd.f32 %v1802_v58, %v2991_v0  ;;  %v1936_v63 = vadd.f32 %v1935_v59, %v1873_v23  ;;  %v1878_v0 = vmul.f32 %v3007_v35, %v3007_v35  ;;  %v1889_v23 = vmul.f32 %v3049_v13, %v3049_v13 }
 0x1a4   : > { %v1890_v59 = vmul.f32 %v3055_v29, %v3055_v29 }
 0x1a5   : > { %v1804_v1 = vadd.f32 %v1803_v61, %v2993_v6  ;;  %v1937_v2 = vadd.f32 %v1936_v63, %v1874_v32  ;;  %v1879_v6 = vmul.f32 %v3009_v42, %v3009_v42  ;;  %v1891_v61 = vmul.f32 %v3057_v39, %v3057_v39 }
 0x1a7   : > { %v1938_v4 = vadd.f32 %v1937_v2, %v1875_v38  ;;  %v1805_v7 = vadd.f32 %v1804_v1, %v2999_v16  ;;  %v1880_v16 = vmul.f32 %v3015_v53, %v3015_v53  ;;  %v1892_v38 = vmul.f32 %v3063_v52, %v3063_v52 }
 0x1a8   : > { %v1893_v2 = vmul.f32 %v3065_v62, %v3065_v62 }
 0x1a9   : > { %v1806_v9 = vadd.f32 %v1805_v7, %v3001_v24  ;;  %v1939_v10 = vadd.f32 %v1938_v4, %v1876_v48  ;;  %v1881_v24 = vmul.f32 %v3017_v60, %v3017_v60  ;;  %v1894_v4 = vmul.f32 %v3071_v12, %v3071_v12 }
 0x1ab   : > { %v1807_v11 = vadd.f32 %v1806_v9, %v3007_v35  ;;  %v1940_v17 = vadd.f32 %v1939_v10, %v1877_v54  ;;  %v1882_v35 = vmul.f32 %v3023_v8, %v3023_v8  ;;  %v1895_v54 = vmul.f32 %v3073_v22, %v3073_v22 }
 0x1ad   : > { %v1808_v19 = vadd.f32 %v1807_v11, %v3009_v42  ;;  %v1941_v20 = vadd.f32 %v1940_v17, %v1878_v0  ;;  %v1883_v42 = vmul.f32 %v3025_v14, %v3025_v14  ;;  %v1897_v11 = vmul.f32 %v3081_v50, %v3081_v50 }
 0x1af   : > { %v1809_v21 = vadd.f32 %v1808_v19, %v3015_v53  ;;  %v1942_v25 = vadd.f32 %v1941_v20, %v1879_v6  ;;  %v1899_v20 = vmul.f32 %v3089_v15, %v3089_v15 }
 0x1b1   : > { %v1810_v26 = vadd.f32 %v1809_v21, %v3017_v60  ;;  %v1943_v27 = vadd.f32 %v1942_v25, %v1880_v16 }
 0x1b3   : > { %v1811_v30 = vadd.f32 %v1810_v26, %v3023_v8  ;;  %v1944_v31 = vadd.f32 %v1943_v27, %v1881_v24 }
 0x1b5   : > { %v1812_v33 = vadd.f32 %v1811_v30, %v3025_v14  ;;  %v1945_v34 = vadd.f32 %v1944_v31, %v1882_v35 }
 0x1b7   : > { %v1813_v53 = vadd.f32 %v1812_v33, %v3031_v28  ;;  %v1946_v40 = vadd.f32 %v1945_v34, %v1883_v42 }
 0x1b9   : > { %v1947_v60 = vadd.f32 %v1946_v40, %v1884_v37  ;;  %v1814_v43 = vadd.f32 %v1813_v53, %v3033_v36 }
 0x1bb   : > { %v1948_v8 = vadd.f32 %v1947_v60, %v1885_v44  ;;  %v1815_v45 = vadd.f32 %v1814_v43, %v3039_v49 }
 0x1bd   : > { %v1949_v14 = vadd.f32 %v1948_v8, %v1886_v46  ;;  %v1816_v47 = vadd.f32 %v1815_v45, %v3041_v57 }
 0x1bf   : > { %v1950_v28 = vadd.f32 %v1949_v14, %v1887_v18  ;;  %v1817_v51 = vadd.f32 %v1816_v47, %v3047_v5 }
 0x1c1   : > { %v1951_v56 = vadd.f32 %v1950_v28, %v1888_v55  ;;  %v1818_v36 = vadd.f32 %v1817_v51, %v3049_v13 }
 0x1c3   : > { %v1952_v58 = vadd.f32 %v1951_v56, %v1889_v23  ;;  %v1819_v49 = vadd.f32 %v1818_v36, %v3055_v29 }
 0x1c5   : > { %v1953_v32 = vadd.f32 %v1952_v58, %v1890_v59  ;;  %v1820_v57 = vadd.f32 %v1819_v49, %v3057_v39 }
 0x1c7   : > { %v1954_v63 = vadd.f32 %v1953_v32, %v1891_v61  ;;  %v1821_v5 = vadd.f32 %v1820_v57, %v3063_v52 }
 0x1c9   : > { %v1955_v1 = vadd.f32 %v1954_v63, %v1892_v38  ;;  %v1822_v13 = vadd.f32 %v1821_v5, %v3065_v62  ;;  %v1896_v62 = vmul.f32 %v3079_v41, %v3079_v41 }
 0x1cb   : > { %v1956_v48 = vadd.f32 %v1955_v1, %v1893_v2  ;;  %v1823_v29 = vadd.f32 %v1822_v13, %v3071_v12  ;;  %v1898_v12 = vmul.f32 %v3087_v3, %v3087_v3 }
 0x1cd   : > { %v1957_v39 = vadd.f32 %v1956_v48, %v1894_v4  ;;  %v1824_v7 = vadd.f32 %v1823_v29, %v3073_v22 }
 0x1cf   : > { %v1958_v52 = vadd.f32 %v1957_v39, %v1895_v54  ;;  %v1825_v9 = vadd.f32 %v1824_v7, %v3079_v41 }
 0x1d1   : > { %v1959_v10 = vadd.f32 %v1958_v52, %v1896_v62  ;;  %v1826_v0 = vadd.f32 %v1825_v9, %v3081_v50 }
 0x1d3   : > { %v1960_v17 = vadd.f32 %v1959_v10, %v1897_v11  ;;  %v1827_v6 = vadd.f32 %v1826_v0, %v3087_v3 }
 0x1d5   : > { %v1961_v22 = vadd.f32 %v1960_v17, %v1898_v12  ;;  %v1828_v19 = vadd.f32 %v1827_v6, %v3089_v15 }
 0x1d7   : > { %v1829_v41 = vrot.slane %v1828_v19, 4  ;;  %v1962_v16 = vadd.f32 %v1961_v22, %v1899_v20 }
 0x1d9   : > { %v1830_v21 = vadd.f32 %v1829_v41, %v1828_v19  ;;  %v1963_v25 = vrot.slane %v1962_v16, 4 }
 0x1db   : > { %v1831_v24 = vrot.slane %v1830_v21, 2  ;;  %v1964_v50 = vadd.f32 %v1963_v25, %v1962_v16 }
 0x1dd   : > { %v1832_v26 = vadd.f32 %v1831_v24, %v1830_v21  ;;  %v1965_v27 = vrot.slane %v1964_v50, 2 }
 0x1df   : > { %v1833_v35 = vrot.slane %v1832_v26, 1  ;;  %v1966_v30 = vadd.f32 %v1965_v27, %v1964_v50 }
 0x1e1   : > { %v1834_v3 = vadd.f32 %v1833_v35, %v1832_v26  ;;  %v1967_v31 = vrot.slane %v1966_v30, 1 }
 0x1e3   : > { %1835 = vst [vmem:[%s309_s19] sm:$0x1] %v1834_v3  ;;  %v1968_v15 = vadd.f32 %v1967_v31, %v1966_v30 }
 0x1e5   : > { %1969 = vst [vmem:[%s316_s23] sm:$0x1] %v1968_v15 }
 0x1e6 PF: > { %s15_s17 = sadd.s32 1, %s2760_s17   ;;  %s3213_s15 = smov %s2756_s16 }
 0x1e7   : > { %p12_p6 = scmp.ge.s32.totalorder %s15_s17, 6   ;;  %s3214_s16 = smov %s3216_s18 }
 0x1e9   :  { %14 = sbr.rel (!%p12_p6) target bundleno = 2 (0x2), region = 93 }

// kernel: _stem_body.3
= control target key start
LH: loop header
LB: loop body
LE: loop exit
PB: predicated region body
PF: predicated region fallthrough
CT: control target
= control target key end

     0   :  { %s5846_s0 = inlined_call_operand.vmem [shape: bf16[2048,128], index: 0, kind: input, shape index: {}]   ;;  %s5847_s1 = inlined_call_operand.vmem [shape: f32[1,128], index: 1, kind: input, shape index: {}]   ;;  %s5848_s2 = inlined_call_operand.vmem [shape: f32[1,128], index: 2, kind: input, shape index: {}]   ;;  %s5849_s3 = inlined_call_operand.vmem [shape: bf16[2048,128], index: 3, kind: output, shape index: {}]  }
   0x1   :  { %v3107_v0 = vld [vmem:[%s5846_s0] sm:$0xff]   ;;  %v4258_v4 = vld [vmem:[%s5846_s0 + $0x8] sm:$0xff]   ;;  %v4259_v5 = vld [vmem:[%s5846_s0 + $0x10] sm:$0xff]  }
   0x2   :  { %v4542_v1 = vld [vmem:[%s5847_s1] ss:$0 sm:$0xff]  ;;  %v3108_v2 = vunpack.c.l.bf16 %v3107_v0  ;;  %v3109_v3 = vunpack.c.h.bf16 %v3107_v0  ;;  %v4260_v6 = vld [vmem:[%s5846_s0 + $0x18] sm:$0xff]   ;;  %v3112_v8 = vunpack.c.l.bf16 %v4258_v4  ;;  %v3113_v9 = vunpack.c.h.bf16 %v4258_v4  ;;  %v4262_v33 = vld [vmem:[%s5846_s0 + $0x28] sm:$0xff]  }
   0x3   :  { %v4556_v7 = vld [vmem:[%s5848_s2] ss:$0 sm:$0xff]  ;;  %v3116_v10 = vunpack.c.l.bf16 %v4259_v5  ;;  %v3117_v11 = vunpack.c.h.bf16 %v4259_v5  ;;  %v3120_v14 = vunpack.c.l.bf16 %v4260_v6  ;;  %v3121_v15 = vunpack.c.h.bf16 %v4260_v6  ;;  %v4263_v38 = vld [vmem:[%s5846_s0 + $0x30] sm:$0xff]   ;;  %v4264_v43 = vld [vmem:[%s5846_s0 + $0x38] sm:$0xff]  }
   0x4   :  { %v533_v12 = vmul.f32 %v3108_v2, %v4542_v1  ;;  %v534_v13 = vmul.f32 %v3109_v3, %v4542_v1  ;;  %v535_v16 = vmul.f32 %v3112_v8, %v4542_v1  ;;  %v536_v17 = vmul.f32 %v3113_v9, %v4542_v1  ;;  %v4261_v28 = vld [vmem:[%s5846_s0 + $0x20] sm:$0xff]  }
   0x5   :  { %v537_v18 = vmul.f32 %v3116_v10, %v4542_v1  ;;  %v538_v19 = vmul.f32 %v3117_v11, %v4542_v1  ;;  %v539_v22 = vmul.f32 %v3120_v14, %v4542_v1  ;;  %v540_v23 = vmul.f32 %v3121_v15, %v4542_v1  ;;  %v4265_v0 = vld [vmem:[%s5846_s0 + $0x40] sm:$0xff]   ;;  %v4266_v11 = vld [vmem:[%s5846_s0 + $0x48] sm:$0xff]  }
   0x6   :  { %v796_v20 = vadd.f32 %v4556_v7, %v533_v12  ;;  %v797_v21 = vadd.f32 %v4556_v7, %v534_v13  ;;  %v798_v24 = vadd.f32 %v4556_v7, %v535_v16  ;;  %v799_v25 = vadd.f32 %v4556_v7, %v536_v17  ;;  %v4267_v16 = vld [vmem:[%s5846_s0 + $0x50] sm:$0xff]  }
   0x7   :  { %v800_v26 = vadd.f32 %v4556_v7, %v537_v18  ;;  %v801_v27 = vadd.f32 %v4556_v7, %v538_v19  ;;  %v802_v31 = vadd.f32 %v4556_v7, %v539_v22  ;;  %v803_v32 = vadd.f32 %v4556_v7, %v540_v23 }
   0x8   :  { %v1052_v29 = vmax.f32 %v796_v20, 0.0  ;;  %v1053_v30 = vmax.f32 %v797_v21, 0.0  ;;  %v1054_v34 = vmax.f32 %v798_v24, 0.0  ;;  %v1055_v35 = vmax.f32 %v799_v25, 0.0  ;;  %v4268_v25 = vld [vmem:[%s5846_s0 + $0x58] sm:$0xff]  }
   0x9   :  { %v1056_v36 = vmax.f32 %v800_v26, 0.0  ;;  %v1057_v37 = vmax.f32 %v801_v27, 0.0  ;;  %v1058_v40 = vmax.f32 %v802_v31, 0.0  ;;  %v1059_v41 = vmax.f32 %v803_v32, 0.0 }
   0xa   :  { %v3621_v39 = vpack.c.bf16 %v1053_v30, %v1052_v29  ;;  %v3124_v42 = vunpack.c.l.bf16 %v4261_v28  ;;  %v3626_v44 = vpack.c.bf16 %v1055_v35, %v1054_v34  ;;  %v3125_v46 = vunpack.c.h.bf16 %v4261_v28 }
   0xb   :  { %v3631_v45 = vpack.c.bf16 %v1057_v37, %v1056_v36  ;;  %v3128_v47 = vunpack.c.l.bf16 %v4262_v33  ;;  %v3636_v48 = vpack.c.bf16 %v1059_v41, %v1058_v40  ;;  %v3129_v50 = vunpack.c.h.bf16 %v4262_v33 }
   0xc   :  { %3622 = vst [vmem:[%s5849_s3] sm:$0xff] %v3621_v39   ;;  %v541_v49 = vmul.f32 %v3124_v42, %v4542_v1  ;;  %v3132_v51 = vunpack.c.l.bf16 %v4263_v38  ;;  %4385 = vst [vmem:[%s5849_s3 + $0x8] sm:$0xff] %v3626_v44   ;;  %v542_v52 = vmul.f32 %v3125_v46, %v4542_v1  ;;  %v3133_v54 = vunpack.c.h.bf16 %v4263_v38  ;;  %v4269_v38 = vld [vmem:[%s5846_s0 + $0x60] sm:$0xff]  }
   0xd   :  { %4386 = vst [vmem:[%s5849_s3 + $0x10] sm:$0xff] %v3631_v45   ;;  %v543_v53 = vmul.f32 %v3128_v47, %v4542_v1  ;;  %v3136_v55 = vunpack.c.l.bf16 %v4264_v43  ;;  %4387 = vst [vmem:[%s5849_s3 + $0x18] sm:$0xff] %v3636_v48   ;;  %v544_v57 = vmul.f32 %v3129_v50, %v4542_v1  ;;  %v3137_v59 = vunpack.c.h.bf16 %v4264_v43 }
   0xe   :  { %v804_v56 = vadd.f32 %v4556_v7, %v541_v49  ;;  %v545_v58 = vmul.f32 %v3132_v51, %v4542_v1  ;;  %v805_v60 = vadd.f32 %v4556_v7, %v542_v52  ;;  %v546_v62 = vmul.f32 %v3133_v54, %v4542_v1  ;;  %v4270_v51 = vld [vmem:[%s5846_s0 + $0x68] sm:$0xff]  }
   0xf   :  { %v806_v61 = vadd.f32 %v4556_v7, %v543_v53  ;;  %v547_v63 = vmul.f32 %v3136_v55, %v4542_v1  ;;  %v807_v3 = vadd.f32 %v4556_v7, %v544_v57  ;;  %v548_v5 = vmul.f32 %v3137_v59, %v4542_v1 }
  0x10   :  { %v1060_v2 = vmax.f32 %v804_v56, 0.0  ;;  %v808_v4 = vadd.f32 %v4556_v7, %v545_v58  ;;  %v1061_v6 = vmax.f32 %v805_v60, 0.0  ;;  %v809_v9 = vadd.f32 %v4556_v7, %v546_v62  ;;  %v4271_v60 = vld [vmem:[%s5846_s0 + $0x70] sm:$0xff]  }
  0x11   :  { %v1062_v8 = vmax.f32 %v806_v61, 0.0  ;;  %v810_v10 = vadd.f32 %v4556_v7, %v547_v63  ;;  %v1063_v12 = vmax.f32 %v807_v3, 0.0  ;;  %v811_v14 = vadd.f32 %v4556_v7, %v548_v5 }
  0x12   :  { %v1064_v13 = vmax.f32 %v808_v4, 0.0  ;;  %v3140_v15 = vunpack.c.l.bf16 %v4265_v0  ;;  %v3641_v17 = vpack.c.bf16 %v1061_v6, %v1060_v2  ;;  %v1065_v18 = vmax.f32 %v809_v9, 0.0  ;;  %v4272_v2 = vld [vmem:[%s5846_s0 + $0x78] sm:$0xff]  }
  0x13   :  { %v1066_v19 = vmax.f32 %v810_v10, 0.0  ;;  %v3141_v20 = vunpack.c.h.bf16 %v4265_v0  ;;  %v3646_v21 = vpack.c.bf16 %v1063_v12, %v1062_v8  ;;  %v1067_v22 = vmax.f32 %v811_v14, 0.0  ;;  %v4273_v12 = vld [vmem:[%s5846_s0 + $0x80] sm:$0xff]  }
  0x14   :  { %v549_v23 = vmul.f32 %v3140_v15, %v4542_v1  ;;  %v3144_v24 = vunpack.c.l.bf16 %v4266_v11  ;;  %4388 = vst [vmem:[%s5849_s3 + $0x20] sm:$0xff] %v3641_v17   ;;  %v3651_v26 = vpack.c.bf16 %v1065_v18, %v1064_v13  ;;  %v3145_v28 = vunpack.c.h.bf16 %v4266_v11 }
  0x15   :  { %v550_v27 = vmul.f32 %v3141_v20, %v4542_v1  ;;  %v3148_v29 = vunpack.c.l.bf16 %v4267_v16  ;;  %4389 = vst [vmem:[%s5849_s3 + $0x28] sm:$0xff] %v3646_v21   ;;  %v3656_v30 = vpack.c.bf16 %v1067_v22, %v1066_v19  ;;  %v3149_v33 = vunpack.c.h.bf16 %v4267_v16 }
  0x16   :  { %v812_v31 = vadd.f32 %v4556_v7, %v549_v23  ;;  %v551_v32 = vmul.f32 %v3144_v24, %v4542_v1  ;;  %4390 = vst [vmem:[%s5849_s3 + $0x30] sm:$0xff] %v3651_v26   ;;  %v552_v35 = vmul.f32 %v3145_v28, %v4542_v1  ;;  %v3152_v37 = vunpack.c.l.bf16 %v4268_v25 }
  0x17   :  { %v813_v34 = vadd.f32 %v4556_v7, %v550_v27  ;;  %v553_v36 = vmul.f32 %v3148_v29, %v4542_v1  ;;  %4391 = vst [vmem:[%s5849_s3 + $0x38] sm:$0xff] %v3656_v30   ;;  %v554_v41 = vmul.f32 %v3149_v33, %v4542_v1  ;;  %v3153_v42 = vunpack.c.h.bf16 %v4268_v25  ;;  %v4274_v29 = vld [vmem:[%s5846_s0 + $0x88] sm:$0xff]  }
  0x18   :  { %v1068_v39 = vmax.f32 %v812_v31, 0.0  ;;  %v814_v40 = vadd.f32 %v4556_v7, %v551_v32  ;;  %v815_v44 = vadd.f32 %v4556_v7, %v552_v35  ;;  %v555_v46 = vmul.f32 %v3152_v37, %v4542_v1 }
  0x19   :  { %v1069_v43 = vmax.f32 %v813_v34, 0.0  ;;  %v816_v45 = vadd.f32 %v4556_v7, %v553_v36  ;;  %v817_v48 = vadd.f32 %v4556_v7, %v554_v41  ;;  %v556_v49 = vmul.f32 %v3153_v42, %v4542_v1  ;;  %v4275_v34 = vld [vmem:[%s5846_s0 + $0x90] sm:$0xff]  }
  0x1a   :  { %v1070_v47 = vmax.f32 %v814_v40, 0.0  ;;  %v3156_v50 = vunpack.c.l.bf16 %v4269_v38  ;;  %v1071_v53 = vmax.f32 %v815_v44, 0.0  ;;  %v818_v55 = vadd.f32 %v4556_v7, %v555_v46 }
  0x1b   :  { %v3661_v52 = vpack.c.bf16 %v1069_v43, %v1068_v39  ;;  %v1072_v54 = vmax.f32 %v816_v45, 0.0  ;;  %v1073_v56 = vmax.f32 %v817_v48, 0.0  ;;  %v819_v57 = vadd.f32 %v4556_v7, %v556_v49  ;;  %v4276_v43 = vld [vmem:[%s5846_s0 + $0x98] sm:$0xff]  }
  0x1c   :  { %v3157_v58 = vunpack.c.h.bf16 %v4269_v38  ;;  %v557_v59 = vmul.f32 %v3156_v50, %v4542_v1  ;;  %v3666_v61 = vpack.c.bf16 %v1071_v53, %v1070_v47  ;;  %v1074_v62 = vmax.f32 %v818_v55, 0.0 }
  0x1d   :  { %4392 = vst [vmem:[%s5849_s3 + $0x40] sm:$0xff] %v3661_v52   ;;  %v3160_v63 = vunpack.c.l.bf16 %v4270_v51  ;;  %v3161_v0 = vunpack.c.h.bf16 %v4270_v51  ;;  %v3671_v3 = vpack.c.bf16 %v1073_v56, %v1072_v54  ;;  %v1075_v4 = vmax.f32 %v819_v57, 0.0  ;;  %v4277_v56 = vld [vmem:[%s5846_s0 + $0xa0] sm:$0xff]  }
  0x1e   :  { %v558_v5 = vmul.f32 %v3157_v58, %v4542_v1  ;;  %v820_v6 = vadd.f32 %v4556_v7, %v557_v59  ;;  %4393 = vst [vmem:[%s5849_s3 + $0x48] sm:$0xff] %v3666_v61   ;;  %v3164_v10 = vunpack.c.l.bf16 %v4271_v60  ;;  %v3165_v11 = vunpack.c.h.bf16 %v4271_v60 }
  0x1f   :  { %v559_v8 = vmul.f32 %v3160_v63, %v4542_v1  ;;  %v560_v9 = vmul.f32 %v3161_v0, %v4542_v1  ;;  %4394 = vst [vmem:[%s5849_s3 + $0x50] sm:$0xff] %v3671_v3   ;;  %v3676_v13 = vpack.c.bf16 %v1075_v4, %v1074_v62  ;;  %v3168_v16 = vunpack.c.l.bf16 %v4272_v2 }
  0x20   :  { %v821_v14 = vadd.f32 %v4556_v7, %v558_v5  ;;  %v1076_v15 = vmax.f32 %v820_v6, 0.0  ;;  %v561_v19 = vmul.f32 %v3164_v10, %v4542_v1  ;;  %v562_v20 = vmul.f32 %v3165_v11, %v4542_v1 }
  0x21   :  { %v822_v17 = vadd.f32 %v4556_v7, %v559_v8  ;;  %v823_v18 = vadd.f32 %v4556_v7, %v560_v9  ;;  %4395 = vst [vmem:[%s5849_s3 + $0x58] sm:$0xff] %v3676_v13   ;;  %v3169_v22 = vunpack.c.h.bf16 %v4272_v2  ;;  %v563_v23 = vmul.f32 %v3168_v16, %v4542_v1  ;;  %v4278_v2 = vld [vmem:[%s5846_s0 + $0xa8] sm:$0xff]   ;;  %v4279_v16 = vld [vmem:[%s5846_s0 + $0xb0] sm:$0xff]  }
  0x22   :  { %v1077_v21 = vmax.f32 %v821_v14, 0.0  ;;  %v3172_v24 = vunpack.c.l.bf16 %v4273_v12  ;;  %v824_v27 = vadd.f32 %v4556_v7, %v561_v19  ;;  %v825_v28 = vadd.f32 %v4556_v7, %v562_v20 }
  0x23   :  { %v1078_v25 = vmax.f32 %v822_v17, 0.0  ;;  %v1079_v26 = vmax.f32 %v823_v18, 0.0  ;;  %v564_v31 = vmul.f32 %v3169_v22, %v4542_v1  ;;  %v826_v32 = vadd.f32 %v4556_v7, %v563_v23 }
  0x24   :  { %v3681_v30 = vpack.c.bf16 %v1077_v21, %v1076_v15  ;;  %v3173_v33 = vunpack.c.h.bf16 %v4273_v12  ;;  %v1080_v36 = vmax.f32 %v824_v27, 0.0  ;;  %v1081_v37 = vmax.f32 %v825_v28, 0.0  ;;  %v4280_v21 = vld [vmem:[%s5846_s0 + $0xb8] sm:$0xff]  }
  0x25   :  { %v3686_v35 = vpack.c.bf16 %v1079_v26, %v1078_v25  ;;  %v565_v38 = vmul.f32 %v3172_v24, %v4542_v1  ;;  %v827_v39 = vadd.f32 %v4556_v7, %v564_v31  ;;  %v1082_v40 = vmax.f32 %v826_v32, 0.0 }
  0x26   :  { %4396 = vst [vmem:[%s5849_s3 + $0x60] sm:$0xff] %v3681_v30   ;;  %v566_v41 = vmul.f32 %v3173_v33, %v4542_v1  ;;  %v3176_v42 = vunpack.c.l.bf16 %v4274_v29  ;;  %v3691_v44 = vpack.c.bf16 %v1081_v37, %v1080_v36  ;;  %v3177_v46 = vunpack.c.h.bf16 %v4274_v29 }
  0x27   :  { %4397 = vst [vmem:[%s5849_s3 + $0x68] sm:$0xff] %v3686_v35   ;;  %v828_v45 = vadd.f32 %v4556_v7, %v565_v38  ;;  %v3180_v47 = vunpack.c.l.bf16 %v4275_v34  ;;  %v1083_v48 = vmax.f32 %v827_v39, 0.0  ;;  %v3181_v51 = vunpack.c.h.bf16 %v4275_v34  ;;  %v4281_v34 = vld [vmem:[%s5846_s0 + $0xc0] sm:$0xff]  }
  0x28   :  { %v829_v49 = vadd.f32 %v4556_v7, %v566_v41  ;;  %v567_v50 = vmul.f32 %v3176_v42, %v4542_v1  ;;  %4398 = vst [vmem:[%s5849_s3 + $0x70] sm:$0xff] %v3691_v44   ;;  %v568_v53 = vmul.f32 %v3177_v46, %v4542_v1  ;;  %v3184_v55 = vunpack.c.l.bf16 %v4276_v43 }
  0x29   :  { %v1084_v52 = vmax.f32 %v828_v45, 0.0  ;;  %v569_v54 = vmul.f32 %v3180_v47, %v4542_v1  ;;  %v3696_v57 = vpack.c.bf16 %v1083_v48, %v1082_v40  ;;  %v570_v60 = vmul.f32 %v3181_v51, %v4542_v1  ;;  %v4282_v47 = vld [vmem:[%s5846_s0 + $0xc8] sm:$0xff]  }
  0x2a   :  { %v1085_v58 = vmax.f32 %v829_v49, 0.0  ;;  %v830_v59 = vadd.f32 %v4556_v7, %v567_v50  ;;  %v831_v61 = vadd.f32 %v4556_v7, %v568_v53  ;;  %v3185_v63 = vunpack.c.h.bf16 %v4276_v43 }
  0x2b   :  { %v832_v62 = vadd.f32 %v4556_v7, %v569_v54  ;;  %v571_v0 = vmul.f32 %v3184_v55, %v4542_v1  ;;  %4399 = vst [vmem:[%s5849_s3 + $0x78] sm:$0xff] %v3696_v57   ;;  %v833_v5 = vadd.f32 %v4556_v7, %v570_v60  ;;  %v3188_v6 = vunpack.c.l.bf16 %v4277_v56 }
  0x2c   :  { %v3701_v3 = vpack.c.bf16 %v1085_v58, %v1084_v52  ;;  %v1086_v4 = vmax.f32 %v830_v59, 0.0  ;;  %v1087_v8 = vmax.f32 %v831_v61, 0.0  ;;  %v572_v10 = vmul.f32 %v3185_v63, %v4542_v1  ;;  %v4283_v52 = vld [vmem:[%s5846_s0 + $0xd0] sm:$0xff]   ;;  %v4284_v61 = vld [vmem:[%s5846_s0 + $0xd8] sm:$0xff]  }
  0x2d   :  { %v1088_v9 = vmax.f32 %v832_v62, 0.0  ;;  %v834_v11 = vadd.f32 %v4556_v7, %v571_v0  ;;  %v1089_v12 = vmax.f32 %v833_v5, 0.0  ;;  %v3189_v13 = vunpack.c.h.bf16 %v4277_v56 }
  0x2e   :  { %4400 = vst [vmem:[%s5849_s3 + $0x80] sm:$0xff] %v3701_v3   ;;  %v573_v14 = vmul.f32 %v3188_v6, %v4542_v1  ;;  %v3192_v15 = vunpack.c.l.bf16 %v4278_v2  ;;  %v3706_v17 = vpack.c.bf16 %v1087_v8, %v1086_v4  ;;  %v835_v18 = vadd.f32 %v4556_v7, %v572_v10 }
  0x2f   :  { %v1090_v19 = vmax.f32 %v834_v11, 0.0  ;;  %v3193_v20 = vunpack.c.h.bf16 %v4278_v2  ;;  %v3711_v22 = vpack.c.bf16 %v1089_v12, %v1088_v9  ;;  %v574_v23 = vmul.f32 %v3189_v13, %v4542_v1  ;;  %v4285_v12 = vld [vmem:[%s5846_s0 + $0xe0] sm:$0xff]  }
  0x30   :  { %v836_v24 = vadd.f32 %v4556_v7, %v573_v14  ;;  %v575_v25 = vmul.f32 %v3192_v15, %v4542_v1  ;;  %4401 = vst [vmem:[%s5849_s3 + $0x88] sm:$0xff] %v3706_v17   ;;  %v1091_v26 = vmax.f32 %v835_v18, 0.0  ;;  %v3196_v28 = vunpack.c.l.bf16 %v4279_v16 }
  0x31   :  { %v576_v27 = vmul.f32 %v3193_v20, %v4542_v1  ;;  %v3197_v29 = vunpack.c.h.bf16 %v4279_v16  ;;  %4402 = vst [vmem:[%s5849_s3 + $0x90] sm:$0xff] %v3711_v22   ;;  %v837_v30 = vadd.f32 %v4556_v7, %v574_v23  ;;  %v3200_v33 = vunpack.c.l.bf16 %v4280_v21 }
  0x32   :  { %v1092_v31 = vmax.f32 %v836_v24, 0.0  ;;  %v838_v32 = vadd.f32 %v4556_v7, %v575_v25  ;;  %v3716_v35 = vpack.c.bf16 %v1091_v26, %v1090_v19  ;;  %v577_v37 = vmul.f32 %v3196_v28, %v4542_v1 }
  0x33   :  { %v839_v36 = vadd.f32 %v4556_v7, %v576_v27  ;;  %v578_v38 = vmul.f32 %v3197_v29, %v4542_v1  ;;  %v1093_v39 = vmax.f32 %v837_v30, 0.0  ;;  %v3201_v41 = vunpack.c.h.bf16 %v4280_v21  ;;  %v4286_v21 = vld [vmem:[%s5846_s0 + $0xe8] sm:$0xff]  }
  0x34   :  { %v1094_v40 = vmax.f32 %v838_v32, 0.0  ;;  %v579_v42 = vmul.f32 %v3200_v33, %v4542_v1  ;;  %4403 = vst [vmem:[%s5849_s3 + $0x98] sm:$0xff] %v3716_v35   ;;  %v840_v44 = vadd.f32 %v4556_v7, %v577_v37  ;;  %v3204_v46 = vunpack.c.l.bf16 %v4281_v34 }
  0x35   :  { %v1095_v43 = vmax.f32 %v839_v36, 0.0  ;;  %v841_v45 = vadd.f32 %v4556_v7, %v578_v38  ;;  %v3721_v48 = vpack.c.bf16 %v1093_v39, %v1092_v31  ;;  %v580_v49 = vmul.f32 %v3201_v41, %v4542_v1  ;;  %v4288_v39 = vld [vmem:[%s5846_s0 + $0xf8] sm:$0xff]  }
  0x36   :  { %v842_v50 = vadd.f32 %v4556_v7, %v579_v42  ;;  %v3205_v51 = vunpack.c.h.bf16 %v4281_v34  ;;  %v1096_v54 = vmax.f32 %v840_v44, 0.0  ;;  %v581_v56 = vmul.f32 %v3204_v46, %v4542_v1  ;;  %v4287_v34 = vld [vmem:[%s5846_s0 + $0xf0] sm:$0xff]  }
  0x37   :  { %v3726_v53 = vpack.c.bf16 %v1095_v43, %v1094_v40  ;;  %v1097_v55 = vmax.f32 %v841_v45, 0.0  ;;  %4404 = vst [vmem:[%s5849_s3 + $0xa0] sm:$0xff] %v3721_v48   ;;  %v843_v57 = vadd.f32 %v4556_v7, %v580_v49  ;;  %v3208_v60 = vunpack.c.l.bf16 %v4282_v47 }
  0x38   :  { %v1098_v58 = vmax.f32 %v842_v50, 0.0  ;;  %v582_v59 = vmul.f32 %v3205_v51, %v4542_v1  ;;  %v844_v63 = vadd.f32 %v4556_v7, %v581_v56  ;;  %v3209_v0 = vunpack.c.h.bf16 %v4282_v47 }
  0x39   :  { %4405 = vst [vmem:[%s5849_s3 + $0xa8] sm:$0xff] %v3726_v53   ;;  %v3731_v62 = vpack.c.bf16 %v1097_v55, %v1096_v54  ;;  %v3212_v2 = vunpack.c.l.bf16 %v4283_v52  ;;  %v1099_v3 = vmax.f32 %v843_v57, 0.0  ;;  %v583_v5 = vmul.f32 %v3208_v60, %v4542_v1 }
  0x3a   :  { %v845_v4 = vadd.f32 %v4556_v7, %v582_v59  ;;  %v3213_v6 = vunpack.c.h.bf16 %v4283_v52  ;;  %v1100_v8 = vmax.f32 %v844_v63, 0.0  ;;  %v584_v9 = vmul.f32 %v3209_v0, %v4542_v1  ;;  %v4289_v52 = vld [vmem:[%s5846_s0 + $0x100] sm:$0xff]  }
  0x3b   :  { %4406 = vst [vmem:[%s5849_s3 + $0xb0] sm:$0xff] %v3731_v62   ;;  %v585_v10 = vmul.f32 %v3212_v2, %v4542_v1  ;;  %v3216_v11 = vunpack.c.l.bf16 %v4284_v61  ;;  %v3736_v13 = vpack.c.bf16 %v1099_v3, %v1098_v58  ;;  %v846_v15 = vadd.f32 %v4556_v7, %v583_v5  ;;  %v4290_v2 = vld [vmem:[%s5846_s0 + $0x108] sm:$0xff]  }
  0x3c   :  { %v1101_v14 = vmax.f32 %v845_v4, 0.0  ;;  %v586_v16 = vmul.f32 %v3213_v6, %v4542_v1  ;;  %v847_v17 = vadd.f32 %v4556_v7, %v584_v9  ;;  %v3217_v19 = vunpack.c.h.bf16 %v4284_v61 }
  0x3d   :  { %v848_v18 = vadd.f32 %v4556_v7, %v585_v10  ;;  %v587_v20 = vmul.f32 %v3216_v11, %v4542_v1  ;;  %4407 = vst [vmem:[%s5849_s3 + $0xb8] sm:$0xff] %v3736_v13   ;;  %v1102_v23 = vmax.f32 %v846_v15, 0.0  ;;  %v3220_v25 = vunpack.c.l.bf16 %v4285_v12 }
  0x3e   :  { %v3741_v22 = vpack.c.bf16 %v1101_v14, %v1100_v8  ;;  %v849_v24 = vadd.f32 %v4556_v7, %v586_v16  ;;  %v1103_v26 = vmax.f32 %v847_v17, 0.0  ;;  %v588_v28 = vmul.f32 %v3217_v19, %v4542_v1  ;;  %v4291_v8 = vld [vmem:[%s5846_s0 + $0x110] sm:$0xff]   ;;  %v4292_v17 = vld [vmem:[%s5846_s0 + $0x118] sm:$0xff]  }
  0x3f   :  { %v1104_v27 = vmax.f32 %v848_v18, 0.0  ;;  %v850_v29 = vadd.f32 %v4556_v7, %v587_v20  ;;  %v3221_v31 = vunpack.c.h.bf16 %v4285_v12  ;;  %v589_v32 = vmul.f32 %v3220_v25, %v4542_v1 }
  0x40   :  { %4408 = vst [vmem:[%s5849_s3 + $0xc0] sm:$0xff] %v3741_v22   ;;  %v1105_v30 = vmax.f32 %v849_v24, 0.0  ;;  %v3224_v33 = vunpack.c.l.bf16 %v4286_v21  ;;  %v3746_v35 = vpack.c.bf16 %v1103_v26, %v1102_v23  ;;  %v851_v36 = vadd.f32 %v4556_v7, %v588_v28 }
  0x41   :  { %v1106_v37 = vmax.f32 %v850_v29, 0.0  ;;  %v3225_v38 = vunpack.c.h.bf16 %v4286_v21  ;;  %v590_v41 = vmul.f32 %v3221_v31, %v4542_v1  ;;  %v852_v42 = vadd.f32 %v4556_v7, %v589_v32 }
  0x42   :  { %v3751_v40 = vpack.c.bf16 %v1105_v30, %v1104_v27  ;;  %v591_v43 = vmul.f32 %v3224_v33, %v4542_v1  ;;  %4409 = vst [vmem:[%s5849_s3 + $0xc8] sm:$0xff] %v3746_v35   ;;  %v1107_v44 = vmax.f32 %v851_v36, 0.0  ;;  %v3228_v46 = vunpack.c.l.bf16 %v4287_v34  ;;  %v4293_v30 = vld [vmem:[%s5846_s0 + $0x120] sm:$0xff]  }
  0x43   :  { %v592_v45 = vmul.f32 %v3225_v38, %v4542_v1  ;;  %v3229_v47 = vunpack.c.h.bf16 %v4287_v34  ;;  %v853_v48 = vadd.f32 %v4556_v7, %v590_v41  ;;  %v1108_v49 = vmax.f32 %v852_v42, 0.0 }
  0x44   :  { %4410 = vst [vmem:[%s5849_s3 + $0xd0] sm:$0xff] %v3751_v40   ;;  %v854_v50 = vadd.f32 %v4556_v7, %v591_v43  ;;  %v3232_v51 = vunpack.c.l.bf16 %v4288_v39  ;;  %v3756_v53 = vpack.c.bf16 %v1107_v44, %v1106_v37  ;;  %v593_v55 = vmul.f32 %v3228_v46, %v4542_v1 }
  0x45   :  { %v855_v54 = vadd.f32 %v4556_v7, %v592_v45  ;;  %v594_v56 = vmul.f32 %v3229_v47, %v4542_v1  ;;  %v1109_v57 = vmax.f32 %v853_v48, 0.0  ;;  %v3233_v59 = vunpack.c.h.bf16 %v4288_v39  ;;  %v4294_v39 = vld [vmem:[%s5846_s0 + $0x128] sm:$0xff]  }
  0x46   :  { %v1110_v58 = vmax.f32 %v854_v50, 0.0  ;;  %v595_v60 = vmul.f32 %v3232_v51, %v4542_v1  ;;  %4411 = vst [vmem:[%s5849_s3 + $0xd8] sm:$0xff] %v3756_v53   ;;  %v856_v62 = vadd.f32 %v4556_v7, %v593_v55  ;;  %v3236_v0 = vunpack.c.l.bf16 %v4289_v52 }
  0x47   :  { %v1111_v61 = vmax.f32 %v855_v54, 0.0  ;;  %v857_v63 = vadd.f32 %v4556_v7, %v594_v56  ;;  %v3761_v3 = vpack.c.bf16 %v1109_v57, %v1108_v49  ;;  %v596_v4 = vmul.f32 %v3233_v59, %v4542_v1  ;;  %v4296_v57 = vld [vmem:[%s5846_s0 + $0x138] sm:$0xff]  }
  0x48   :  { %v858_v5 = vadd.f32 %v4556_v7, %v595_v60  ;;  %v3237_v6 = vunpack.c.h.bf16 %v4289_v52  ;;  %v1112_v10 = vmax.f32 %v856_v62, 0.0  ;;  %v597_v12 = vmul.f32 %v3236_v0, %v4542_v1  ;;  %v4295_v52 = vld [vmem:[%s5846_s0 + $0x130] sm:$0xff]  }
  0x49   :  { %v3766_v9 = vpack.c.bf16 %v1111_v61, %v1110_v58  ;;  %v1113_v11 = vmax.f32 %v857_v63, 0.0  ;;  %4412 = vst [vmem:[%s5849_s3 + $0xe0] sm:$0xff] %v3761_v3   ;;  %v859_v13 = vadd.f32 %v4556_v7, %v596_v4  ;;  %v3240_v16 = vunpack.c.l.bf16 %v4290_v2 }
  0x4a   :  { %v1114_v14 = vmax.f32 %v858_v5, 0.0  ;;  %v598_v15 = vmul.f32 %v3237_v6, %v4542_v1  ;;  %v860_v19 = vadd.f32 %v4556_v7, %v597_v12  ;;  %v3241_v20 = vunpack.c.h.bf16 %v4290_v2 }
  0x4b   :  { %4413 = vst [vmem:[%s5849_s3 + $0xe8] sm:$0xff] %v3766_v9   ;;  %v3771_v18 = vpack.c.bf16 %v1113_v11, %v1112_v10  ;;  %v3244_v21 = vunpack.c.l.bf16 %v4291_v8  ;;  %v1115_v22 = vmax.f32 %v859_v13, 0.0  ;;  %v599_v24 = vmul.f32 %v3240_v16, %v4542_v1 }
  0x4c   :  { %v861_v23 = vadd.f32 %v4556_v7, %v598_v15  ;;  %v3245_v25 = vunpack.c.h.bf16 %v4291_v8  ;;  %v1116_v26 = vmax.f32 %v860_v19, 0.0  ;;  %v600_v27 = vmul.f32 %v3241_v20, %v4542_v1  ;;  %v4297_v8 = vld [vmem:[%s5846_s0 + $0x140] sm:$0xff]  }
  0x4d   :  { %4414 = vst [vmem:[%s5849_s3 + $0xf0] sm:$0xff] %v3771_v18   ;;  %v601_v28 = vmul.f32 %v3244_v21, %v4542_v1  ;;  %v3248_v29 = vunpack.c.l.bf16 %v4292_v17  ;;  %v3776_v31 = vpack.c.bf16 %v1115_v22, %v1114_v14  ;;  %v862_v33 = vadd.f32 %v4556_v7, %v599_v24  ;;  %v4298_v21 = vld [vmem:[%s5846_s0 + $0x148] sm:$0xff]  }
  0x4e   :  { %v1117_v32 = vmax.f32 %v861_v23, 0.0  ;;  %v602_v34 = vmul.f32 %v3245_v25, %v4542_v1  ;;  %v863_v35 = vadd.f32 %v4556_v7, %v600_v27  ;;  %v3249_v37 = vunpack.c.h.bf16 %v4292_v17 }
  0x4f   :  { %v864_v36 = vadd.f32 %v4556_v7, %v601_v28  ;;  %v603_v38 = vmul.f32 %v3248_v29, %v4542_v1  ;;  %4415 = vst [vmem:[%s5849_s3 + $0xf8] sm:$0xff] %v3776_v31   ;;  %v1118_v41 = vmax.f32 %v862_v33, 0.0  ;;  %v3252_v43 = vunpack.c.l.bf16 %v4293_v30 }
  0x50   :  { %v3781_v40 = vpack.c.bf16 %v1117_v32, %v1116_v26  ;;  %v865_v42 = vadd.f32 %v4556_v7, %v602_v34  ;;  %v1119_v44 = vmax.f32 %v863_v35, 0.0  ;;  %v604_v46 = vmul.f32 %v3249_v37, %v4542_v1  ;;  %v4299_v26 = vld [vmem:[%s5846_s0 + $0x150] sm:$0xff]   ;;  %v4300_v35 = vld [vmem:[%s5846_s0 + $0x158] sm:$0xff]  }
  0x51   :  { %v1120_v45 = vmax.f32 %v864_v36, 0.0  ;;  %v866_v47 = vadd.f32 %v4556_v7, %v603_v38  ;;  %v3253_v49 = vunpack.c.h.bf16 %v4293_v30  ;;  %v605_v50 = vmul.f32 %v3252_v43, %v4542_v1 }
  0x52   :  { %4416 = vst [vmem:[%s5849_s3 + $0x100] sm:$0xff] %v3781_v40   ;;  %v1121_v48 = vmax.f32 %v865_v42, 0.0  ;;  %v3256_v51 = vunpack.c.l.bf16 %v4294_v39  ;;  %v3786_v53 = vpack.c.bf16 %v1119_v44, %v1118_v41  ;;  %v867_v54 = vadd.f32 %v4556_v7, %v604_v46 }
  0x53   :  { %v1122_v55 = vmax.f32 %v866_v47, 0.0  ;;  %v3257_v56 = vunpack.c.h.bf16 %v4294_v39  ;;  %v606_v59 = vmul.f32 %v3253_v49, %v4542_v1  ;;  %v868_v60 = vadd.f32 %v4556_v7, %v605_v50 }
  0x54   :  { %v3791_v58 = vpack.c.bf16 %v1121_v48, %v1120_v45  ;;  %v607_v61 = vmul.f32 %v3256_v51, %v4542_v1  ;;  %4417 = vst [vmem:[%s5849_s3 + $0x108] sm:$0xff] %v3786_v53   ;;  %v1123_v62 = vmax.f32 %v867_v54, 0.0  ;;  %v3260_v0 = vunpack.c.l.bf16 %v4295_v52  ;;  %v4301_v48 = vld [vmem:[%s5846_s0 + $0x160] sm:$0xff]  }
  0x55   :  { %v608_v63 = vmul.f32 %v3257_v56, %v4542_v1  ;;  %v3261_v2 = vunpack.c.h.bf16 %v4295_v52  ;;  %v869_v3 = vadd.f32 %v4556_v7, %v606_v59  ;;  %v1124_v4 = vmax.f32 %v868_v60, 0.0 }
  0x56   :  { %4418 = vst [vmem:[%s5849_s3 + $0x110] sm:$0xff] %v3791_v58   ;;  %v870_v5 = vadd.f32 %v4556_v7, %v607_v61  ;;  %v3264_v6 = vunpack.c.l.bf16 %v4296_v57  ;;  %v3796_v9 = vpack.c.bf16 %v1123_v62, %v1122_v55  ;;  %v609_v11 = vmul.f32 %v3260_v0, %v4542_v1 }
  0x57   :  { %v871_v10 = vadd.f32 %v4556_v7, %v608_v63  ;;  %v610_v12 = vmul.f32 %v3261_v2, %v4542_v1  ;;  %v1125_v13 = vmax.f32 %v869_v3, 0.0  ;;  %v3265_v15 = vunpack.c.h.bf16 %v4296_v57  ;;  %v4302_v57 = vld [vmem:[%s5846_s0 + $0x168] sm:$0xff]  }
  0x58   :  { %v1126_v14 = vmax.f32 %v870_v5, 0.0  ;;  %v611_v16 = vmul.f32 %v3264_v6, %v4542_v1  ;;  %4419 = vst [vmem:[%s5849_s3 + $0x118] sm:$0xff] %v3796_v9   ;;  %v872_v18 = vadd.f32 %v4556_v7, %v609_v11  ;;  %v3268_v20 = vunpack.c.l.bf16 %v4297_v8 }
  0x59   :  { %v1127_v17 = vmax.f32 %v871_v10, 0.0  ;;  %v873_v19 = vadd.f32 %v4556_v7, %v610_v12  ;;  %v3801_v22 = vpack.c.bf16 %v1125_v13, %v1124_v4  ;;  %v612_v23 = vmul.f32 %v3265_v15, %v4542_v1  ;;  %v4304_v13 = vld [vmem:[%s5846_s0 + $0x178] sm:$0xff]  }
  0x5a   :  { %v874_v24 = vadd.f32 %v4556_v7, %v611_v16  ;;  %v3269_v25 = vunpack.c.h.bf16 %v4297_v8  ;;  %v1128_v28 = vmax.f32 %v872_v18, 0.0  ;;  %v613_v30 = vmul.f32 %v3268_v20, %v4542_v1  ;;  %v4303_v8 = vld [vmem:[%s5846_s0 + $0x170] sm:$0xff]  }
  0x5b   :  { %v3806_v27 = vpack.c.bf16 %v1127_v17, %v1126_v14  ;;  %v1129_v29 = vmax.f32 %v873_v19, 0.0  ;;  %4420 = vst [vmem:[%s5849_s3 + $0x120] sm:$0xff] %v3801_v22   ;;  %v875_v31 = vadd.f32 %v4556_v7, %v612_v23  ;;  %v3272_v34 = vunpack.c.l.bf16 %v4298_v21 }
  0x5c   :  { %v1130_v32 = vmax.f32 %v874_v24, 0.0  ;;  %v614_v33 = vmul.f32 %v3269_v25, %v4542_v1  ;;  %v876_v37 = vadd.f32 %v4556_v7, %v613_v30  ;;  %v3273_v38 = vunpack.c.h.bf16 %v4298_v21 }
  0x5d   :  { %4421 = vst [vmem:[%s5849_s3 + $0x128] sm:$0xff] %v3806_v27   ;;  %v3811_v36 = vpack.c.bf16 %v1129_v29, %v1128_v28  ;;  %v3276_v39 = vunpack.c.l.bf16 %v4299_v26  ;;  %v1131_v40 = vmax.f32 %v875_v31, 0.0  ;;  %v615_v42 = vmul.f32 %v3272_v34, %v4542_v1 }
  0x5e   :  { %v877_v41 = vadd.f32 %v4556_v7, %v614_v33  ;;  %v3277_v43 = vunpack.c.h.bf16 %v4299_v26  ;;  %v1132_v44 = vmax.f32 %v876_v37, 0.0  ;;  %v616_v45 = vmul.f32 %v3273_v38, %v4542_v1  ;;  %v4305_v26 = vld [vmem:[%s5846_s0 + $0x180] sm:$0xff]  }
  0x5f   :  { %4422 = vst [vmem:[%s5849_s3 + $0x130] sm:$0xff] %v3811_v36   ;;  %v617_v46 = vmul.f32 %v3276_v39, %v4542_v1  ;;  %v3280_v47 = vunpack.c.l.bf16 %v4300_v35  ;;  %v3816_v49 = vpack.c.bf16 %v1131_v40, %v1130_v32  ;;  %v878_v51 = vadd.f32 %v4556_v7, %v615_v42  ;;  %v4306_v39 = vld [vmem:[%s5846_s0 + $0x188] sm:$0xff]   ;;  %v5026_v42 = vld [vmem:[%s5848_s2] ss:$0 sm:$0xff] }
  0x60   :  { %v1133_v50 = vmax.f32 %v877_v41, 0.0  ;;  %v618_v52 = vmul.f32 %v3277_v43, %v4542_v1  ;;  %v879_v53 = vadd.f32 %v4556_v7, %v616_v45  ;;  %v3281_v55 = vunpack.c.h.bf16 %v4300_v35  ;;  %v5020_v41 = vld [vmem:[%s5847_s1] ss:$0 sm:$0xff] }
  0x61   :  { %v880_v54 = vadd.f32 %v4556_v7, %v617_v46  ;;  %v619_v56 = vmul.f32 %v3280_v47, %v4542_v1  ;;  %4423 = vst [vmem:[%s5849_s3 + $0x138] sm:$0xff] %v3816_v49   ;;  %v1134_v59 = vmax.f32 %v878_v51, 0.0  ;;  %v3284_v61 = vunpack.c.l.bf16 %v4301_v48 }
  0x62   :  { %v3821_v58 = vpack.c.bf16 %v1133_v50, %v1132_v44  ;;  %v881_v60 = vadd.f32 %v4556_v7, %v618_v52  ;;  %v1135_v62 = vmax.f32 %v879_v53, 0.0  ;;  %v620_v0 = vmul.f32 %v3281_v55, %v4542_v1  ;;  %v4307_v44 = vld [vmem:[%s5846_s0 + $0x190] sm:$0xff]   ;;  %v4308_v53 = vld [vmem:[%s5846_s0 + $0x198] sm:$0xff]  }
  0x63   :  { %v1136_v63 = vmax.f32 %v880_v54, 0.0  ;;  %v882_v2 = vadd.f32 %v4556_v7, %v619_v56  ;;  %v3285_v4 = vunpack.c.h.bf16 %v4301_v48  ;;  %v621_v5 = vmul.f32 %v3284_v61, %v4542_v1 }
  0x64   :  { %4424 = vst [vmem:[%s5849_s3 + $0x140] sm:$0xff] %v3821_v58   ;;  %v1137_v3 = vmax.f32 %v881_v60, 0.0  ;;  %v3288_v6 = vunpack.c.l.bf16 %v4302_v57  ;;  %v3826_v9 = vpack.c.bf16 %v1135_v62, %v1134_v59  ;;  %v883_v10 = vadd.f32 %v4556_v7, %v620_v0 }
  0x65   :  { %v1138_v11 = vmax.f32 %v882_v2, 0.0  ;;  %v3289_v12 = vunpack.c.h.bf16 %v4302_v57  ;;  %v622_v15 = vmul.f32 %v3285_v4, %v4542_v1  ;;  %v884_v16 = vadd.f32 %v4556_v7, %v621_v5 }
  0x66   :  { %v3831_v14 = vpack.c.bf16 %v1137_v3, %v1136_v63  ;;  %v623_v17 = vmul.f32 %v3288_v6, %v4542_v1  ;;  %4425 = vst [vmem:[%s5849_s3 + $0x148] sm:$0xff] %v3826_v9   ;;  %v1139_v18 = vmax.f32 %v883_v10, 0.0  ;;  %v3292_v20 = vunpack.c.l.bf16 %v4303_v8  ;;  %v4309_v3 = vld [vmem:[%s5846_s0 + $0x1a0] sm:$0xff]  }
  0x67   :  { %v624_v19 = vmul.f32 %v3289_v12, %v4542_v1  ;;  %v3293_v21 = vunpack.c.h.bf16 %v4303_v8  ;;  %v885_v22 = vadd.f32 %v4556_v7, %v622_v15  ;;  %v1140_v23 = vmax.f32 %v884_v16, 0.0 }
  0x68   :  { %4426 = vst [vmem:[%s5849_s3 + $0x150] sm:$0xff] %v3831_v14   ;;  %v886_v24 = vadd.f32 %v4556_v7, %v623_v17  ;;  %v3296_v25 = vunpack.c.l.bf16 %v4304_v13  ;;  %v3836_v27 = vpack.c.bf16 %v1139_v18, %v1138_v11  ;;  %v625_v29 = vmul.f32 %v3292_v20, %v4542_v1 }
  0x69   :  { %v887_v28 = vadd.f32 %v4556_v7, %v624_v19  ;;  %v626_v30 = vmul.f32 %v3293_v21, %v4542_v1  ;;  %v1141_v31 = vmax.f32 %v885_v22, 0.0  ;;  %v3297_v33 = vunpack.c.h.bf16 %v4304_v13  ;;  %v4310_v13 = vld [vmem:[%s5846_s0 + $0x1a8] sm:$0xff]  }
  0x6a   :  { %v1142_v32 = vmax.f32 %v886_v24, 0.0  ;;  %v627_v34 = vmul.f32 %v3296_v25, %v4542_v1  ;;  %4427 = vst [vmem:[%s5849_s3 + $0x158] sm:$0xff] %v3836_v27   ;;  %v888_v36 = vadd.f32 %v4556_v7, %v625_v29  ;;  %v3300_v38 = vunpack.c.l.bf16 %v4305_v26 }
  0x6b   :  { %v1143_v35 = vmax.f32 %v887_v28, 0.0  ;;  %v889_v37 = vadd.f32 %v4556_v7, %v626_v30  ;;  %v3841_v40 = vpack.c.bf16 %v1141_v31, %v1140_v23  ;;  %v628_v1 = vmul.f32 %v5020_v41, %v3297_v33  ;;  %v4312_v31 = vld [vmem:[%s5846_s0 + $0x1b8] sm:$0xff]  }
  0x6c   :  { %v890_v7 = vadd.f32 %v5026_v42, %v627_v34  ;;  %v3301_v43 = vunpack.c.h.bf16 %v4305_v26  ;;  %v1144_v46 = vmax.f32 %v888_v36, 0.0  ;;  %v629_v48 = vmul.f32 %v5020_v41, %v3300_v38  ;;  %v4311_v26 = vld [vmem:[%s5846_s0 + $0x1b0] sm:$0xff]  }
  0x6d   :  { %v3846_v45 = vpack.c.bf16 %v1143_v35, %v1142_v32  ;;  %v1145_v47 = vmax.f32 %v889_v37, 0.0  ;;  %4428 = vst [vmem:[%s5849_s3 + $0x160] sm:$0xff] %v3841_v40   ;;  %v891_v49 = vadd.f32 %v5026_v42, %v628_v1  ;;  %v3304_v52 = vunpack.c.l.bf16 %v4306_v39 }
  0x6e   :  { %v1146_v50 = vmax.f32 %v890_v7, 0.0  ;;  %v630_v51 = vmul.f32 %v5020_v41, %v3301_v43  ;;  %v892_v55 = vadd.f32 %v5026_v42, %v629_v48  ;;  %v3305_v56 = vunpack.c.h.bf16 %v4306_v39 }
  0x6f   :  { %4429 = vst [vmem:[%s5849_s3 + $0x168] sm:$0xff] %v3846_v45   ;;  %v3851_v54 = vpack.c.bf16 %v1145_v47, %v1144_v46  ;;  %v3308_v57 = vunpack.c.l.bf16 %v4307_v44  ;;  %v1147_v58 = vmax.f32 %v891_v49, 0.0  ;;  %v631_v60 = vmul.f32 %v5020_v41, %v3304_v52 }
  0x70   :  { %v893_v59 = vadd.f32 %v5026_v42, %v630_v51  ;;  %v3309_v61 = vunpack.c.h.bf16 %v4307_v44  ;;  %v1148_v62 = vmax.f32 %v892_v55, 0.0  ;;  %v632_v63 = vmul.f32 %v5020_v41, %v3305_v56  ;;  %v4313_v44 = vld [vmem:[%s5846_s0 + $0x1c0] sm:$0xff]  }
  0x71   :  { %4430 = vst [vmem:[%s5849_s3 + $0x170] sm:$0xff] %v3851_v54   ;;  %v633_v0 = vmul.f32 %v5020_v41, %v3308_v57  ;;  %v3312_v2 = vunpack.c.l.bf16 %v4308_v53  ;;  %v3856_v4 = vpack.c.bf16 %v1147_v58, %v1146_v50  ;;  %v894_v6 = vadd.f32 %v5026_v42, %v631_v60  ;;  %v4314_v57 = vld [vmem:[%s5846_s0 + $0x1c8] sm:$0xff]  }
  0x72   :  { %v1149_v5 = vmax.f32 %v893_v59, 0.0  ;;  %v634_v8 = vmul.f32 %v5020_v41, %v3309_v61  ;;  %v895_v9 = vadd.f32 %v5026_v42, %v632_v63  ;;  %v3313_v11 = vunpack.c.h.bf16 %v4308_v53 }
  0x73   :  { %v896_v10 = vadd.f32 %v5026_v42, %v633_v0  ;;  %v635_v12 = vmul.f32 %v5020_v41, %v3312_v2  ;;  %4431 = vst [vmem:[%s5849_s3 + $0x178] sm:$0xff] %v3856_v4   ;;  %v1150_v15 = vmax.f32 %v894_v6, 0.0  ;;  %v3316_v17 = vunpack.c.l.bf16 %v4309_v3 }
  0x74   :  { %v3861_v14 = vpack.c.bf16 %v1149_v5, %v1148_v62  ;;  %v897_v16 = vadd.f32 %v5026_v42, %v634_v8  ;;  %v1151_v18 = vmax.f32 %v895_v9, 0.0  ;;  %v636_v20 = vmul.f32 %v5020_v41, %v3313_v11  ;;  %v4315_v62 = vld [vmem:[%s5846_s0 + $0x1d0] sm:$0xff]   ;;  %v4316_v9 = vld [vmem:[%s5846_s0 + $0x1d8] sm:$0xff]  }
  0x75   :  { %v1152_v19 = vmax.f32 %v896_v10, 0.0  ;;  %v898_v21 = vadd.f32 %v5026_v42, %v635_v12  ;;  %v3317_v23 = vunpack.c.h.bf16 %v4309_v3  ;;  %v637_v24 = vmul.f32 %v5020_v41, %v3316_v17 }
  0x76   :  { %4432 = vst [vmem:[%s5849_s3 + $0x180] sm:$0xff] %v3861_v14   ;;  %v1153_v22 = vmax.f32 %v897_v16, 0.0  ;;  %v3320_v25 = vunpack.c.l.bf16 %v4310_v13  ;;  %v3866_v27 = vpack.c.bf16 %v1151_v18, %v1150_v15  ;;  %v899_v28 = vadd.f32 %v5026_v42, %v636_v20 }
  0x77   :  { %v1154_v29 = vmax.f32 %v898_v21, 0.0  ;;  %v3321_v30 = vunpack.c.h.bf16 %v4310_v13  ;;  %v638_v33 = vmul.f32 %v5020_v41, %v3317_v23  ;;  %v900_v34 = vadd.f32 %v5026_v42, %v637_v24 }
  0x78   :  { %v3871_v32 = vpack.c.bf16 %v1153_v22, %v1152_v19  ;;  %v639_v35 = vmul.f32 %v5020_v41, %v3320_v25  ;;  %4433 = vst [vmem:[%s5849_s3 + $0x188] sm:$0xff] %v3866_v27   ;;  %v1155_v36 = vmax.f32 %v899_v28, 0.0  ;;  %v3324_v38 = vunpack.c.l.bf16 %v4311_v26  ;;  %v4317_v22 = vld [vmem:[%s5846_s0 + $0x1e0] sm:$0xff]  }
  0x79   :  { %v640_v37 = vmul.f32 %v5020_v41, %v3321_v30  ;;  %v3325_v39 = vunpack.c.h.bf16 %v4311_v26  ;;  %v901_v40 = vadd.f32 %v5026_v42, %v638_v33  ;;  %v1156_v1 = vmax.f32 %v900_v34, 0.0 }
  0x7a   :  { %4434 = vst [vmem:[%s5849_s3 + $0x190] sm:$0xff] %v3871_v32   ;;  %v902_v7 = vadd.f32 %v5026_v42, %v639_v35  ;;  %v3328_v43 = vunpack.c.l.bf16 %v4312_v31  ;;  %v3876_v45 = vpack.c.bf16 %v1155_v36, %v1154_v29  ;;  %v641_v47 = vmul.f32 %v5020_v41, %v3324_v38 }
  0x7b   :  { %v903_v46 = vadd.f32 %v5026_v42, %v640_v37  ;;  %v642_v48 = vmul.f32 %v5020_v41, %v3325_v39  ;;  %v1157_v49 = vmax.f32 %v901_v40, 0.0  ;;  %v3329_v51 = vunpack.c.h.bf16 %v4312_v31  ;;  %v4318_v31 = vld [vmem:[%s5846_s0 + $0x1e8] sm:$0xff]  }
  0x7c   :  { %v1158_v50 = vmax.f32 %v902_v7, 0.0  ;;  %v643_v52 = vmul.f32 %v5020_v41, %v3328_v43  ;;  %4435 = vst [vmem:[%s5849_s3 + $0x198] sm:$0xff] %v3876_v45   ;;  %v904_v54 = vadd.f32 %v5026_v42, %v641_v47  ;;  %v3332_v56 = vunpack.c.l.bf16 %v4313_v44 }
  0x7d   :  { %v1159_v53 = vmax.f32 %v903_v46, 0.0  ;;  %v905_v55 = vadd.f32 %v5026_v42, %v642_v48  ;;  %v3881_v58 = vpack.c.bf16 %v1157_v49, %v1156_v1  ;;  %v644_v59 = vmul.f32 %v5020_v41, %v3329_v51  ;;  %v4320_v49 = vld [vmem:[%s5846_s0 + $0x1f8] sm:$0xff]  }
  0x7e   :  { %v906_v60 = vadd.f32 %v5026_v42, %v643_v52  ;;  %v3333_v61 = vunpack.c.h.bf16 %v4313_v44  ;;  %v1160_v0 = vmax.f32 %v904_v54, 0.0  ;;  %v645_v3 = vmul.f32 %v5020_v41, %v3332_v56  ;;  %v4319_v44 = vld [vmem:[%s5846_s0 + $0x1f0] sm:$0xff]  }
  0x7f   :  { %v3886_v63 = vpack.c.bf16 %v1159_v53, %v1158_v50  ;;  %v1161_v2 = vmax.f32 %v905_v55, 0.0  ;;  %4436 = vst [vmem:[%s5849_s3 + $0x1a0] sm:$0xff] %v3881_v58   ;;  %v907_v4 = vadd.f32 %v5026_v42, %v644_v59  ;;  %v3336_v8 = vunpack.c.l.bf16 %v4314_v57 }
  0x80   :  { %v1162_v5 = vmax.f32 %v906_v60, 0.0  ;;  %v646_v6 = vmul.f32 %v5020_v41, %v3333_v61  ;;  %v908_v11 = vadd.f32 %v5026_v42, %v645_v3  ;;  %v3337_v12 = vunpack.c.h.bf16 %v4314_v57 }
  0x81   :  { %4437 = vst [vmem:[%s5849_s3 + $0x1a8] sm:$0xff] %v3886_v63   ;;  %v3891_v10 = vpack.c.bf16 %v1161_v2, %v1160_v0  ;;  %v3340_v13 = vunpack.c.l.bf16 %v4315_v62  ;;  %v1163_v14 = vmax.f32 %v907_v4, 0.0  ;;  %v647_v16 = vmul.f32 %v5020_v41, %v3336_v8 }
  0x82   :  { %v909_v15 = vadd.f32 %v5026_v42, %v646_v6  ;;  %v3341_v17 = vunpack.c.h.bf16 %v4315_v62  ;;  %v1164_v18 = vmax.f32 %v908_v11, 0.0  ;;  %v648_v19 = vmul.f32 %v5020_v41, %v3337_v12  ;;  %v4321_v62 = vld [vmem:[%s5846_s0 + $0x200] sm:$0xff]  }
  0x83   :  { %4438 = vst [vmem:[%s5849_s3 + $0x1b0] sm:$0xff] %v3891_v10   ;;  %v649_v20 = vmul.f32 %v5020_v41, %v3340_v13  ;;  %v3344_v21 = vunpack.c.l.bf16 %v4316_v9  ;;  %v3896_v23 = vpack.c.bf16 %v1163_v14, %v1162_v5  ;;  %v910_v25 = vadd.f32 %v5026_v42, %v647_v16  ;;  %v4322_v13 = vld [vmem:[%s5846_s0 + $0x208] sm:$0xff]  }
  0x84   :  { %v1165_v24 = vmax.f32 %v909_v15, 0.0  ;;  %v650_v26 = vmul.f32 %v5020_v41, %v3341_v17  ;;  %v911_v27 = vadd.f32 %v5026_v42, %v648_v19  ;;  %v3345_v29 = vunpack.c.h.bf16 %v4316_v9 }
  0x85   :  { %v912_v28 = vadd.f32 %v5026_v42, %v649_v20  ;;  %v651_v30 = vmul.f32 %v5020_v41, %v3344_v21  ;;  %4439 = vst [vmem:[%s5849_s3 + $0x1b8] sm:$0xff] %v3896_v23   ;;  %v1166_v33 = vmax.f32 %v910_v25, 0.0  ;;  %v3348_v35 = vunpack.c.l.bf16 %v4317_v22 }
  0x86   :  { %v3901_v32 = vpack.c.bf16 %v1165_v24, %v1164_v18  ;;  %v913_v34 = vadd.f32 %v5026_v42, %v650_v26  ;;  %v1167_v36 = vmax.f32 %v911_v27, 0.0  ;;  %v652_v38 = vmul.f32 %v5020_v41, %v3345_v29  ;;  %v4323_v18 = vld [vmem:[%s5846_s0 + $0x210] sm:$0xff]   ;;  %v4324_v27 = vld [vmem:[%s5846_s0 + $0x218] sm:$0xff]  }
  0x87   :  { %v1168_v37 = vmax.f32 %v912_v28, 0.0  ;;  %v914_v39 = vadd.f32 %v5026_v42, %v651_v30  ;;  %v3349_v1 = vunpack.c.h.bf16 %v4317_v22  ;;  %v653_v7 = vmul.f32 %v5020_v41, %v3348_v35 }
  0x88   :  { %4440 = vst [vmem:[%s5849_s3 + $0x1c0] sm:$0xff] %v3901_v32   ;;  %v1169_v40 = vmax.f32 %v913_v34, 0.0  ;;  %v3352_v43 = vunpack.c.l.bf16 %v4318_v31  ;;  %v3906_v45 = vpack.c.bf16 %v1167_v36, %v1166_v33  ;;  %v915_v46 = vadd.f32 %v5026_v42, %v652_v38 }
  0x89   :  { %v1170_v47 = vmax.f32 %v914_v39, 0.0  ;;  %v3353_v48 = vunpack.c.h.bf16 %v4318_v31  ;;  %v654_v51 = vmul.f32 %v5020_v41, %v3349_v1  ;;  %v916_v52 = vadd.f32 %v5026_v42, %v653_v7 }
  0x8a   :  { %v3911_v50 = vpack.c.bf16 %v1169_v40, %v1168_v37  ;;  %v655_v53 = vmul.f32 %v5020_v41, %v3352_v43  ;;  %4441 = vst [vmem:[%s5849_s3 + $0x1c8] sm:$0xff] %v3906_v45   ;;  %v1171_v54 = vmax.f32 %v915_v46, 0.0  ;;  %v3356_v56 = vunpack.c.l.bf16 %v4319_v44  ;;  %v4325_v40 = vld [vmem:[%s5846_s0 + $0x220] sm:$0xff]  }
  0x8b   :  { %v656_v55 = vmul.f32 %v5020_v41, %v3353_v48  ;;  %v3357_v57 = vunpack.c.h.bf16 %v4319_v44  ;;  %v917_v58 = vadd.f32 %v5026_v42, %v654_v51  ;;  %v1172_v59 = vmax.f32 %v916_v52, 0.0 }
  0x8c   :  { %4442 = vst [vmem:[%s5849_s3 + $0x1d0] sm:$0xff] %v3911_v50   ;;  %v918_v60 = vadd.f32 %v5026_v42, %v655_v53  ;;  %v3360_v61 = vunpack.c.l.bf16 %v4320_v49  ;;  %v3916_v63 = vpack.c.bf16 %v1171_v54, %v1170_v47  ;;  %v657_v2 = vmul.f32 %v5020_v41, %v3356_v56 }
  0x8d   :  { %v919_v0 = vadd.f32 %v5026_v42, %v656_v55  ;;  %v658_v3 = vmul.f32 %v5020_v41, %v3357_v57  ;;  %v1173_v4 = vmax.f32 %v917_v58, 0.0  ;;  %v3361_v6 = vunpack.c.h.bf16 %v4320_v49  ;;  %v4326_v49 = vld [vmem:[%s5846_s0 + $0x228] sm:$0xff]  }
  0x8e   :  { %v1174_v5 = vmax.f32 %v918_v60, 0.0  ;;  %v659_v8 = vmul.f32 %v5020_v41, %v3360_v61  ;;  %4443 = vst [vmem:[%s5849_s3 + $0x1d8] sm:$0xff] %v3916_v63   ;;  %v920_v10 = vadd.f32 %v5026_v42, %v657_v2  ;;  %v3364_v12 = vunpack.c.l.bf16 %v4321_v62 }
  0x8f   :  { %v1175_v9 = vmax.f32 %v919_v0, 0.0  ;;  %v921_v11 = vadd.f32 %v5026_v42, %v658_v3  ;;  %v3921_v14 = vpack.c.bf16 %v1173_v4, %v1172_v59  ;;  %v660_v15 = vmul.f32 %v5020_v41, %v3361_v6  ;;  %v4328_v4 = vld [vmem:[%s5846_s0 + $0x238] sm:$0xff]  }
  0x90   :  { %v922_v16 = vadd.f32 %v5026_v42, %v659_v8  ;;  %v3365_v17 = vunpack.c.h.bf16 %v4321_v62  ;;  %v1176_v20 = vmax.f32 %v920_v10, 0.0  ;;  %v661_v22 = vmul.f32 %v5020_v41, %v3364_v12  ;;  %v4327_v62 = vld [vmem:[%s5846_s0 + $0x230] sm:$0xff]  }
  0x91   :  { %v3926_v19 = vpack.c.bf16 %v1175_v9, %v1174_v5  ;;  %v1177_v21 = vmax.f32 %v921_v11, 0.0  ;;  %4444 = vst [vmem:[%s5849_s3 + $0x1e0] sm:$0xff] %v3921_v14   ;;  %v923_v23 = vadd.f32 %v5026_v42, %v660_v15  ;;  %v3368_v26 = vunpack.c.l.bf16 %v4322_v13 }
  0x92   :  { %v1178_v24 = vmax.f32 %v922_v16, 0.0  ;;  %v662_v25 = vmul.f32 %v5020_v41, %v3365_v17  ;;  %v924_v29 = vadd.f32 %v5026_v42, %v661_v22  ;;  %v3369_v30 = vunpack.c.h.bf16 %v4322_v13 }
  0x93   :  { %4445 = vst [vmem:[%s5849_s3 + $0x1e8] sm:$0xff] %v3926_v19   ;;  %v3931_v28 = vpack.c.bf16 %v1177_v21, %v1176_v20  ;;  %v3372_v31 = vunpack.c.l.bf16 %v4323_v18  ;;  %v1179_v32 = vmax.f32 %v923_v23, 0.0  ;;  %v663_v34 = vmul.f32 %v5020_v41, %v3368_v26 }
  0x94   :  { %v925_v33 = vadd.f32 %v5026_v42, %v662_v25  ;;  %v3373_v35 = vunpack.c.h.bf16 %v4323_v18  ;;  %v1180_v36 = vmax.f32 %v924_v29, 0.0  ;;  %v664_v37 = vmul.f32 %v5020_v41, %v3369_v30  ;;  %v4329_v18 = vld [vmem:[%s5846_s0 + $0x240] sm:$0xff]  }
  0x95   :  { %4446 = vst [vmem:[%s5849_s3 + $0x1f0] sm:$0xff] %v3931_v28   ;;  %v665_v38 = vmul.f32 %v5020_v41, %v3372_v31  ;;  %v3376_v39 = vunpack.c.l.bf16 %v4324_v27  ;;  %v3936_v1 = vpack.c.bf16 %v1179_v32, %v1178_v24  ;;  %v926_v43 = vadd.f32 %v5026_v42, %v663_v34  ;;  %v4330_v31 = vld [vmem:[%s5846_s0 + $0x248] sm:$0xff]  }
  0x96   :  { %v1181_v7 = vmax.f32 %v925_v33, 0.0  ;;  %v666_v44 = vmul.f32 %v5020_v41, %v3373_v35  ;;  %v927_v45 = vadd.f32 %v5026_v42, %v664_v37  ;;  %v3377_v47 = vunpack.c.h.bf16 %v4324_v27 }
  0x97   :  { %v928_v46 = vadd.f32 %v5026_v42, %v665_v38  ;;  %v667_v48 = vmul.f32 %v5020_v41, %v3376_v39  ;;  %4447 = vst [vmem:[%s5849_s3 + $0x1f8] sm:$0xff] %v3936_v1   ;;  %v1182_v51 = vmax.f32 %v926_v43, 0.0  ;;  %v3380_v53 = vunpack.c.l.bf16 %v4325_v40 }
  0x98   :  { %v3941_v50 = vpack.c.bf16 %v1181_v7, %v1180_v36  ;;  %v929_v52 = vadd.f32 %v5026_v42, %v666_v44  ;;  %v1183_v54 = vmax.f32 %v927_v45, 0.0  ;;  %v668_v56 = vmul.f32 %v5020_v41, %v3377_v47  ;;  %v4331_v36 = vld [vmem:[%s5846_s0 + $0x250] sm:$0xff]   ;;  %v4332_v45 = vld [vmem:[%s5846_s0 + $0x258] sm:$0xff]  }
  0x99   :  { %v1184_v55 = vmax.f32 %v928_v46, 0.0  ;;  %v930_v57 = vadd.f32 %v5026_v42, %v667_v48  ;;  %v3381_v59 = vunpack.c.h.bf16 %v4325_v40  ;;  %v669_v60 = vmul.f32 %v5020_v41, %v3380_v53 }
  0x9a   :  { %4448 = vst [vmem:[%s5849_s3 + $0x200] sm:$0xff] %v3941_v50   ;;  %v1185_v58 = vmax.f32 %v929_v52, 0.0  ;;  %v3384_v61 = vunpack.c.l.bf16 %v4326_v49  ;;  %v3946_v63 = vpack.c.bf16 %v1183_v54, %v1182_v51  ;;  %v931_v0 = vadd.f32 %v5026_v42, %v668_v56 }
  0x9b   :  { %v1186_v2 = vmax.f32 %v930_v57, 0.0  ;;  %v3385_v3 = vunpack.c.h.bf16 %v4326_v49  ;;  %v670_v6 = vmul.f32 %v5020_v41, %v3381_v59  ;;  %v932_v8 = vadd.f32 %v5026_v42, %v669_v60 }
  0x9c   :  { %v3951_v5 = vpack.c.bf16 %v1185_v58, %v1184_v55  ;;  %v671_v9 = vmul.f32 %v5020_v41, %v3384_v61  ;;  %4449 = vst [vmem:[%s5849_s3 + $0x208] sm:$0xff] %v3946_v63   ;;  %v1187_v10 = vmax.f32 %v931_v0, 0.0  ;;  %v3388_v12 = vunpack.c.l.bf16 %v4327_v62  ;;  %v4333_v58 = vld [vmem:[%s5846_s0 + $0x260] sm:$0xff]  }
  0x9d   :  { %v672_v11 = vmul.f32 %v5020_v41, %v3385_v3  ;;  %v3389_v13 = vunpack.c.h.bf16 %v4327_v62  ;;  %v933_v14 = vadd.f32 %v5026_v42, %v670_v6  ;;  %v1188_v15 = vmax.f32 %v932_v8, 0.0 }
  0x9e   :  { %4450 = vst [vmem:[%s5849_s3 + $0x210] sm:$0xff] %v3951_v5   ;;  %v934_v16 = vadd.f32 %v5026_v42, %v671_v9  ;;  %v3392_v17 = vunpack.c.l.bf16 %v4328_v4  ;;  %v3956_v19 = vpack.c.bf16 %v1187_v10, %v1186_v2  ;;  %v673_v21 = vmul.f32 %v5020_v41, %v3388_v12 }
  0x9f   :  { %v935_v20 = vadd.f32 %v5026_v42, %v672_v11  ;;  %v674_v22 = vmul.f32 %v5020_v41, %v3389_v13  ;;  %v1189_v23 = vmax.f32 %v933_v14, 0.0  ;;  %v3393_v25 = vunpack.c.h.bf16 %v4328_v4  ;;  %v4334_v4 = vld [vmem:[%s5846_s0 + $0x268] sm:$0xff]  }
  0xa0   :  { %v1190_v24 = vmax.f32 %v934_v16, 0.0  ;;  %v675_v26 = vmul.f32 %v5020_v41, %v3392_v17  ;;  %4451 = vst [vmem:[%s5849_s3 + $0x218] sm:$0xff] %v3956_v19   ;;  %v936_v28 = vadd.f32 %v5026_v42, %v673_v21  ;;  %v3396_v30 = vunpack.c.l.bf16 %v4329_v18 }
  0xa1   :  { %v1191_v27 = vmax.f32 %v935_v20, 0.0  ;;  %v937_v29 = vadd.f32 %v5026_v42, %v674_v22  ;;  %v3961_v32 = vpack.c.bf16 %v1189_v23, %v1188_v15  ;;  %v676_v33 = vmul.f32 %v5020_v41, %v3393_v25  ;;  %v4336_v23 = vld [vmem:[%s5846_s0 + $0x278] sm:$0xff]  }
  0xa2   :  { %v938_v34 = vadd.f32 %v5026_v42, %v675_v26  ;;  %v3397_v35 = vunpack.c.h.bf16 %v4329_v18  ;;  %v1192_v38 = vmax.f32 %v936_v28, 0.0  ;;  %v677_v40 = vmul.f32 %v5020_v41, %v3396_v30  ;;  %v4335_v18 = vld [vmem:[%s5846_s0 + $0x270] sm:$0xff]  }
  0xa3   :  { %v3966_v37 = vpack.c.bf16 %v1191_v27, %v1190_v24  ;;  %v1193_v39 = vmax.f32 %v937_v29, 0.0  ;;  %4452 = vst [vmem:[%s5849_s3 + $0x220] sm:$0xff] %v3961_v32   ;;  %v939_v1 = vadd.f32 %v5026_v42, %v676_v33  ;;  %v3400_v44 = vunpack.c.l.bf16 %v4330_v31 }
  0xa4   :  { %v1194_v7 = vmax.f32 %v938_v34, 0.0  ;;  %v678_v43 = vmul.f32 %v5020_v41, %v3397_v35  ;;  %v940_v47 = vadd.f32 %v5026_v42, %v677_v40  ;;  %v3401_v48 = vunpack.c.h.bf16 %v4330_v31 }
  0xa5   :  { %4453 = vst [vmem:[%s5849_s3 + $0x228] sm:$0xff] %v3966_v37   ;;  %v3971_v46 = vpack.c.bf16 %v1193_v39, %v1192_v38  ;;  %v3404_v49 = vunpack.c.l.bf16 %v4331_v36  ;;  %v1195_v50 = vmax.f32 %v939_v1, 0.0  ;;  %v679_v52 = vmul.f32 %v5020_v41, %v3400_v44 }
  0xa6   :  { %v941_v51 = vadd.f32 %v5026_v42, %v678_v43  ;;  %v3405_v53 = vunpack.c.h.bf16 %v4331_v36  ;;  %v1196_v54 = vmax.f32 %v940_v47, 0.0  ;;  %v680_v55 = vmul.f32 %v5020_v41, %v3401_v48  ;;  %v4337_v36 = vld [vmem:[%s5846_s0 + $0x280] sm:$0xff]  }
  0xa7   :  { %4454 = vst [vmem:[%s5849_s3 + $0x230] sm:$0xff] %v3971_v46   ;;  %v681_v56 = vmul.f32 %v5020_v41, %v3404_v49  ;;  %v3408_v57 = vunpack.c.l.bf16 %v4332_v45  ;;  %v3976_v59 = vpack.c.bf16 %v1195_v50, %v1194_v7  ;;  %v942_v61 = vadd.f32 %v5026_v42, %v679_v52  ;;  %v4338_v49 = vld [vmem:[%s5846_s0 + $0x288] sm:$0xff]  }
  0xa8   :  { %v1197_v60 = vmax.f32 %v941_v51, 0.0  ;;  %v682_v62 = vmul.f32 %v5020_v41, %v3405_v53  ;;  %v943_v63 = vadd.f32 %v5026_v42, %v680_v55  ;;  %v3409_v2 = vunpack.c.h.bf16 %v4332_v45 }
  0xa9   :  { %v944_v0 = vadd.f32 %v5026_v42, %v681_v56  ;;  %v683_v3 = vmul.f32 %v5020_v41, %v3408_v57  ;;  %4455 = vst [vmem:[%s5849_s3 + $0x238] sm:$0xff] %v3976_v59   ;;  %v1198_v6 = vmax.f32 %v942_v61, 0.0  ;;  %v3412_v9 = vunpack.c.l.bf16 %v4333_v58 }
  0xaa   :  { %v3981_v5 = vpack.c.bf16 %v1197_v60, %v1196_v54  ;;  %v945_v8 = vadd.f32 %v5026_v42, %v682_v62  ;;  %v1199_v10 = vmax.f32 %v943_v63, 0.0  ;;  %v684_v12 = vmul.f32 %v5020_v41, %v3409_v2  ;;  %v4339_v54 = vld [vmem:[%s5846_s0 + $0x290] sm:$0xff]   ;;  %v4340_v63 = vld [vmem:[%s5846_s0 + $0x298] sm:$0xff]  }
  0xab   :  { %v1200_v11 = vmax.f32 %v944_v0, 0.0  ;;  %v946_v13 = vadd.f32 %v5026_v42, %v683_v3  ;;  %v3413_v15 = vunpack.c.h.bf16 %v4333_v58  ;;  %v685_v16 = vmul.f32 %v5020_v41, %v3412_v9 }
  0xac   :  { %4456 = vst [vmem:[%s5849_s3 + $0x240] sm:$0xff] %v3981_v5   ;;  %v1201_v14 = vmax.f32 %v945_v8, 0.0  ;;  %v3416_v17 = vunpack.c.l.bf16 %v4334_v4  ;;  %v3986_v19 = vpack.c.bf16 %v1199_v10, %v1198_v6  ;;  %v947_v20 = vadd.f32 %v5026_v42, %v684_v12 }
  0xad   :  { %v1202_v21 = vmax.f32 %v946_v13, 0.0  ;;  %v3417_v22 = vunpack.c.h.bf16 %v4334_v4  ;;  %v686_v25 = vmul.f32 %v5020_v41, %v3413_v15  ;;  %v948_v26 = vadd.f32 %v5026_v42, %v685_v16 }
  0xae   :  { %v3991_v24 = vpack.c.bf16 %v1201_v14, %v1200_v11  ;;  %v687_v27 = vmul.f32 %v5020_v41, %v3416_v17  ;;  %4457 = vst [vmem:[%s5849_s3 + $0x248] sm:$0xff] %v3986_v19   ;;  %v1203_v28 = vmax.f32 %v947_v20, 0.0  ;;  %v3420_v30 = vunpack.c.l.bf16 %v4335_v18  ;;  %v4341_v14 = vld [vmem:[%s5846_s0 + $0x2a0] sm:$0xff]  }
  0xaf   :  { %v688_v29 = vmul.f32 %v5020_v41, %v3417_v22  ;;  %v3421_v31 = vunpack.c.h.bf16 %v4335_v18  ;;  %v949_v32 = vadd.f32 %v5026_v42, %v686_v25  ;;  %v1204_v33 = vmax.f32 %v948_v26, 0.0 }
  0xb0   :  { %4458 = vst [vmem:[%s5849_s3 + $0x250] sm:$0xff] %v3991_v24   ;;  %v950_v34 = vadd.f32 %v5026_v42, %v687_v27  ;;  %v3424_v35 = vunpack.c.l.bf16 %v4336_v23  ;;  %v3996_v37 = vpack.c.bf16 %v1203_v28, %v1202_v21  ;;  %v689_v39 = vmul.f32 %v5020_v41, %v3420_v30 }
  0xb1   :  { %v951_v38 = vadd.f32 %v5026_v42, %v688_v29  ;;  %v690_v40 = vmul.f32 %v5020_v41, %v3421_v31  ;;  %v1205_v1 = vmax.f32 %v949_v32, 0.0  ;;  %v3425_v43 = vunpack.c.h.bf16 %v4336_v23  ;;  %v4342_v23 = vld [vmem:[%s5846_s0 + $0x2a8] sm:$0xff]  }
  0xb2   :  { %v1206_v7 = vmax.f32 %v950_v34, 0.0  ;;  %v691_v44 = vmul.f32 %v5020_v41, %v3424_v35  ;;  %4459 = vst [vmem:[%s5849_s3 + $0x258] sm:$0xff] %v3996_v37   ;;  %v952_v46 = vadd.f32 %v5026_v42, %v689_v39  ;;  %v3428_v48 = vunpack.c.l.bf16 %v4337_v36 }
  0xb3   :  { %v1207_v45 = vmax.f32 %v951_v38, 0.0  ;;  %v953_v47 = vadd.f32 %v5026_v42, %v690_v40  ;;  %v4001_v50 = vpack.c.bf16 %v1205_v1, %v1204_v33  ;;  %v692_v51 = vmul.f32 %v5020_v41, %v3425_v43  ;;  %v4344_v1 = vld [vmem:[%s5846_s0 + $0x2b8] sm:$0xff]  }
  0xb4   :  { %v954_v52 = vadd.f32 %v5026_v42, %v691_v44  ;;  %v3429_v53 = vunpack.c.h.bf16 %v4337_v36  ;;  %v1208_v56 = vmax.f32 %v952_v46, 0.0  ;;  %v693_v58 = vmul.f32 %v5020_v41, %v3428_v48  ;;  %v4343_v36 = vld [vmem:[%s5846_s0 + $0x2b0] sm:$0xff]  }
  0xb5   :  { %v4006_v55 = vpack.c.bf16 %v1207_v45, %v1206_v7  ;;  %v1209_v57 = vmax.f32 %v953_v47, 0.0  ;;  %4460 = vst [vmem:[%s5849_s3 + $0x260] sm:$0xff] %v4001_v50   ;;  %v955_v59 = vadd.f32 %v5026_v42, %v692_v51  ;;  %v3432_v62 = vunpack.c.l.bf16 %v4338_v49 }
  0xb6   :  { %v1210_v60 = vmax.f32 %v954_v52, 0.0  ;;  %v694_v61 = vmul.f32 %v5020_v41, %v3429_v53  ;;  %v956_v2 = vadd.f32 %v5026_v42, %v693_v58  ;;  %v3433_v3 = vunpack.c.h.bf16 %v4338_v49 }
  0xb7   :  { %4461 = vst [vmem:[%s5849_s3 + $0x268] sm:$0xff] %v4006_v55   ;;  %v4011_v0 = vpack.c.bf16 %v1209_v57, %v1208_v56  ;;  %v3436_v4 = vunpack.c.l.bf16 %v4339_v54  ;;  %v1211_v5 = vmax.f32 %v955_v59, 0.0  ;;  %v695_v8 = vmul.f32 %v5020_v41, %v3432_v62 }
  0xb8   :  { %v957_v6 = vadd.f32 %v5026_v42, %v694_v61  ;;  %v3437_v9 = vunpack.c.h.bf16 %v4339_v54  ;;  %v1212_v10 = vmax.f32 %v956_v2, 0.0  ;;  %v696_v11 = vmul.f32 %v5020_v41, %v3433_v3  ;;  %v4345_v54 = vld [vmem:[%s5846_s0 + $0x2c0] sm:$0xff]  }
  0xb9   :  { %4462 = vst [vmem:[%s5849_s3 + $0x270] sm:$0xff] %v4011_v0   ;;  %v697_v12 = vmul.f32 %v5020_v41, %v3436_v4  ;;  %v3440_v13 = vunpack.c.l.bf16 %v4340_v63  ;;  %v4016_v15 = vpack.c.bf16 %v1211_v5, %v1210_v60  ;;  %v958_v17 = vadd.f32 %v5026_v42, %v695_v8  ;;  %v4346_v4 = vld [vmem:[%s5846_s0 + $0x2c8] sm:$0xff]  }
  0xba   :  { %v1213_v16 = vmax.f32 %v957_v6, 0.0  ;;  %v698_v18 = vmul.f32 %v5020_v41, %v3437_v9  ;;  %v959_v19 = vadd.f32 %v5026_v42, %v696_v11  ;;  %v3441_v21 = vunpack.c.h.bf16 %v4340_v63 }
  0xbb   :  { %v960_v20 = vadd.f32 %v5026_v42, %v697_v12  ;;  %v699_v22 = vmul.f32 %v5020_v41, %v3440_v13  ;;  %4463 = vst [vmem:[%s5849_s3 + $0x278] sm:$0xff] %v4016_v15   ;;  %v1214_v25 = vmax.f32 %v958_v17, 0.0  ;;  %v3444_v27 = vunpack.c.l.bf16 %v4341_v14 }
  0xbc   :  { %v4021_v24 = vpack.c.bf16 %v1213_v16, %v1212_v10  ;;  %v961_v26 = vadd.f32 %v5026_v42, %v698_v18  ;;  %v1215_v28 = vmax.f32 %v959_v19, 0.0  ;;  %v700_v30 = vmul.f32 %v5020_v41, %v3441_v21  ;;  %v4347_v10 = vld [vmem:[%s5846_s0 + $0x2d0] sm:$0xff]   ;;  %v4348_v19 = vld [vmem:[%s5846_s0 + $0x2d8] sm:$0xff]  }
  0xbd   :  { %v1216_v29 = vmax.f32 %v960_v20, 0.0  ;;  %v962_v31 = vadd.f32 %v5026_v42, %v699_v22  ;;  %v3445_v33 = vunpack.c.h.bf16 %v4341_v14  ;;  %v701_v34 = vmul.f32 %v5020_v41, %v3444_v27 }
  0xbe   :  { %4464 = vst [vmem:[%s5849_s3 + $0x280] sm:$0xff] %v4021_v24   ;;  %v1217_v32 = vmax.f32 %v961_v26, 0.0  ;;  %v3448_v35 = vunpack.c.l.bf16 %v4342_v23  ;;  %v4026_v37 = vpack.c.bf16 %v1215_v28, %v1214_v25  ;;  %v963_v38 = vadd.f32 %v5026_v42, %v700_v30 }
  0xbf   :  { %v1218_v39 = vmax.f32 %v962_v31, 0.0  ;;  %v3449_v40 = vunpack.c.h.bf16 %v4342_v23  ;;  %v702_v43 = vmul.f32 %v5020_v41, %v3445_v33  ;;  %v964_v44 = vadd.f32 %v5026_v42, %v701_v34 }
  0xc0   :  { %v4031_v7 = vpack.c.bf16 %v1217_v32, %v1216_v29  ;;  %v703_v45 = vmul.f32 %v5020_v41, %v3448_v35  ;;  %4465 = vst [vmem:[%s5849_s3 + $0x288] sm:$0xff] %v4026_v37   ;;  %v1219_v46 = vmax.f32 %v963_v38, 0.0  ;;  %v3452_v48 = vunpack.c.l.bf16 %v4343_v36  ;;  %v4349_v32 = vld [vmem:[%s5846_s0 + $0x2e0] sm:$0xff]  }
  0xc1   :  { %v704_v47 = vmul.f32 %v5020_v41, %v3449_v40  ;;  %v3453_v49 = vunpack.c.h.bf16 %v4343_v36  ;;  %v965_v50 = vadd.f32 %v5026_v42, %v702_v43  ;;  %v1220_v51 = vmax.f32 %v964_v44, 0.0 }
  0xc2   :  { %4466 = vst [vmem:[%s5849_s3 + $0x290] sm:$0xff] %v4031_v7   ;;  %v966_v52 = vadd.f32 %v5026_v42, %v703_v45  ;;  %v3456_v53 = vunpack.c.l.bf16 %v4344_v1  ;;  %v4036_v55 = vpack.c.bf16 %v1219_v46, %v1218_v39  ;;  %v705_v57 = vmul.f32 %v5020_v41, %v3452_v48 }
  0xc3   :  { %v967_v56 = vadd.f32 %v5026_v42, %v704_v47  ;;  %v706_v58 = vmul.f32 %v5020_v41, %v3453_v49  ;;  %v1221_v59 = vmax.f32 %v965_v50, 0.0  ;;  %v3457_v61 = vunpack.c.h.bf16 %v4344_v1  ;;  %v4350_v1 = vld [vmem:[%s5846_s0 + $0x2e8] sm:$0xff]  }
  0xc4   :  { %v1222_v60 = vmax.f32 %v966_v52, 0.0  ;;  %v707_v62 = vmul.f32 %v5020_v41, %v3456_v53  ;;  %4467 = vst [vmem:[%s5849_s3 + $0x298] sm:$0xff] %v4036_v55   ;;  %v968_v0 = vadd.f32 %v5026_v42, %v705_v57  ;;  %v3460_v3 = vunpack.c.l.bf16 %v4345_v54 }
  0xc5   :  { %v1223_v63 = vmax.f32 %v967_v56, 0.0  ;;  %v969_v2 = vadd.f32 %v5026_v42, %v706_v58  ;;  %v4041_v5 = vpack.c.bf16 %v1221_v59, %v1220_v51  ;;  %v708_v6 = vmul.f32 %v5020_v41, %v3457_v61  ;;  %v4352_v59 = vld [vmem:[%s5846_s0 + $0x2f8] sm:$0xff]  }
  0xc6   :  { %v970_v8 = vadd.f32 %v5026_v42, %v707_v62  ;;  %v3461_v9 = vunpack.c.h.bf16 %v4345_v54  ;;  %v1224_v12 = vmax.f32 %v968_v0, 0.0  ;;  %v709_v14 = vmul.f32 %v5020_v41, %v3460_v3  ;;  %v4351_v54 = vld [vmem:[%s5846_s0 + $0x2f0] sm:$0xff]  }
  0xc7   :  { %v4046_v11 = vpack.c.bf16 %v1223_v63, %v1222_v60  ;;  %v1225_v13 = vmax.f32 %v969_v2, 0.0  ;;  %4468 = vst [vmem:[%s5849_s3 + $0x2a0] sm:$0xff] %v4041_v5   ;;  %v971_v15 = vadd.f32 %v5026_v42, %v708_v6  ;;  %v3464_v18 = vunpack.c.l.bf16 %v4346_v4 }
  0xc8   :  { %v1226_v16 = vmax.f32 %v970_v8, 0.0  ;;  %v710_v17 = vmul.f32 %v5020_v41, %v3461_v9  ;;  %v972_v21 = vadd.f32 %v5026_v42, %v709_v14  ;;  %v3465_v22 = vunpack.c.h.bf16 %v4346_v4 }
  0xc9   :  { %4469 = vst [vmem:[%s5849_s3 + $0x2a8] sm:$0xff] %v4046_v11   ;;  %v4051_v20 = vpack.c.bf16 %v1225_v13, %v1224_v12  ;;  %v3468_v23 = vunpack.c.l.bf16 %v4347_v10  ;;  %v1227_v24 = vmax.f32 %v971_v15, 0.0  ;;  %v711_v26 = vmul.f32 %v5020_v41, %v3464_v18  ;;  %v5504_v13 = vld [vmem:[%s5847_s1] ss:$0 sm:$0xff] }
  0xca   :  { %v973_v25 = vadd.f32 %v5026_v42, %v710_v17  ;;  %v3469_v27 = vunpack.c.h.bf16 %v4347_v10  ;;  %v1228_v28 = vmax.f32 %v972_v21, 0.0  ;;  %v712_v29 = vmul.f32 %v5020_v41, %v3465_v22  ;;  %v4353_v10 = vld [vmem:[%s5846_s0 + $0x300] sm:$0xff]  }
  0xcb   :  { %4470 = vst [vmem:[%s5849_s3 + $0x2b0] sm:$0xff] %v4051_v20   ;;  %v713_v30 = vmul.f32 %v5020_v41, %v3468_v23  ;;  %v3472_v31 = vunpack.c.l.bf16 %v4348_v19  ;;  %v4056_v33 = vpack.c.bf16 %v1227_v24, %v1226_v16  ;;  %v974_v35 = vadd.f32 %v5026_v42, %v711_v26  ;;  %v4354_v23 = vld [vmem:[%s5846_s0 + $0x308] sm:$0xff]  }
  0xcc   :  { %v1229_v34 = vmax.f32 %v973_v25, 0.0  ;;  %v714_v36 = vmul.f32 %v5020_v41, %v3469_v27  ;;  %v975_v37 = vadd.f32 %v5026_v42, %v712_v29  ;;  %v3473_v39 = vunpack.c.h.bf16 %v4348_v19 }
  0xcd   :  { %v976_v38 = vadd.f32 %v5026_v42, %v713_v30  ;;  %v715_v40 = vmul.f32 %v5020_v41, %v3472_v31  ;;  %4471 = vst [vmem:[%s5849_s3 + $0x2b8] sm:$0xff] %v4056_v33   ;;  %v1230_v43 = vmax.f32 %v974_v35, 0.0  ;;  %v3476_v45 = vunpack.c.l.bf16 %v4349_v32 }
  0xce   :  { %v4061_v7 = vpack.c.bf16 %v1229_v34, %v1228_v28  ;;  %v977_v44 = vadd.f32 %v5026_v42, %v714_v36  ;;  %v1231_v46 = vmax.f32 %v975_v37, 0.0  ;;  %v716_v48 = vmul.f32 %v5020_v41, %v3473_v39  ;;  %v4355_v28 = vld [vmem:[%s5846_s0 + $0x310] sm:$0xff]   ;;  %v4356_v37 = vld [vmem:[%s5846_s0 + $0x318] sm:$0xff]  }
  0xcf   :  { %v1232_v47 = vmax.f32 %v976_v38, 0.0  ;;  %v978_v49 = vadd.f32 %v5026_v42, %v715_v40  ;;  %v3477_v51 = vunpack.c.h.bf16 %v4349_v32  ;;  %v717_v52 = vmul.f32 %v5020_v41, %v3476_v45 }
  0xd0   :  { %4472 = vst [vmem:[%s5849_s3 + $0x2c0] sm:$0xff] %v4061_v7   ;;  %v1233_v50 = vmax.f32 %v977_v44, 0.0  ;;  %v3480_v53 = vunpack.c.l.bf16 %v4350_v1  ;;  %v4066_v55 = vpack.c.bf16 %v1231_v46, %v1230_v43  ;;  %v979_v56 = vadd.f32 %v5026_v42, %v716_v48 }
  0xd1   :  { %v1234_v57 = vmax.f32 %v978_v49, 0.0  ;;  %v3481_v58 = vunpack.c.h.bf16 %v4350_v1  ;;  %v718_v61 = vmul.f32 %v5020_v41, %v3477_v51  ;;  %v980_v62 = vadd.f32 %v5026_v42, %v717_v52 }
  0xd2   :  { %v4071_v60 = vpack.c.bf16 %v1233_v50, %v1232_v47  ;;  %v719_v63 = vmul.f32 %v5020_v41, %v3480_v53  ;;  %4473 = vst [vmem:[%s5849_s3 + $0x2c8] sm:$0xff] %v4066_v55   ;;  %v1235_v0 = vmax.f32 %v979_v56, 0.0  ;;  %v3484_v3 = vunpack.c.l.bf16 %v4351_v54  ;;  %v4357_v50 = vld [vmem:[%s5846_s0 + $0x320] sm:$0xff]  }
  0xd3   :  { %v720_v2 = vmul.f32 %v5020_v41, %v3481_v58  ;;  %v3485_v4 = vunpack.c.h.bf16 %v4351_v54  ;;  %v981_v5 = vadd.f32 %v5026_v42, %v718_v61  ;;  %v1236_v6 = vmax.f32 %v980_v62, 0.0  ;;  %v5498_v41 = vld [vmem:[%s5848_s2] ss:$0 sm:$0xff] }
  0xd4   :  { %4474 = vst [vmem:[%s5849_s3 + $0x2d0] sm:$0xff] %v4071_v60   ;;  %v982_v8 = vadd.f32 %v5026_v42, %v719_v63  ;;  %v3488_v9 = vunpack.c.l.bf16 %v4352_v59  ;;  %v4076_v11 = vpack.c.bf16 %v1235_v0, %v1234_v57  ;;  %v721_v42 = vmul.f32 %v5504_v13, %v3484_v3 }
  0xd5   :  { %v983_v12 = vadd.f32 %v5498_v41, %v720_v2  ;;  %v722_v14 = vmul.f32 %v5504_v13, %v3485_v4  ;;  %v1237_v15 = vmax.f32 %v981_v5, 0.0  ;;  %v3489_v17 = vunpack.c.h.bf16 %v4352_v59  ;;  %v4358_v59 = vld [vmem:[%s5846_s0 + $0x328] sm:$0xff]  }
  0xd6   :  { %v1238_v16 = vmax.f32 %v982_v8, 0.0  ;;  %v723_v18 = vmul.f32 %v5504_v13, %v3488_v9  ;;  %4475 = vst [vmem:[%s5849_s3 + $0x2d8] sm:$0xff] %v4076_v11   ;;  %v984_v20 = vadd.f32 %v5498_v41, %v721_v42  ;;  %v3492_v22 = vunpack.c.l.bf16 %v4353_v10 }
  0xd7   :  { %v1239_v19 = vmax.f32 %v983_v12, 0.0  ;;  %v985_v21 = vadd.f32 %v5498_v41, %v722_v14  ;;  %v4081_v24 = vpack.c.bf16 %v1237_v15, %v1236_v6  ;;  %v724_v25 = vmul.f32 %v5504_v13, %v3489_v17  ;;  %v4360_v15 = vld [vmem:[%s5846_s0 + $0x338] sm:$0xff]  }
  0xd8   :  { %v986_v26 = vadd.f32 %v5498_v41, %v723_v18  ;;  %v3493_v27 = vunpack.c.h.bf16 %v4353_v10  ;;  %v1240_v30 = vmax.f32 %v984_v20, 0.0  ;;  %v725_v32 = vmul.f32 %v5504_v13, %v3492_v22  ;;  %v4359_v10 = vld [vmem:[%s5846_s0 + $0x330] sm:$0xff]  }
  0xd9   :  { %v4086_v29 = vpack.c.bf16 %v1239_v19, %v1238_v16  ;;  %v1241_v31 = vmax.f32 %v985_v21, 0.0  ;;  %4476 = vst [vmem:[%s5849_s3 + $0x2e0] sm:$0xff] %v4081_v24   ;;  %v987_v33 = vadd.f32 %v5498_v41, %v724_v25  ;;  %v3496_v36 = vunpack.c.l.bf16 %v4354_v23 }
  0xda   :  { %v1242_v34 = vmax.f32 %v986_v26, 0.0  ;;  %v726_v35 = vmul.f32 %v5504_v13, %v3493_v27  ;;  %v988_v39 = vadd.f32 %v5498_v41, %v725_v32  ;;  %v3497_v40 = vunpack.c.h.bf16 %v4354_v23 }
  0xdb   :  { %4477 = vst [vmem:[%s5849_s3 + $0x2e8] sm:$0xff] %v4086_v29   ;;  %v4091_v38 = vpack.c.bf16 %v1241_v31, %v1240_v30  ;;  %v3500_v1 = vunpack.c.l.bf16 %v4355_v28  ;;  %v1243_v7 = vmax.f32 %v987_v33, 0.0  ;;  %v727_v44 = vmul.f32 %v5504_v13, %v3496_v36 }
  0xdc   :  { %v989_v43 = vadd.f32 %v5498_v41, %v726_v35  ;;  %v3501_v45 = vunpack.c.h.bf16 %v4355_v28  ;;  %v1244_v46 = vmax.f32 %v988_v39, 0.0  ;;  %v728_v47 = vmul.f32 %v5504_v13, %v3497_v40  ;;  %v4361_v28 = vld [vmem:[%s5846_s0 + $0x340] sm:$0xff]  }
  0xdd   :  { %4478 = vst [vmem:[%s5849_s3 + $0x2f0] sm:$0xff] %v4091_v38   ;;  %v729_v48 = vmul.f32 %v5504_v13, %v3500_v1  ;;  %v3504_v49 = vunpack.c.l.bf16 %v4356_v37  ;;  %v4096_v51 = vpack.c.bf16 %v1243_v7, %v1242_v34  ;;  %v990_v53 = vadd.f32 %v5498_v41, %v727_v44  ;;  %v4362_v1 = vld [vmem:[%s5846_s0 + $0x348] sm:$0xff]  }
  0xde   :  { %v1245_v52 = vmax.f32 %v989_v43, 0.0  ;;  %v730_v54 = vmul.f32 %v5504_v13, %v3501_v45  ;;  %v991_v55 = vadd.f32 %v5498_v41, %v728_v47  ;;  %v3505_v57 = vunpack.c.h.bf16 %v4356_v37 }
  0xdf   :  { %v992_v56 = vadd.f32 %v5498_v41, %v729_v48  ;;  %v731_v58 = vmul.f32 %v5504_v13, %v3504_v49  ;;  %4479 = vst [vmem:[%s5849_s3 + $0x2f8] sm:$0xff] %v4096_v51   ;;  %v1246_v61 = vmax.f32 %v990_v53, 0.0  ;;  %v3508_v63 = vunpack.c.l.bf16 %v4357_v50 }
  0xe0   :  { %v4101_v60 = vpack.c.bf16 %v1245_v52, %v1244_v46  ;;  %v993_v62 = vadd.f32 %v5498_v41, %v730_v54  ;;  %v1247_v0 = vmax.f32 %v991_v55, 0.0  ;;  %v732_v3 = vmul.f32 %v5504_v13, %v3505_v57  ;;  %v4363_v46 = vld [vmem:[%s5846_s0 + $0x350] sm:$0xff]   ;;  %v4364_v55 = vld [vmem:[%s5846_s0 + $0x358] sm:$0xff]  }
  0xe1   :  { %v1248_v2 = vmax.f32 %v992_v56, 0.0  ;;  %v994_v4 = vadd.f32 %v5498_v41, %v731_v58  ;;  %v3509_v6 = vunpack.c.h.bf16 %v4357_v50  ;;  %v733_v8 = vmul.f32 %v5504_v13, %v3508_v63 }
  0xe2   :  { %4480 = vst [vmem:[%s5849_s3 + $0x300] sm:$0xff] %v4101_v60   ;;  %v1249_v5 = vmax.f32 %v993_v62, 0.0  ;;  %v3512_v9 = vunpack.c.l.bf16 %v4358_v59  ;;  %v4106_v11 = vpack.c.bf16 %v1247_v0, %v1246_v61  ;;  %v995_v12 = vadd.f32 %v5498_v41, %v732_v3 }
  0xe3   :  { %v1250_v42 = vmax.f32 %v994_v4, 0.0  ;;  %v3513_v14 = vunpack.c.h.bf16 %v4358_v59  ;;  %v734_v17 = vmul.f32 %v5504_v13, %v3509_v6  ;;  %v996_v18 = vadd.f32 %v5498_v41, %v733_v8 }
  0xe4   :  { %v4111_v16 = vpack.c.bf16 %v1249_v5, %v1248_v2  ;;  %v735_v19 = vmul.f32 %v5504_v13, %v3512_v9  ;;  %4481 = vst [vmem:[%s5849_s3 + $0x308] sm:$0xff] %v4106_v11   ;;  %v1251_v20 = vmax.f32 %v995_v12, 0.0  ;;  %v3516_v22 = vunpack.c.l.bf16 %v4359_v10  ;;  %v4365_v5 = vld [vmem:[%s5846_s0 + $0x360] sm:$0xff]  }
  0xe5   :  { %v736_v21 = vmul.f32 %v5504_v13, %v3513_v14  ;;  %v3517_v23 = vunpack.c.h.bf16 %v4359_v10  ;;  %v997_v24 = vadd.f32 %v5498_v41, %v734_v17  ;;  %v1252_v25 = vmax.f32 %v996_v18, 0.0 }
  0xe6   :  { %4482 = vst [vmem:[%s5849_s3 + $0x310] sm:$0xff] %v4111_v16   ;;  %v998_v26 = vadd.f32 %v5498_v41, %v735_v19  ;;  %v3520_v27 = vunpack.c.l.bf16 %v4360_v15  ;;  %v4116_v29 = vpack.c.bf16 %v1251_v20, %v1250_v42  ;;  %v737_v31 = vmul.f32 %v5504_v13, %v3516_v22 }
  0xe7   :  { %v999_v30 = vadd.f32 %v5498_v41, %v736_v21  ;;  %v738_v32 = vmul.f32 %v5504_v13, %v3517_v23  ;;  %v1253_v33 = vmax.f32 %v997_v24, 0.0  ;;  %v3521_v35 = vunpack.c.h.bf16 %v4360_v15  ;;  %v4366_v15 = vld [vmem:[%s5846_s0 + $0x368] sm:$0xff]  }
  0xe8   :  { %v1254_v34 = vmax.f32 %v998_v26, 0.0  ;;  %v739_v36 = vmul.f32 %v5504_v13, %v3520_v27  ;;  %4483 = vst [vmem:[%s5849_s3 + $0x318] sm:$0xff] %v4116_v29   ;;  %v1000_v38 = vadd.f32 %v5498_v41, %v737_v31  ;;  %v3524_v40 = vunpack.c.l.bf16 %v4361_v28 }
  0xe9   :  { %v1255_v37 = vmax.f32 %v999_v30, 0.0  ;;  %v1001_v39 = vadd.f32 %v5498_v41, %v738_v32  ;;  %v4121_v7 = vpack.c.bf16 %v1253_v33, %v1252_v25  ;;  %v740_v43 = vmul.f32 %v5504_v13, %v3521_v35  ;;  %v4368_v33 = vld [vmem:[%s5846_s0 + $0x378] sm:$0xff]  }
  0xea   :  { %v1002_v44 = vadd.f32 %v5498_v41, %v739_v36  ;;  %v3525_v45 = vunpack.c.h.bf16 %v4361_v28  ;;  %v1256_v48 = vmax.f32 %v1000_v38, 0.0  ;;  %v741_v50 = vmul.f32 %v5504_v13, %v3524_v40  ;;  %v4367_v28 = vld [vmem:[%s5846_s0 + $0x370] sm:$0xff]  }
  0xeb   :  { %v4126_v47 = vpack.c.bf16 %v1255_v37, %v1254_v34  ;;  %v1257_v49 = vmax.f32 %v1001_v39, 0.0  ;;  %4484 = vst [vmem:[%s5849_s3 + $0x320] sm:$0xff] %v4121_v7   ;;  %v1003_v51 = vadd.f32 %v5498_v41, %v740_v43  ;;  %v3528_v54 = vunpack.c.l.bf16 %v4362_v1 }
  0xec   :  { %v1258_v52 = vmax.f32 %v1002_v44, 0.0  ;;  %v742_v53 = vmul.f32 %v5504_v13, %v3525_v45  ;;  %v1004_v57 = vadd.f32 %v5498_v41, %v741_v50  ;;  %v3529_v58 = vunpack.c.h.bf16 %v4362_v1 }
  0xed   :  { %4485 = vst [vmem:[%s5849_s3 + $0x328] sm:$0xff] %v4126_v47   ;;  %v4131_v56 = vpack.c.bf16 %v1257_v49, %v1256_v48  ;;  %v3532_v59 = vunpack.c.l.bf16 %v4363_v46  ;;  %v1259_v60 = vmax.f32 %v1003_v51, 0.0  ;;  %v743_v62 = vmul.f32 %v5504_v13, %v3528_v54 }
  0xee   :  { %v1005_v61 = vadd.f32 %v5498_v41, %v742_v53  ;;  %v3533_v63 = vunpack.c.h.bf16 %v4363_v46  ;;  %v1260_v0 = vmax.f32 %v1004_v57, 0.0  ;;  %v744_v2 = vmul.f32 %v5504_v13, %v3529_v58  ;;  %v4369_v46 = vld [vmem:[%s5846_s0 + $0x380] sm:$0xff]  }
  0xef   :  { %4486 = vst [vmem:[%s5849_s3 + $0x330] sm:$0xff] %v4131_v56   ;;  %v745_v3 = vmul.f32 %v5504_v13, %v3532_v59  ;;  %v3536_v4 = vunpack.c.l.bf16 %v4364_v55  ;;  %v4136_v6 = vpack.c.bf16 %v1259_v60, %v1258_v52  ;;  %v1006_v9 = vadd.f32 %v5498_v41, %v743_v62  ;;  %v4370_v59 = vld [vmem:[%s5846_s0 + $0x388] sm:$0xff]  }
  0xf0   :  { %v1261_v8 = vmax.f32 %v1005_v61, 0.0  ;;  %v746_v10 = vmul.f32 %v5504_v13, %v3533_v63  ;;  %v1007_v11 = vadd.f32 %v5498_v41, %v744_v2  ;;  %v3537_v42 = vunpack.c.h.bf16 %v4364_v55 }
  0xf1   :  { %v1008_v12 = vadd.f32 %v5498_v41, %v745_v3  ;;  %v747_v14 = vmul.f32 %v5504_v13, %v3536_v4  ;;  %4487 = vst [vmem:[%s5849_s3 + $0x338] sm:$0xff] %v4136_v6   ;;  %v1262_v17 = vmax.f32 %v1006_v9, 0.0  ;;  %v3540_v19 = vunpack.c.l.bf16 %v4365_v5 }
  0xf2   :  { %v4141_v16 = vpack.c.bf16 %v1261_v8, %v1260_v0  ;;  %v1009_v18 = vadd.f32 %v5498_v41, %v746_v10  ;;  %v1263_v20 = vmax.f32 %v1007_v11, 0.0  ;;  %v748_v22 = vmul.f32 %v5504_v13, %v3537_v42  ;;  %v4371_v0 = vld [vmem:[%s5846_s0 + $0x390] sm:$0xff]   ;;  %v4372_v11 = vld [vmem:[%s5846_s0 + $0x398] sm:$0xff]  }
  0xf3   :  { %v1264_v21 = vmax.f32 %v1008_v12, 0.0  ;;  %v1010_v23 = vadd.f32 %v5498_v41, %v747_v14  ;;  %v3541_v25 = vunpack.c.h.bf16 %v4365_v5  ;;  %v749_v26 = vmul.f32 %v5504_v13, %v3540_v19 }
  0xf4   :  { %4488 = vst [vmem:[%s5849_s3 + $0x340] sm:$0xff] %v4141_v16   ;;  %v1265_v24 = vmax.f32 %v1009_v18, 0.0  ;;  %v3544_v27 = vunpack.c.l.bf16 %v4366_v15  ;;  %v4146_v29 = vpack.c.bf16 %v1263_v20, %v1262_v17  ;;  %v1011_v30 = vadd.f32 %v5498_v41, %v748_v22 }
  0xf5   :  { %v1266_v31 = vmax.f32 %v1010_v23, 0.0  ;;  %v3545_v32 = vunpack.c.h.bf16 %v4366_v15  ;;  %v750_v35 = vmul.f32 %v5504_v13, %v3541_v25  ;;  %v1012_v36 = vadd.f32 %v5498_v41, %v749_v26 }
  0xf6   :  { %v4151_v34 = vpack.c.bf16 %v1265_v24, %v1264_v21  ;;  %v751_v37 = vmul.f32 %v5504_v13, %v3544_v27  ;;  %4489 = vst [vmem:[%s5849_s3 + $0x348] sm:$0xff] %v4146_v29   ;;  %v1267_v38 = vmax.f32 %v1011_v30, 0.0  ;;  %v3548_v40 = vunpack.c.l.bf16 %v4367_v28  ;;  %v4373_v24 = vld [vmem:[%s5846_s0 + $0x3a0] sm:$0xff]  }
  0xf7   :  { %v752_v39 = vmul.f32 %v5504_v13, %v3545_v32  ;;  %v3549_v1 = vunpack.c.h.bf16 %v4367_v28  ;;  %v1013_v7 = vadd.f32 %v5498_v41, %v750_v35  ;;  %v1268_v43 = vmax.f32 %v1012_v36, 0.0 }
  0xf8   :  { %4490 = vst [vmem:[%s5849_s3 + $0x350] sm:$0xff] %v4151_v34   ;;  %v1014_v44 = vadd.f32 %v5498_v41, %v751_v37  ;;  %v3552_v45 = vunpack.c.l.bf16 %v4368_v33  ;;  %v4156_v47 = vpack.c.bf16 %v1267_v38, %v1266_v31  ;;  %v753_v49 = vmul.f32 %v5504_v13, %v3548_v40 }
  0xf9   :  { %v1015_v48 = vadd.f32 %v5498_v41, %v752_v39  ;;  %v754_v50 = vmul.f32 %v5504_v13, %v3549_v1  ;;  %v1269_v51 = vmax.f32 %v1013_v7, 0.0  ;;  %v3553_v53 = vunpack.c.h.bf16 %v4368_v33  ;;  %v4374_v33 = vld [vmem:[%s5846_s0 + $0x3a8] sm:$0xff]  }
  0xfa   :  { %v1270_v52 = vmax.f32 %v1014_v44, 0.0  ;;  %v755_v54 = vmul.f32 %v5504_v13, %v3552_v45  ;;  %4491 = vst [vmem:[%s5849_s3 + $0x358] sm:$0xff] %v4156_v47   ;;  %v1016_v56 = vadd.f32 %v5498_v41, %v753_v49  ;;  %v3556_v58 = vunpack.c.l.bf16 %v4369_v46 }
  0xfb   :  { %v1271_v55 = vmax.f32 %v1015_v48, 0.0  ;;  %v1017_v57 = vadd.f32 %v5498_v41, %v754_v50  ;;  %v4161_v60 = vpack.c.bf16 %v1269_v51, %v1268_v43  ;;  %v756_v61 = vmul.f32 %v5504_v13, %v3553_v53  ;;  %v4376_v51 = vld [vmem:[%s5846_s0 + $0x3b8] sm:$0xff]  }
  0xfc   :  { %v1018_v62 = vadd.f32 %v5498_v41, %v755_v54  ;;  %v3557_v63 = vunpack.c.h.bf16 %v4369_v46  ;;  %v1272_v3 = vmax.f32 %v1016_v56, 0.0  ;;  %v757_v5 = vmul.f32 %v5504_v13, %v3556_v58  ;;  %v4375_v46 = vld [vmem:[%s5846_s0 + $0x3b0] sm:$0xff]  }
  0xfd   :  { %v4166_v2 = vpack.c.bf16 %v1271_v55, %v1270_v52  ;;  %v1273_v4 = vmax.f32 %v1017_v57, 0.0  ;;  %4492 = vst [vmem:[%s5849_s3 + $0x360] sm:$0xff] %v4161_v60   ;;  %v1019_v6 = vadd.f32 %v5498_v41, %v756_v61  ;;  %v3560_v10 = vunpack.c.l.bf16 %v4370_v59 }
  0xfe   :  { %v1274_v8 = vmax.f32 %v1018_v62, 0.0  ;;  %v758_v9 = vmul.f32 %v5504_v13, %v3557_v63  ;;  %v1020_v42 = vadd.f32 %v5498_v41, %v757_v5  ;;  %v3561_v14 = vunpack.c.h.bf16 %v4370_v59 }
  0xff   :  { %4493 = vst [vmem:[%s5849_s3 + $0x368] sm:$0xff] %v4166_v2   ;;  %v4171_v12 = vpack.c.bf16 %v1273_v4, %v1272_v3  ;;  %v3564_v15 = vunpack.c.l.bf16 %v4371_v0  ;;  %v1275_v16 = vmax.f32 %v1019_v6, 0.0  ;;  %v759_v18 = vmul.f32 %v5504_v13, %v3560_v10 }
 0x100   :  { %v1021_v17 = vadd.f32 %v5498_v41, %v758_v9  ;;  %v3565_v19 = vunpack.c.h.bf16 %v4371_v0  ;;  %v1276_v20 = vmax.f32 %v1020_v42, 0.0  ;;  %v760_v21 = vmul.f32 %v5504_v13, %v3561_v14  ;;  %v4377_v0 = vld [vmem:[%s5846_s0 + $0x3c0] sm:$0xff]  }
 0x101   :  { %4494 = vst [vmem:[%s5849_s3 + $0x370] sm:$0xff] %v4171_v12   ;;  %v761_v22 = vmul.f32 %v5504_v13, %v3564_v15  ;;  %v3568_v23 = vunpack.c.l.bf16 %v4372_v11  ;;  %v4176_v25 = vpack.c.bf16 %v1275_v16, %v1274_v8  ;;  %v1022_v27 = vadd.f32 %v5498_v41, %v759_v18  ;;  %v4378_v15 = vld [vmem:[%s5846_s0 + $0x3c8] sm:$0xff]  }
 0x102   :  { %v1277_v26 = vmax.f32 %v1021_v17, 0.0  ;;  %v762_v28 = vmul.f32 %v5504_v13, %v3565_v19  ;;  %v1023_v29 = vadd.f32 %v5498_v41, %v760_v21  ;;  %v3569_v31 = vunpack.c.h.bf16 %v4372_v11 }
 0x103   :  { %v1024_v30 = vadd.f32 %v5498_v41, %v761_v22  ;;  %v763_v32 = vmul.f32 %v5504_v13, %v3568_v23  ;;  %4495 = vst [vmem:[%s5849_s3 + $0x378] sm:$0xff] %v4176_v25   ;;  %v1278_v35 = vmax.f32 %v1022_v27, 0.0  ;;  %v3572_v37 = vunpack.c.l.bf16 %v4373_v24 }
 0x104   :  { %v4181_v34 = vpack.c.bf16 %v1277_v26, %v1276_v20  ;;  %v1025_v36 = vadd.f32 %v5498_v41, %v762_v28  ;;  %v1279_v38 = vmax.f32 %v1023_v29, 0.0  ;;  %v764_v40 = vmul.f32 %v5504_v13, %v3569_v31  ;;  %v4379_v20 = vld [vmem:[%s5846_s0 + $0x3d0] sm:$0xff]   ;;  %v4380_v29 = vld [vmem:[%s5846_s0 + $0x3d8] sm:$0xff]  }
 0x105   :  { %v1280_v39 = vmax.f32 %v1024_v30, 0.0  ;;  %v1026_v1 = vadd.f32 %v5498_v41, %v763_v32  ;;  %v3573_v43 = vunpack.c.h.bf16 %v4373_v24  ;;  %v765_v44 = vmul.f32 %v5504_v13, %v3572_v37 }
 0x106   :  { %4496 = vst [vmem:[%s5849_s3 + $0x380] sm:$0xff] %v4181_v34   ;;  %v1281_v7 = vmax.f32 %v1025_v36, 0.0  ;;  %v3576_v45 = vunpack.c.l.bf16 %v4374_v33  ;;  %v4186_v47 = vpack.c.bf16 %v1279_v38, %v1278_v35  ;;  %v1027_v48 = vadd.f32 %v5498_v41, %v764_v40 }
 0x107   :  { %v1282_v49 = vmax.f32 %v1026_v1, 0.0  ;;  %v3577_v50 = vunpack.c.h.bf16 %v4374_v33  ;;  %v766_v53 = vmul.f32 %v5504_v13, %v3573_v43  ;;  %v1028_v54 = vadd.f32 %v5498_v41, %v765_v44 }
 0x108   :  { %v4191_v52 = vpack.c.bf16 %v1281_v7, %v1280_v39  ;;  %v767_v55 = vmul.f32 %v5504_v13, %v3576_v45  ;;  %4497 = vst [vmem:[%s5849_s3 + $0x388] sm:$0xff] %v4186_v47   ;;  %v1283_v56 = vmax.f32 %v1027_v48, 0.0  ;;  %v3580_v58 = vunpack.c.l.bf16 %v4375_v46  ;;  %v4381_v7 = vld [vmem:[%s5846_s0 + $0x3e0] sm:$0xff]  }
 0x109   :  { %v768_v57 = vmul.f32 %v5504_v13, %v3577_v50  ;;  %v3581_v59 = vunpack.c.h.bf16 %v4375_v46  ;;  %v1029_v60 = vadd.f32 %v5498_v41, %v766_v53  ;;  %v1284_v61 = vmax.f32 %v1028_v54, 0.0 }
 0x10a   :  { %4498 = vst [vmem:[%s5849_s3 + $0x390] sm:$0xff] %v4191_v52   ;;  %v1030_v62 = vadd.f32 %v5498_v41, %v767_v55  ;;  %v3584_v63 = vunpack.c.l.bf16 %v4376_v51  ;;  %v4196_v2 = vpack.c.bf16 %v1283_v56, %v1282_v49  ;;  %v769_v4 = vmul.f32 %v5504_v13, %v3580_v58 }
 0x10b   :  { %v1031_v3 = vadd.f32 %v5498_v41, %v768_v57  ;;  %v770_v5 = vmul.f32 %v5504_v13, %v3581_v59  ;;  %v1285_v6 = vmax.f32 %v1029_v60, 0.0  ;;  %v3585_v9 = vunpack.c.h.bf16 %v4376_v51  ;;  %v4382_v51 = vld [vmem:[%s5846_s0 + $0x3e8] sm:$0xff]  }
 0x10c   :  { %v1286_v8 = vmax.f32 %v1030_v62, 0.0  ;;  %v771_v10 = vmul.f32 %v5504_v13, %v3584_v63  ;;  %4499 = vst [vmem:[%s5849_s3 + $0x398] sm:$0xff] %v4196_v2   ;;  %v1032_v12 = vadd.f32 %v5498_v41, %v769_v4  ;;  %v3588_v14 = vunpack.c.l.bf16 %v4377_v0 }
 0x10d   :  { %v1287_v11 = vmax.f32 %v1031_v3, 0.0  ;;  %v1033_v42 = vadd.f32 %v5498_v41, %v770_v5  ;;  %v4201_v16 = vpack.c.bf16 %v1285_v6, %v1284_v61  ;;  %v772_v17 = vmul.f32 %v5504_v13, %v3585_v9  ;;  %v4384_v6 = vld [vmem:[%s5846_s0 + $0x3f8] sm:$0xff]  }
 0x10e   :  { %v1034_v18 = vadd.f32 %v5498_v41, %v771_v10  ;;  %v3589_v19 = vunpack.c.h.bf16 %v4377_v0  ;;  %v1288_v22 = vmax.f32 %v1032_v12, 0.0  ;;  %v773_v24 = vmul.f32 %v5504_v13, %v3588_v14  ;;  %v4383_v0 = vld [vmem:[%s5846_s0 + $0x3f0] sm:$0xff]  }
 0x10f   :  { %v4206_v21 = vpack.c.bf16 %v1287_v11, %v1286_v8  ;;  %v1289_v23 = vmax.f32 %v1033_v42, 0.0  ;;  %4500 = vst [vmem:[%s5849_s3 + $0x3a0] sm:$0xff] %v4201_v16   ;;  %v1035_v25 = vadd.f32 %v5498_v41, %v772_v17  ;;  %v3592_v28 = vunpack.c.l.bf16 %v4378_v15 }
 0x110   :  { %v1290_v26 = vmax.f32 %v1034_v18, 0.0  ;;  %v774_v27 = vmul.f32 %v5504_v13, %v3589_v19  ;;  %v1036_v31 = vadd.f32 %v5498_v41, %v773_v24  ;;  %v3593_v32 = vunpack.c.h.bf16 %v4378_v15 }
 0x111   :  { %4501 = vst [vmem:[%s5849_s3 + $0x3a8] sm:$0xff] %v4206_v21   ;;  %v4211_v30 = vpack.c.bf16 %v1289_v23, %v1288_v22  ;;  %v3596_v33 = vunpack.c.l.bf16 %v4379_v20  ;;  %v1291_v34 = vmax.f32 %v1035_v25, 0.0  ;;  %v775_v36 = vmul.f32 %v5504_v13, %v3592_v28 }
 0x112   :  { %v1037_v35 = vadd.f32 %v5498_v41, %v774_v27  ;;  %v3597_v37 = vunpack.c.h.bf16 %v4379_v20  ;;  %v1292_v38 = vmax.f32 %v1036_v31, 0.0  ;;  %v776_v39 = vmul.f32 %v5504_v13, %v3593_v32 }
 0x113   :  { %4502 = vst [vmem:[%s5849_s3 + $0x3b0] sm:$0xff] %v4211_v30   ;;  %v777_v40 = vmul.f32 %v5504_v13, %v3596_v33  ;;  %v3600_v1 = vunpack.c.l.bf16 %v4380_v29  ;;  %v4216_v43 = vpack.c.bf16 %v1291_v34, %v1290_v26  ;;  %v1038_v45 = vadd.f32 %v5498_v41, %v775_v36 }
 0x114   :  { %v1293_v44 = vmax.f32 %v1037_v35, 0.0  ;;  %v778_v46 = vmul.f32 %v5504_v13, %v3597_v37  ;;  %v1039_v47 = vadd.f32 %v5498_v41, %v776_v39  ;;  %v3601_v49 = vunpack.c.h.bf16 %v4380_v29 }
 0x115   :  { %v1040_v48 = vadd.f32 %v5498_v41, %v777_v40  ;;  %v779_v50 = vmul.f32 %v5504_v13, %v3600_v1  ;;  %4503 = vst [vmem:[%s5849_s3 + $0x3b8] sm:$0xff] %v4216_v43   ;;  %v1294_v53 = vmax.f32 %v1038_v45, 0.0  ;;  %v3604_v55 = vunpack.c.l.bf16 %v4381_v7 }
 0x116   :  { %v4221_v52 = vpack.c.bf16 %v1293_v44, %v1292_v38  ;;  %v1041_v54 = vadd.f32 %v5498_v41, %v778_v46  ;;  %v1295_v56 = vmax.f32 %v1039_v47, 0.0  ;;  %v780_v58 = vmul.f32 %v5504_v13, %v3601_v49 }
 0x117   :  { %v1296_v57 = vmax.f32 %v1040_v48, 0.0  ;;  %v1042_v59 = vadd.f32 %v5498_v41, %v779_v50  ;;  %v3605_v61 = vunpack.c.h.bf16 %v4381_v7  ;;  %v781_v62 = vmul.f32 %v5504_v13, %v3604_v55 }
 0x118   :  { %4504 = vst [vmem:[%s5849_s3 + $0x3c0] sm:$0xff] %v4221_v52   ;;  %v1297_v60 = vmax.f32 %v1041_v54, 0.0  ;;  %v3608_v63 = vunpack.c.l.bf16 %v4382_v51  ;;  %v4226_v2 = vpack.c.bf16 %v1295_v56, %v1294_v53  ;;  %v1043_v3 = vadd.f32 %v5498_v41, %v780_v58 }
 0x119   :  { %v1298_v4 = vmax.f32 %v1042_v59, 0.0  ;;  %v3609_v5 = vunpack.c.h.bf16 %v4382_v51  ;;  %v782_v9 = vmul.f32 %v5504_v13, %v3605_v61  ;;  %v1044_v10 = vadd.f32 %v5498_v41, %v781_v62 }
 0x11a   :  { %v4231_v8 = vpack.c.bf16 %v1297_v60, %v1296_v57  ;;  %v783_v11 = vmul.f32 %v5504_v13, %v3608_v63  ;;  %4505 = vst [vmem:[%s5849_s3 + $0x3c8] sm:$0xff] %v4226_v2   ;;  %v1299_v12 = vmax.f32 %v1043_v3, 0.0  ;;  %v3612_v14 = vunpack.c.l.bf16 %v4383_v0 }
 0x11b   :  { %v784_v42 = vmul.f32 %v5504_v13, %v3609_v5  ;;  %v3613_v15 = vunpack.c.h.bf16 %v4383_v0  ;;  %v1045_v16 = vadd.f32 %v5498_v41, %v782_v9  ;;  %v1300_v17 = vmax.f32 %v1044_v10, 0.0 }
 0x11c   :  { %4506 = vst [vmem:[%s5849_s3 + $0x3d0] sm:$0xff] %v4231_v8   ;;  %v1046_v18 = vadd.f32 %v5498_v41, %v783_v11  ;;  %v3616_v19 = vunpack.c.l.bf16 %v4384_v6  ;;  %v4236_v20 = vpack.c.bf16 %v1299_v12, %v1298_v4  ;;  %v785_v22 = vmul.f32 %v5504_v13, %v3612_v14 }
 0x11d   :  { %v1047_v21 = vadd.f32 %v5498_v41, %v784_v42  ;;  %v786_v23 = vmul.f32 %v5504_v13, %v3613_v15  ;;  %v1301_v24 = vmax.f32 %v1045_v16, 0.0  ;;  %v3617_v26 = vunpack.c.h.bf16 %v4384_v6 }
 0x11e   :  { %v1302_v25 = vmax.f32 %v1046_v18, 0.0  ;;  %v787_v27 = vmul.f32 %v5504_v13, %v3616_v19  ;;  %4507 = vst [vmem:[%s5849_s3 + $0x3d8] sm:$0xff] %v4236_v20   ;;  %v1048_v29 = vadd.f32 %v5498_v41, %v785_v22 }
 0x11f   :  { %v1303_v28 = vmax.f32 %v1047_v21, 0.0  ;;  %v1049_v30 = vadd.f32 %v5498_v41, %v786_v23  ;;  %v4241_v31 = vpack.c.bf16 %v1301_v24, %v1300_v17  ;;  %v788_v32 = vmul.f32 %v5504_v13, %v3617_v26 }
 0x120   :  { %v1050_v33 = vadd.f32 %v5498_v41, %v787_v27  ;;  %v1304_v35 = vmax.f32 %v1048_v29, 0.0 }
 0x121   :  { %v4246_v34 = vpack.c.bf16 %v1303_v28, %v1302_v25  ;;  %v1305_v36 = vmax.f32 %v1049_v30, 0.0  ;;  %4508 = vst [vmem:[%s5849_s3 + $0x3e0] sm:$0xff] %v4241_v31   ;;  %v1051_v37 = vadd.f32 %v5498_v41, %v788_v32 }
 0x122   :  { %v1306_v38 = vmax.f32 %v1050_v33, 0.0 }
 0x123   :  { %4509 = vst [vmem:[%s5849_s3 + $0x3e8] sm:$0xff] %v4246_v34   ;;  %v4251_v39 = vpack.c.bf16 %v1305_v36, %v1304_v35  ;;  %v1307_v40 = vmax.f32 %v1051_v37, 0.0 }
 0x125   :  { %4510 = vst [vmem:[%s5849_s3 + $0x3f0] sm:$0xff] %v4251_v39   ;;  %v4256_v13 = vpack.c.bf16 %v1307_v40, %v1306_v38 }
 0x127   :  { %4511 = vst [vmem:[%s5849_s3 + $0x3f8] sm:$0xff] %v4256_v13  }

</bundles_post_ra>
